<compile_context>
chip_gen: v7x
topology: tpu7x:2x2x1
jax: 0.10.0
libtpu: 0.0.40
codegen_flags: <defaults>
</compile_context>

<pallas_src>
import numpy as np
import jax
import jax.numpy as jnp
from jax.experimental import pallas as pl
from jax.experimental.pallas import tpu as pltpu

# fixed sizes implied by the module
NUM_CHANNELS = 2
CONV_OUT = 16
KERNEL = 2
SEQ_IN = 100                          # input length
CONV_LEN = SEQ_IN - KERNEL + 1        # 99
POOL_LEN = (CONV_LEN - 2) // 2 + 1    # 49  (MaxPool1d(2) drops the last element)
LSTM_IN = POOL_LEN                    # 49  == LSTM input_size
HIDDEN = 10
SEQ_LSTM = CONV_OUT                   # 16 timesteps (channel axis becomes seq axis)
CLASSES = 2

# ---- packed parameter slab layout (rows x 40 f32 columns, 8-row aligned) ------
SLAB_COLS = 4 * HIDDEN                # 40
OFF_WXE = 0                           # (100, 40) zero-interleaved x-side gate weights
OFF_WH = 104                          # (10, 40)  recurrent gate weights  (i,f,o,g)
OFF_BIAS = 120                        # (1, 40)   b_ih + b_hh             (i,f,o,g)
OFF_CONV = 128                        # (16, 5)   conv taps (c0t0,c1t0,c0t1,c1t1) + bias
OFF_HC0 = 144                         # (2, 10)   h_0 ; c_0
OFF_FC = 152                          # (10, 2)   fc_w.T
OFF_BFC = 168                         # (1, 2)    fc_b
SLAB_ROWS = 176


def _tree_sum(vals):
    """Balanced pairwise sum of a Python list of same-shape arrays."""
    while len(vals) > 1:
        nxt = [vals[i] + vals[i + 1] for i in range(0, len(vals) - 1, 2)]
        if len(vals) % 2:
            nxt.append(vals[-1])
        vals = nxt
    return vals[0]


def _deepconvlstm_kernel(x_ref, p_ref, out_ref):
    # ---- inputs ---------------------------------------------------------------
    x = x_ref[...]                                               # (2, 100)
    # x_next[:, j] = x[:, j+1]; last column zero (finite -> NaN-safe with the
    # zero rows of the folded pooling weights below).
    x_next = jnp.concatenate(
        [x[:, 1:], jnp.zeros((NUM_CHANNELS, 1), jnp.float32)], axis=1)

    # ---- Conv1d(2 -> 16, kernel=2) as 4 rank-1 broadcast FMAs (VPU only) ------
    convp = p_ref[OFF_CONV:OFF_CONV + CONV_OUT, 0:5]             # (16, 5)
    conv_full = (convp[:, 0:1] * x[0:1, :] + convp[:, 1:2] * x[1:2, :]
                 + convp[:, 2:3] * x_next[0:1, :] + convp[:, 3:4] * x_next[1:2, :]
                 + convp[:, 4:5])                                # (16, 100); col 99 junk (finite)

    # ---- ReLU + MaxPool1d(2) -------------------------------------------------
    relu = jnp.maximum(conv_full, 0.0)                           # (16, 100)
    relu_next = jnp.concatenate(
        [relu[:, 1:], jnp.zeros((CONV_OUT, 1), jnp.float32)], axis=1)
    # pooled_full[:, 2k] == pooled[:, k]; odd / tail columns are killed by the
    # zero rows of the WXE slab section, so no stride-2 lane slice is needed.
    pooled_full = jnp.maximum(relu, relu_next)                   # (16, 100)

    # ---- Hoisted x-side gate matmul: one (16,100)@(100,40) on the MXU ---------
    wxe = p_ref[OFF_WXE:OFF_WXE + SEQ_IN, :]                     # (100, 40)
    bias = p_ref[OFF_BIAS:OFF_BIAS + 1, :]                       # (1, 40)
    gate_x = jnp.dot(pooled_full, wxe,
                     preferred_element_type=jnp.float32) + bias  # (16, 40) cols = i|f|o|g

    # ---- LSTM(input=49, hidden=10), 16 steps, fully unrolled, MXU-free --------
    wh = p_ref[OFF_WH:OFF_WH + HIDDEN, :]                        # (10, 40)
    wh_rows = [wh[k:k + 1, :] for k in range(HIDDEN)]            # hoisted (1,40) rows
    gx_rows = [gate_x[t:t + 1, :] for t in range(SEQ_LSTM)]      # hoisted row extracts

    hc0 = p_ref[OFF_HC0:OFF_HC0 + 2, 0:HIDDEN]                   # (2, 10)
    h = hc0[0:1, :]                                              # (1, 10)
    c = hc0[1:2, :]                                              # (1, 10)

    for t in range(SEQ_LSTM):                                    # static unroll
        # recurrent matvec as 10 lane-broadcast multiplies + balanced add tree
        terms = [gx_rows[t]] + [h[:, k:k + 1] * wh_rows[k] for k in range(HIDDEN)]
        gates = _tree_sum(terms)                                 # (1, 40)
        ifo = jax.nn.sigmoid(gates[:, 0:3 * HIDDEN])             # one 30-lane sigmoid
        g = jnp.tanh(gates[:, 3 * HIDDEN:4 * HIDDEN])            # one 10-lane tanh
        i_g = ifo[:, 0:HIDDEN]
        f_g = ifo[:, HIDDEN:2 * HIDDEN]
        o_g = ifo[:, 2 * HIDDEN:3 * HIDDEN]
        c = f_g * c + i_g * g
        h = o_g * jnp.tanh(c)

    # ---- Dropout(p=0.2): identity in eval/inference mode ----------------------
    # ---- Linear(10 -> 2) via broadcast FMAs (no trailing MXU fill) -------------
    wfc = p_ref[OFF_FC:OFF_FC + HIDDEN, 0:CLASSES]               # (10, 2)
    bfc = p_ref[OFF_BFC:OFF_BFC + 1, 0:CLASSES]                  # (1, 2)
    fterms = [bfc] + [h[:, k:k + 1] * wfc[k:k + 1, :] for k in range(HIDDEN)]
    out_ref[...] = _tree_sum(fterms)                             # (1, 2)


def prepare_params(params):
    """One-time host-side packing of all constant parameters into one f32 slab."""
    conv_w, conv_b, w_ih, w_hh, b_ih, b_hh, h0, c0, fc_w, fc_b = (
        np.asarray(p, dtype=np.float32) for p in params)

    # PyTorch gate order (i, f, g, o) -> (i, f, o, g) so sigmoid covers 30 lanes.
    perm = np.concatenate([np.arange(0, HIDDEN),
                           np.arange(HIDDEN, 2 * HIDDEN),
                           np.arange(3 * HIDDEN, 4 * HIDDEN),
                           np.arange(2 * HIDDEN, 3 * HIDDEN)])
    wx = w_ih[perm].T                            # (49, 40)
    wh = w_hh[perm].T                            # (10, 40)
    bias = (b_ih + b_hh)[perm]                   # (40,)

    slab = np.zeros((SLAB_ROWS, SLAB_COLS), np.float32)

    # Fold the MaxPool even-column selection into the x-side weights:
    # row 2k of WXE = wx[k]; odd rows and rows 97..99 stay zero.
    slab[OFF_WXE:OFF_WXE + 2 * POOL_LEN:2, :] = wx
    slab[OFF_WH:OFF_WH + HIDDEN, :] = wh
    slab[OFF_BIAS, :] = bias
    # Conv taps: cols (ch0 tap0, ch1 tap0, ch0 tap1, ch1 tap1, bias).
    slab[OFF_CONV:OFF_CONV + CONV_OUT, 0] = conv_w[:, 0, 0]
    slab[OFF_CONV:OFF_CONV + CONV_OUT, 1] = conv_w[:, 1, 0]
    slab[OFF_CONV:OFF_CONV + CONV_OUT, 2] = conv_w[:, 0, 1]
    slab[OFF_CONV:OFF_CONV + CONV_OUT, 3] = conv_w[:, 1, 1]
    slab[OFF_CONV:OFF_CONV + CONV_OUT, 4] = conv_b
    slab[OFF_HC0, 0:HIDDEN] = h0[0, 0]
    slab[OFF_HC0 + 1, 0:HIDDEN] = c0[0, 0]
    slab[OFF_FC:OFF_FC + HIDDEN, 0:CLASSES] = fc_w.T
    slab[OFF_BFC, 0:CLASSES] = fc_b
    return jnp.asarray(slab)


_COST = pl.CostEstimate(
    flops=2 * (CONV_OUT * SEQ_IN * 2 * NUM_CHANNELS           # conv FMAs
               + CONV_OUT * SEQ_IN * 4 * HIDDEN               # hoisted gate_x matmul
               + SEQ_LSTM * HIDDEN * 4 * HIDDEN               # recurrent FMAs
               + HIDDEN * CLASSES),                           # fc
    transcendentals=SEQ_LSTM * 5 * HIDDEN,                    # sigmoid + 2x tanh
    bytes_accessed=4 * (NUM_CHANNELS * SEQ_IN + SLAB_ROWS * SLAB_COLS + CLASSES))

_VMEM = pl.BlockSpec(memory_space=pltpu.MemorySpace.VMEM)


@jax.jit
def deepconvlstm_forward(x, slab):
    """x: (1, NUM_CHANNELS, SEQ_IN) float32 (PyTorch NCL). slab: prepare_params(...)."""
    x2d = x[0].astype(jnp.float32)                               # (2, 100)
    return pl.pallas_call(
        _deepconvlstm_kernel,
        out_shape=jax.ShapeDtypeStruct((1, CLASSES), jnp.float32),
        in_specs=[_VMEM, _VMEM],
        out_specs=_VMEM,
        cost_estimate=_COST,
    )(x2d, slab)


def reference_forward(x, params):
    """Pure-JAX reference mirroring the PyTorch forward (eval mode)."""
    conv_w, conv_b, w_ih, w_hh, b_ih, b_hh, h0, c0, fc_w, fc_b = params
    x2d = x[0]
    conv = (conv_w[:, :, 0] @ x2d[:, :-1] + conv_w[:, :, 1] @ x2d[:, 1:]
            + conv_b[:, None])                                   # (16, 99)
    relu = jnp.maximum(conv, 0.0)
    pooled = jnp.maximum(relu[:, 0:2 * POOL_LEN:2],
                         relu[:, 1:2 * POOL_LEN:2])              # (16, 49)
    h, c = h0[0], c0[0]                                          # (1, 10)
    for t in range(SEQ_LSTM):
        xt = pooled[t:t + 1]                                     # (1, 49)
        gates = xt @ w_ih.T + h @ w_hh.T + b_ih + b_hh
        i = jax.nn.sigmoid(gates[:, 0:HIDDEN])
        f = jax.nn.sigmoid(gates[:, HIDDEN:2 * HIDDEN])
        g = jnp.tanh(gates[:, 2 * HIDDEN:3 * HIDDEN])
        o = jax.nn.sigmoid(gates[:, 3 * HIDDEN:4 * HIDDEN])
        c = f * c + i * g
        h = o * jnp.tanh(c)
    return h @ fc_w.T + fc_b[None, :]


if __name__ == "__main__":
    key = jax.random.PRNGKey(0)
    ks = jax.random.split(key, 11)
    params = (
        jax.random.normal(ks[0], (CONV_OUT, NUM_CHANNELS, KERNEL), jnp.float32) * 0.3,
        jax.random.normal(ks[1], (CONV_OUT,), jnp.float32) * 0.1,
        jax.random.normal(ks[2], (4 * HIDDEN, LSTM_IN), jnp.float32) * 0.15,
        jax.random.normal(ks[3], (4 * HIDDEN, HIDDEN), jnp.float32) * 0.15,
        jax.random.normal(ks[4], (4 * HIDDEN,), jnp.float32) * 0.1,
        jax.random.normal(ks[5], (4 * HIDDEN,), jnp.float32) * 0.1,
        jax.random.normal(ks[6], (1, 1, HIDDEN), jnp.float32),   # h_0
        jax.random.normal(ks[7], (1, 1, HIDDEN), jnp.float32),   # c_0
        jax.random.normal(ks[8], (CLASSES, HIDDEN), jnp.float32) * 0.3,
        jax.random.normal(ks[9], (CLASSES,), jnp.float32) * 0.1,
    )
    # batch must be 1 (h_0/c_0 are (1,1,10)); length 100 -> conv 99 -> pool 49 == LSTM input_size
    x = jax.random.normal(ks[10], (1, NUM_CHANNELS, SEQ_IN), jnp.float32)

    slab = prepare_params(params)                   # one-time parameter packing
    out = jax.block_until_ready(deepconvlstm_forward(x, slab))
    ref = reference_forward(x, params)
    assert out.shape == (1, CLASSES)
    assert jnp.allclose(out, ref, rtol=1e-3, atol=1e-3), (out, ref)
    print("KERNEL_OK")
</pallas_src>

<mosaic_0001>
module attributes {stable_mosaic.version = 11 : i64} {
  func.func @_deepconvlstm_kernel(%arg0: memref<2x100xf32, #tpu.memory_space<vmem>>, %arg1: memref<176x40xf32, #tpu.memory_space<vmem>>, %arg2: memref<1x2xf32, #tpu.memory_space<vmem>>) attributes {dimension_semantics = [], scalar_prefetch = 0 : i64, scratch_operands = 0 : i64, tpu.core_type = #tpu.core_type<tc>} {
    %c0 = arith.constant 0 : index
    %c0_0 = arith.constant 0 : index
    %0 = vector.load %arg0[%c0, %c0_0] : memref<2x100xf32, #tpu.memory_space<vmem>>, vector<2x100xf32>
    %1 = vector.extract_strided_slice %0 {offsets = [0, 1], sizes = [2, 99], strides = [1, 1]} : vector<2x100xf32> to vector<2x99xf32>
    %cst = arith.constant 0.000000e+00 : f32
    %2 = vector.broadcast %cst : f32 to vector<2x1xf32>
    %3 = tpu.concatenate %1, %2 in 1 : vector<2x99xf32>, vector<2x1xf32> -> vector<2x100xf32>
    %c128 = arith.constant 128 : index
    %c0_1 = arith.constant 0 : index
    %4 = vector.load %arg1[%c128, %c0_1] : memref<176x40xf32, #tpu.memory_space<vmem>>, vector<16x5xf32>
    %5 = vector.extract_strided_slice %4 {offsets = [0, 0], sizes = [16, 1], strides = [1, 1]} : vector<16x5xf32> to vector<16x1xf32>
    %6 = vector.extract_strided_slice %0 {offsets = [0, 0], sizes = [1, 100], strides = [1, 1]} : vector<2x100xf32> to vector<1x100xf32>
    %7 = vector.broadcast %5 : vector<16x1xf32> to vector<16x100xf32>
    %8 = vector.broadcast %6 : vector<1x100xf32> to vector<16x100xf32>
    %9 = arith.mulf %7, %8 : vector<16x100xf32>
    %10 = vector.extract_strided_slice %4 {offsets = [0, 1], sizes = [16, 1], strides = [1, 1]} : vector<16x5xf32> to vector<16x1xf32>
    %11 = vector.extract_strided_slice %0 {offsets = [1, 0], sizes = [1, 100], strides = [1, 1]} : vector<2x100xf32> to vector<1x100xf32>
    %12 = vector.broadcast %10 : vector<16x1xf32> to vector<16x100xf32>
    %13 = vector.broadcast %11 : vector<1x100xf32> to vector<16x100xf32>
    %14 = arith.mulf %12, %13 : vector<16x100xf32>
    %15 = arith.addf %9, %14 : vector<16x100xf32>
    %16 = vector.extract_strided_slice %4 {offsets = [0, 2], sizes = [16, 1], strides = [1, 1]} : vector<16x5xf32> to vector<16x1xf32>
    %17 = vector.extract_strided_slice %3 {offsets = [0, 0], sizes = [1, 100], strides = [1, 1]} : vector<2x100xf32> to vector<1x100xf32>
    %18 = vector.broadcast %16 : vector<16x1xf32> to vector<16x100xf32>
    %19 = vector.broadcast %17 : vector<1x100xf32> to vector<16x100xf32>
    %20 = arith.mulf %18, %19 : vector<16x100xf32>
    %21 = arith.addf %15, %20 : vector<16x100xf32>
    %22 = vector.extract_strided_slice %4 {offsets = [0, 3], sizes = [16, 1], strides = [1, 1]} : vector<16x5xf32> to vector<16x1xf32>
    %23 = vector.extract_strided_slice %3 {offsets = [1, 0], sizes = [1, 100], strides = [1, 1]} : vector<2x100xf32> to vector<1x100xf32>
    %24 = vector.broadcast %22 : vector<16x1xf32> to vector<16x100xf32>
    %25 = vector.broadcast %23 : vector<1x100xf32> to vector<16x100xf32>
    %26 = arith.mulf %24, %25 : vector<16x100xf32>
    %27 = arith.addf %21, %26 : vector<16x100xf32>
    %28 = vector.extract_strided_slice %4 {offsets = [0, 4], sizes = [16, 1], strides = [1, 1]} : vector<16x5xf32> to vector<16x1xf32>
    %29 = vector.broadcast %28 : vector<16x1xf32> to vector<16x100xf32>
    %30 = arith.addf %27, %29 : vector<16x100xf32>
    %cst_2 = arith.constant 0.000000e+00 : f32
    %31 = vector.broadcast %cst_2 : f32 to vector<16x100xf32>
    %32 = arith.maximumf %30, %31 : vector<16x100xf32>
    %33 = vector.extract_strided_slice %32 {offsets = [0, 1], sizes = [16, 99], strides = [1, 1]} : vector<16x100xf32> to vector<16x99xf32>
    %cst_3 = arith.constant 0.000000e+00 : f32
    %34 = vector.broadcast %cst_3 : f32 to vector<16x1xf32>
    %35 = tpu.concatenate %33, %34 in 1 : vector<16x99xf32>, vector<16x1xf32> -> vector<16x100xf32>
    %36 = arith.maximumf %32, %35 : vector<16x100xf32>
    %c0_4 = arith.constant 0 : index
    %c0_5 = arith.constant 0 : index
    %37 = vector.load %arg1[%c0_4, %c0_5] : memref<176x40xf32, #tpu.memory_space<vmem>>, vector<100x40xf32>
    %c120 = arith.constant 120 : index
    %c0_6 = arith.constant 0 : index
    %38 = vector.load %arg1[%c120, %c0_6] : memref<176x40xf32, #tpu.memory_space<vmem>>, vector<1x40xf32>
    %cst_7 = arith.constant dense<0.000000e+00> : vector<16x40xf32>
    %39 = tpu.matmul %36, %37, %cst_7 {dimension_numbers = #tpu.dot_dimension_numbers<[1], [0], [0], [1], [0, 0, 1, 1], [], []>} : vector<16x100xf32>, vector<100x40xf32>, vector<16x40xf32> -> vector<16x40xf32>
    %40 = vector.broadcast %38 : vector<1x40xf32> to vector<16x40xf32>
    %41 = arith.addf %39, %40 : vector<16x40xf32>
    %c104 = arith.constant 104 : index
    %c0_8 = arith.constant 0 : index
    %42 = vector.load %arg1[%c104, %c0_8] : memref<176x40xf32, #tpu.memory_space<vmem>>, vector<10x40xf32>
    %43 = vector.extract_strided_slice %42 {offsets = [0, 0], sizes = [1, 40], strides = [1, 1]} : vector<10x40xf32> to vector<1x40xf32>
    %44 = vector.extract_strided_slice %42 {offsets = [1, 0], sizes = [1, 40], strides = [1, 1]} : vector<10x40xf32> to vector<1x40xf32>
    %45 = vector.extract_strided_slice %42 {offsets = [2, 0], sizes = [1, 40], strides = [1, 1]} : vector<10x40xf32> to vector<1x40xf32>
    %46 = vector.extract_strided_slice %42 {offsets = [3, 0], sizes = [1, 40], strides = [1, 1]} : vector<10x40xf32> to vector<1x40xf32>
    %47 = vector.extract_strided_slice %42 {offsets = [4, 0], sizes = [1, 40], strides = [1, 1]} : vector<10x40xf32> to vector<1x40xf32>
    %48 = vector.extract_strided_slice %42 {offsets = [5, 0], sizes = [1, 40], strides = [1, 1]} : vector<10x40xf32> to vector<1x40xf32>
    %49 = vector.extract_strided_slice %42 {offsets = [6, 0], sizes = [1, 40], strides = [1, 1]} : vector<10x40xf32> to vector<1x40xf32>
    %50 = vector.extract_strided_slice %42 {offsets = [7, 0], sizes = [1, 40], strides = [1, 1]} : vector<10x40xf32> to vector<1x40xf32>
    %51 = vector.extract_strided_slice %42 {offsets = [8, 0], sizes = [1, 40], strides = [1, 1]} : vector<10x40xf32> to vector<1x40xf32>
    %52 = vector.extract_strided_slice %42 {offsets = [9, 0], sizes = [1, 40], strides = [1, 1]} : vector<10x40xf32> to vector<1x40xf32>
    %53 = vector.extract_strided_slice %41 {offsets = [0, 0], sizes = [1, 40], strides = [1, 1]} : vector<16x40xf32> to vector<1x40xf32>
    %54 = vector.extract_strided_slice %41 {offsets = [1, 0], sizes = [1, 40], strides = [1, 1]} : vector<16x40xf32> to vector<1x40xf32>
    %55 = vector.extract_strided_slice %41 {offsets = [2, 0], sizes = [1, 40], strides = [1, 1]} : vector<16x40xf32> to vector<1x40xf32>
    %56 = vector.extract_strided_slice %41 {offsets = [3, 0], sizes = [1, 40], strides = [1, 1]} : vector<16x40xf32> to vector<1x40xf32>
    %57 = vector.extract_strided_slice %41 {offsets = [4, 0], sizes = [1, 40], strides = [1, 1]} : vector<16x40xf32> to vector<1x40xf32>
    %58 = vector.extract_strided_slice %41 {offsets = [5, 0], sizes = [1, 40], strides = [1, 1]} : vector<16x40xf32> to vector<1x40xf32>
    %59 = vector.extract_strided_slice %41 {offsets = [6, 0], sizes = [1, 40], strides = [1, 1]} : vector<16x40xf32> to vector<1x40xf32>
    %60 = vector.extract_strided_slice %41 {offsets = [7, 0], sizes = [1, 40], strides = [1, 1]} : vector<16x40xf32> to vector<1x40xf32>
    %61 = vector.extract_strided_slice %41 {offsets = [8, 0], sizes = [1, 40], strides = [1, 1]} : vector<16x40xf32> to vector<1x40xf32>
    %62 = vector.extract_strided_slice %41 {offsets = [9, 0], sizes = [1, 40], strides = [1, 1]} : vector<16x40xf32> to vector<1x40xf32>
    %63 = vector.extract_strided_slice %41 {offsets = [10, 0], sizes = [1, 40], strides = [1, 1]} : vector<16x40xf32> to vector<1x40xf32>
    %64 = vector.extract_strided_slice %41 {offsets = [11, 0], sizes = [1, 40], strides = [1, 1]} : vector<16x40xf32> to vector<1x40xf32>
    %65 = vector.extract_strided_slice %41 {offsets = [12, 0], sizes = [1, 40], strides = [1, 1]} : vector<16x40xf32> to vector<1x40xf32>
    %66 = vector.extract_strided_slice %41 {offsets = [13, 0], sizes = [1, 40], strides = [1, 1]} : vector<16x40xf32> to vector<1x40xf32>
    %67 = vector.extract_strided_slice %41 {offsets = [14, 0], sizes = [1, 40], strides = [1, 1]} : vector<16x40xf32> to vector<1x40xf32>
    %68 = vector.extract_strided_slice %41 {offsets = [15, 0], sizes = [1, 40], strides = [1, 1]} : vector<16x40xf32> to vector<1x40xf32>
    %c144 = arith.constant 144 : index
    %c0_9 = arith.constant 0 : index
    %69 = vector.load %arg1[%c144, %c0_9] : memref<176x40xf32, #tpu.memory_space<vmem>>, vector<2x10xf32>
    %70 = vector.extract_strided_slice %69 {offsets = [0, 0], sizes = [1, 10], strides = [1, 1]} : vector<2x10xf32> to vector<1x10xf32>
    %71 = vector.extract_strided_slice %69 {offsets = [1, 0], sizes = [1, 10], strides = [1, 1]} : vector<2x10xf32> to vector<1x10xf32>
    %72 = vector.extract_strided_slice %70 {offsets = [0, 0], sizes = [1, 1], strides = [1, 1]} : vector<1x10xf32> to vector<1x1xf32>
    %73 = vector.broadcast %72 : vector<1x1xf32> to vector<1x40xf32>
    %74 = arith.mulf %73, %43 : vector<1x40xf32>
    %75 = vector.extract_strided_slice %70 {offsets = [0, 1], sizes = [1, 1], strides = [1, 1]} : vector<1x10xf32> to vector<1x1xf32>
    %76 = vector.broadcast %75 : vector<1x1xf32> to vector<1x40xf32>
    %77 = arith.mulf %76, %44 : vector<1x40xf32>
    %78 = vector.extract_strided_slice %70 {offsets = [0, 2], sizes = [1, 1], strides = [1, 1]} : vector<1x10xf32> to vector<1x1xf32>
    %79 = vector.broadcast %78 : vector<1x1xf32> to vector<1x40xf32>
    %80 = arith.mulf %79, %45 : vector<1x40xf32>
    %81 = vector.extract_strided_slice %70 {offsets = [0, 3], sizes = [1, 1], strides = [1, 1]} : vector<1x10xf32> to vector<1x1xf32>
    %82 = vector.broadcast %81 : vector<1x1xf32> to vector<1x40xf32>
    %83 = arith.mulf %82, %46 : vector<1x40xf32>
    %84 = vector.extract_strided_slice %70 {offsets = [0, 4], sizes = [1, 1], strides = [1, 1]} : vector<1x10xf32> to vector<1x1xf32>
    %85 = vector.broadcast %84 : vector<1x1xf32> to vector<1x40xf32>
    %86 = arith.mulf %85, %47 : vector<1x40xf32>
    %87 = vector.extract_strided_slice %70 {offsets = [0, 5], sizes = [1, 1], strides = [1, 1]} : vector<1x10xf32> to vector<1x1xf32>
    %88 = vector.broadcast %87 : vector<1x1xf32> to vector<1x40xf32>
    %89 = arith.mulf %88, %48 : vector<1x40xf32>
    %90 = vector.extract_strided_slice %70 {offsets = [0, 6], sizes = [1, 1], strides = [1, 1]} : vector<1x10xf32> to vector<1x1xf32>
    %91 = vector.broadcast %90 : vector<1x1xf32> to vector<1x40xf32>
    %92 = arith.mulf %91, %49 : vector<1x40xf32>
    %93 = vector.extract_strided_slice %70 {offsets = [0, 7], sizes = [1, 1], strides = [1, 1]} : vector<1x10xf32> to vector<1x1xf32>
    %94 = vector.broadcast %93 : vector<1x1xf32> to vector<1x40xf32>
    %95 = arith.mulf %94, %50 : vector<1x40xf32>
    %96 = vector.extract_strided_slice %70 {offsets = [0, 8], sizes = [1, 1], strides = [1, 1]} : vector<1x10xf32> to vector<1x1xf32>
    %97 = vector.broadcast %96 : vector<1x1xf32> to vector<1x40xf32>
    %98 = arith.mulf %97, %51 : vector<1x40xf32>
    %99 = vector.extract_strided_slice %70 {offsets = [0, 9], sizes = [1, 1], strides = [1, 1]} : vector<1x10xf32> to vector<1x1xf32>
    %100 = vector.broadcast %99 : vector<1x1xf32> to vector<1x40xf32>
    %101 = arith.mulf %100, %52 : vector<1x40xf32>
    %102 = arith.addf %53, %74 : vector<1x40xf32>
    %103 = arith.addf %77, %80 : vector<1x40xf32>
    %104 = arith.addf %83, %86 : vector<1x40xf32>
    %105 = arith.addf %89, %92 : vector<1x40xf32>
    %106 = arith.addf %95, %98 : vector<1x40xf32>
    %107 = arith.addf %102, %103 : vector<1x40xf32>
    %108 = arith.addf %104, %105 : vector<1x40xf32>
    %109 = arith.addf %106, %101 : vector<1x40xf32>
    %110 = arith.addf %107, %108 : vector<1x40xf32>
    %111 = arith.addf %110, %109 : vector<1x40xf32>
    %112 = vector.extract_strided_slice %111 {offsets = [0, 0], sizes = [1, 30], strides = [1, 1]} : vector<1x40xf32> to vector<1x30xf32>
    %113 = arith.negf %112 : vector<1x30xf32>
    %114 = math.exp %113 : vector<1x30xf32>
    %cst_10 = arith.constant 1.000000e+00 : f32
    %115 = vector.broadcast %cst_10 : f32 to vector<1x30xf32>
    %116 = arith.addf %115, %114 : vector<1x30xf32>
    %117 = arith.divf %115, %116 : vector<1x30xf32>
    %118 = vector.extract_strided_slice %111 {offsets = [0, 30], sizes = [1, 10], strides = [1, 1]} : vector<1x40xf32> to vector<1x10xf32>
    %119 = math.tanh %118 : vector<1x10xf32>
    %120 = vector.extract_strided_slice %117 {offsets = [0, 0], sizes = [1, 10], strides = [1, 1]} : vector<1x30xf32> to vector<1x10xf32>
    %121 = vector.extract_strided_slice %117 {offsets = [0, 10], sizes = [1, 10], strides = [1, 1]} : vector<1x30xf32> to vector<1x10xf32>
    %122 = vector.extract_strided_slice %117 {offsets = [0, 20], sizes = [1, 10], strides = [1, 1]} : vector<1x30xf32> to vector<1x10xf32>
    %123 = arith.mulf %121, %71 : vector<1x10xf32>
    %124 = arith.mulf %120, %119 : vector<1x10xf32>
    %125 = arith.addf %123, %124 : vector<1x10xf32>
    %126 = math.tanh %125 : vector<1x10xf32>
    %127 = arith.mulf %122, %126 : vector<1x10xf32>
    %128 = vector.extract_strided_slice %127 {offsets = [0, 0], sizes = [1, 1], strides = [1, 1]} : vector<1x10xf32> to vector<1x1xf32>
    %129 = vector.broadcast %128 : vector<1x1xf32> to vector<1x40xf32>
    %130 = arith.mulf %129, %43 : vector<1x40xf32>
    %131 = vector.extract_strided_slice %127 {offsets = [0, 1], sizes = [1, 1], strides = [1, 1]} : vector<1x10xf32> to vector<1x1xf32>
    %132 = vector.broadcast %131 : vector<1x1xf32> to vector<1x40xf32>
    %133 = arith.mulf %132, %44 : vector<1x40xf32>
    %134 = vector.extract_strided_slice %127 {offsets = [0, 2], sizes = [1, 1], strides = [1, 1]} : vector<1x10xf32> to vector<1x1xf32>
    %135 = vector.broadcast %134 : vector<1x1xf32> to vector<1x40xf32>
    %136 = arith.mulf %135, %45 : vector<1x40xf32>
    %137 = vector.extract_strided_slice %127 {offsets = [0, 3], sizes = [1, 1], strides = [1, 1]} : vector<1x10xf32> to vector<1x1xf32>
    %138 = vector.broadcast %137 : vector<1x1xf32> to vector<1x40xf32>
    %139 = arith.mulf %138, %46 : vector<1x40xf32>
    %140 = vector.extract_strided_slice %127 {offsets = [0, 4], sizes = [1, 1], strides = [1, 1]} : vector<1x10xf32> to vector<1x1xf32>
    %141 = vector.broadcast %140 : vector<1x1xf32> to vector<1x40xf32>
    %142 = arith.mulf %141, %47 : vector<1x40xf32>
    %143 = vector.extract_strided_slice %127 {offsets = [0, 5], sizes = [1, 1], strides = [1, 1]} : vector<1x10xf32> to vector<1x1xf32>
    %144 = vector.broadcast %143 : vector<1x1xf32> to vector<1x40xf32>
    %145 = arith.mulf %144, %48 : vector<1x40xf32>
    %146 = vector.extract_strided_slice %127 {offsets = [0, 6], sizes = [1, 1], strides = [1, 1]} : vector<1x10xf32> to vector<1x1xf32>
    %147 = vector.broadcast %146 : vector<1x1xf32> to vector<1x40xf32>
    %148 = arith.mulf %147, %49 : vector<1x40xf32>
    %149 = vector.extract_strided_slice %127 {offsets = [0, 7], sizes = [1, 1], strides = [1, 1]} : vector<1x10xf32> to vector<1x1xf32>
    %150 = vector.broadcast %149 : vector<1x1xf32> to vector<1x40xf32>
    %151 = arith.mulf %150, %50 : vector<1x40xf32>
    %152 = vector.extract_strided_slice %127 {offsets = [0, 8], sizes = [1, 1], strides = [1, 1]} : vector<1x10xf32> to vector<1x1xf32>
    %153 = vector.broadcast %152 : vector<1x1xf32> to vector<1x40xf32>
    %154 = arith.mulf %153, %51 : vector<1x40xf32>
    %155 = vector.extract_strided_slice %127 {offsets = [0, 9], sizes = [1, 1], strides = [1, 1]} : vector<1x10xf32> to vector<1x1xf32>
    %156 = vector.broadcast %155 : vector<1x1xf32> to vector<1x40xf32>
    %157 = arith.mulf %156, %52 : vector<1x40xf32>
    %158 = arith.addf %54, %130 : vector<1x40xf32>
    %159 = arith.addf %133, %136 : vector<1x40xf32>
    %160 = arith.addf %139, %142 : vector<1x40xf32>
    %161 = arith.addf %145, %148 : vector<1x40xf32>
    %162 = arith.addf %151, %154 : vector<1x40xf32>
    %163 = arith.addf %158, %159 : vector<1x40xf32>
    %164 = arith.addf %160, %161 : vector<1x40xf32>
    %165 = arith.addf %162, %157 : vector<1x40xf32>
    %166 = arith.addf %163, %164 : vector<1x40xf32>
    %167 = arith.addf %166, %165 : vector<1x40xf32>
    %168 = vector.extract_strided_slice %167 {offsets = [0, 0], sizes = [1, 30], strides = [1, 1]} : vector<1x40xf32> to vector<1x30xf32>
    %169 = arith.negf %168 : vector<1x30xf32>
    %170 = math.exp %169 : vector<1x30xf32>
    %cst_11 = arith.constant 1.000000e+00 : f32
    %171 = vector.broadcast %cst_11 : f32 to vector<1x30xf32>
    %172 = arith.addf %171, %170 : vector<1x30xf32>
    %173 = arith.divf %171, %172 : vector<1x30xf32>
    %174 = vector.extract_strided_slice %167 {offsets = [0, 30], sizes = [1, 10], strides = [1, 1]} : vector<1x40xf32> to vector<1x10xf32>
    %175 = math.tanh %174 : vector<1x10xf32>
    %176 = vector.extract_strided_slice %173 {offsets = [0, 0], sizes = [1, 10], strides = [1, 1]} : vector<1x30xf32> to vector<1x10xf32>
    %177 = vector.extract_strided_slice %173 {offsets = [0, 10], sizes = [1, 10], strides = [1, 1]} : vector<1x30xf32> to vector<1x10xf32>
    %178 = vector.extract_strided_slice %173 {offsets = [0, 20], sizes = [1, 10], strides = [1, 1]} : vector<1x30xf32> to vector<1x10xf32>
    %179 = arith.mulf %177, %125 : vector<1x10xf32>
    %180 = arith.mulf %176, %175 : vector<1x10xf32>
    %181 = arith.addf %179, %180 : vector<1x10xf32>
    %182 = math.tanh %181 : vector<1x10xf32>
    %183 = arith.mulf %178, %182 : vector<1x10xf32>
    %184 = vector.extract_strided_slice %183 {offsets = [0, 0], sizes = [1, 1], strides = [1, 1]} : vector<1x10xf32> to vector<1x1xf32>
    %185 = vector.broadcast %184 : vector<1x1xf32> to vector<1x40xf32>
    %186 = arith.mulf %185, %43 : vector<1x40xf32>
    %187 = vector.extract_strided_slice %183 {offsets = [0, 1], sizes = [1, 1], strides = [1, 1]} : vector<1x10xf32> to vector<1x1xf32>
    %188 = vector.broadcast %187 : vector<1x1xf32> to vector<1x40xf32>
    %189 = arith.mulf %188, %44 : vector<1x40xf32>
    %190 = vector.extract_strided_slice %183 {offsets = [0, 2], sizes = [1, 1], strides = [1, 1]} : vector<1x10xf32> to vector<1x1xf32>
    %191 = vector.broadcast %190 : vector<1x1xf32> to vector<1x40xf32>
    %192 = arith.mulf %191, %45 : vector<1x40xf32>
    %193 = vector.extract_strided_slice %183 {offsets = [0, 3], sizes = [1, 1], strides = [1, 1]} : vector<1x10xf32> to vector<1x1xf32>
    %194 = vector.broadcast %193 : vector<1x1xf32> to vector<1x40xf32>
    %195 = arith.mulf %194, %46 : vector<1x40xf32>
    %196 = vector.extract_strided_slice %183 {offsets = [0, 4], sizes = [1, 1], strides = [1, 1]} : vector<1x10xf32> to vector<1x1xf32>
    %197 = vector.broadcast %196 : vector<1x1xf32> to vector<1x40xf32>
    %198 = arith.mulf %197, %47 : vector<1x40xf32>
    %199 = vector.extract_strided_slice %183 {offsets = [0, 5], sizes = [1, 1], strides = [1, 1]} : vector<1x10xf32> to vector<1x1xf32>
    %200 = vector.broadcast %199 : vector<1x1xf32> to vector<1x40xf32>
    %201 = arith.mulf %200, %48 : vector<1x40xf32>
    %202 = vector.extract_strided_slice %183 {offsets = [0, 6], sizes = [1, 1], strides = [1, 1]} : vector<1x10xf32> to vector<1x1xf32>
    %203 = vector.broadcast %202 : vector<1x1xf32> to vector<1x40xf32>
    %204 = arith.mulf %203, %49 : vector<1x40xf32>
    %205 = vector.extract_strided_slice %183 {offsets = [0, 7], sizes = [1, 1], strides = [1, 1]} : vector<1x10xf32> to vector<1x1xf32>
    %206 = vector.broadcast %205 : vector<1x1xf32> to vector<1x40xf32>
    %207 = arith.mulf %206, %50 : vector<1x40xf32>
    %208 = vector.extract_strided_slice %183 {offsets = [0, 8], sizes = [1, 1], strides = [1, 1]} : vector<1x10xf32> to vector<1x1xf32>
    %209 = vector.broadcast %208 : vector<1x1xf32> to vector<1x40xf32>
    %210 = arith.mulf %209, %51 : vector<1x40xf32>
    %211 = vector.extract_strided_slice %183 {offsets = [0, 9], sizes = [1, 1], strides = [1, 1]} : vector<1x10xf32> to vector<1x1xf32>
    %212 = vector.broadcast %211 : vector<1x1xf32> to vector<1x40xf32>
    %213 = arith.mulf %212, %52 : vector<1x40xf32>
    %214 = arith.addf %55, %186 : vector<1x40xf32>
    %215 = arith.addf %189, %192 : vector<1x40xf32>
    %216 = arith.addf %195, %198 : vector<1x40xf32>
    %217 = arith.addf %201, %204 : vector<1x40xf32>
    %218 = arith.addf %207, %210 : vector<1x40xf32>
    %219 = arith.addf %214, %215 : vector<1x40xf32>
    %220 = arith.addf %216, %217 : vector<1x40xf32>
    %221 = arith.addf %218, %213 : vector<1x40xf32>
    %222 = arith.addf %219, %220 : vector<1x40xf32>
    %223 = arith.addf %222, %221 : vector<1x40xf32>
    %224 = vector.extract_strided_slice %223 {offsets = [0, 0], sizes = [1, 30], strides = [1, 1]} : vector<1x40xf32> to vector<1x30xf32>
    %225 = arith.negf %224 : vector<1x30xf32>
    %226 = math.exp %225 : vector<1x30xf32>
    %cst_12 = arith.constant 1.000000e+00 : f32
    %227 = vector.broadcast %cst_12 : f32 to vector<1x30xf32>
    %228 = arith.addf %227, %226 : vector<1x30xf32>
    %229 = arith.divf %227, %228 : vector<1x30xf32>
    %230 = vector.extract_strided_slice %223 {offsets = [0, 30], sizes = [1, 10], strides = [1, 1]} : vector<1x40xf32> to vector<1x10xf32>
    %231 = math.tanh %230 : vector<1x10xf32>
    %232 = vector.extract_strided_slice %229 {offsets = [0, 0], sizes = [1, 10], strides = [1, 1]} : vector<1x30xf32> to vector<1x10xf32>
    %233 = vector.extract_strided_slice %229 {offsets = [0, 10], sizes = [1, 10], strides = [1, 1]} : vector<1x30xf32> to vector<1x10xf32>
    %234 = vector.extract_strided_slice %229 {offsets = [0, 20], sizes = [1, 10], strides = [1, 1]} : vector<1x30xf32> to vector<1x10xf32>
    %235 = arith.mulf %233, %181 : vector<1x10xf32>
    %236 = arith.mulf %232, %231 : vector<1x10xf32>
    %237 = arith.addf %235, %236 : vector<1x10xf32>
    %238 = math.tanh %237 : vector<1x10xf32>
    %239 = arith.mulf %234, %238 : vector<1x10xf32>
    %240 = vector.extract_strided_slice %239 {offsets = [0, 0], sizes = [1, 1], strides = [1, 1]} : vector<1x10xf32> to vector<1x1xf32>
    %241 = vector.broadcast %240 : vector<1x1xf32> to vector<1x40xf32>
    %242 = arith.mulf %241, %43 : vector<1x40xf32>
    %243 = vector.extract_strided_slice %239 {offsets = [0, 1], sizes = [1, 1], strides = [1, 1]} : vector<1x10xf32> to vector<1x1xf32>
    %244 = vector.broadcast %243 : vector<1x1xf32> to vector<1x40xf32>
    %245 = arith.mulf %244, %44 : vector<1x40xf32>
    %246 = vector.extract_strided_slice %239 {offsets = [0, 2], sizes = [1, 1], strides = [1, 1]} : vector<1x10xf32> to vector<1x1xf32>
    %247 = vector.broadcast %246 : vector<1x1xf32> to vector<1x40xf32>
    %248 = arith.mulf %247, %45 : vector<1x40xf32>
    %249 = vector.extract_strided_slice %239 {offsets = [0, 3], sizes = [1, 1], strides = [1, 1]} : vector<1x10xf32> to vector<1x1xf32>
    %250 = vector.broadcast %249 : vector<1x1xf32> to vector<1x40xf32>
    %251 = arith.mulf %250, %46 : vector<1x40xf32>
    %252 = vector.extract_strided_slice %239 {offsets = [0, 4], sizes = [1, 1], strides = [1, 1]} : vector<1x10xf32> to vector<1x1xf32>
    %253 = vector.broadcast %252 : vector<1x1xf32> to vector<1x40xf32>
    %254 = arith.mulf %253, %47 : vector<1x40xf32>
    %255 = vector.extract_strided_slice %239 {offsets = [0, 5], sizes = [1, 1], strides = [1, 1]} : vector<1x10xf32> to vector<1x1xf32>
    %256 = vector.broadcast %255 : vector<1x1xf32> to vector<1x40xf32>
    %257 = arith.mulf %256, %48 : vector<1x40xf32>
    %258 = vector.extract_strided_slice %239 {offsets = [0, 6], sizes = [1, 1], strides = [1, 1]} : vector<1x10xf32> to vector<1x1xf32>
    %259 = vector.broadcast %258 : vector<1x1xf32> to vector<1x40xf32>
    %260 = arith.mulf %259, %49 : vector<1x40xf32>
    %261 = vector.extract_strided_slice %239 {offsets = [0, 7], sizes = [1, 1], strides = [1, 1]} : vector<1x10xf32> to vector<1x1xf32>
    %262 = vector.broadcast %261 : vector<1x1xf32> to vector<1x40xf32>
    %263 = arith.mulf %262, %50 : vector<1x40xf32>
    %264 = vector.extract_strided_slice %239 {offsets = [0, 8], sizes = [1, 1], strides = [1, 1]} : vector<1x10xf32> to vector<1x1xf32>
    %265 = vector.broadcast %264 : vector<1x1xf32> to vector<1x40xf32>
    %266 = arith.mulf %265, %51 : vector<1x40xf32>
    %267 = vector.extract_strided_slice %239 {offsets = [0, 9], sizes = [1, 1], strides = [1, 1]} : vector<1x10xf32> to vector<1x1xf32>
    %268 = vector.broadcast %267 : vector<1x1xf32> to vector<1x40xf32>
    %269 = arith.mulf %268, %52 : vector<1x40xf32>
    %270 = arith.addf %56, %242 : vector<1x40xf32>
    %271 = arith.addf %245, %248 : vector<1x40xf32>
    %272 = arith.addf %251, %254 : vector<1x40xf32>
    %273 = arith.addf %257, %260 : vector<1x40xf32>
    %274 = arith.addf %263, %266 : vector<1x40xf32>
    %275 = arith.addf %270, %271 : vector<1x40xf32>
    %276 = arith.addf %272, %273 : vector<1x40xf32>
    %277 = arith.addf %274, %269 : vector<1x40xf32>
    %278 = arith.addf %275, %276 : vector<1x40xf32>
    %279 = arith.addf %278, %277 : vector<1x40xf32>
    %280 = vector.extract_strided_slice %279 {offsets = [0, 0], sizes = [1, 30], strides = [1, 1]} : vector<1x40xf32> to vector<1x30xf32>
    %281 = arith.negf %280 : vector<1x30xf32>
    %282 = math.exp %281 : vector<1x30xf32>
    %cst_13 = arith.constant 1.000000e+00 : f32
    %283 = vector.broadcast %cst_13 : f32 to vector<1x30xf32>
    %284 = arith.addf %283, %282 : vector<1x30xf32>
    %285 = arith.divf %283, %284 : vector<1x30xf32>
    %286 = vector.extract_strided_slice %279 {offsets = [0, 30], sizes = [1, 10], strides = [1, 1]} : vector<1x40xf32> to vector<1x10xf32>
    %287 = math.tanh %286 : vector<1x10xf32>
    %288 = vector.extract_strided_slice %285 {offsets = [0, 0], sizes = [1, 10], strides = [1, 1]} : vector<1x30xf32> to vector<1x10xf32>
    %289 = vector.extract_strided_slice %285 {offsets = [0, 10], sizes = [1, 10], strides = [1, 1]} : vector<1x30xf32> to vector<1x10xf32>
    %290 = vector.extract_strided_slice %285 {offsets = [0, 20], sizes = [1, 10], strides = [1, 1]} : vector<1x30xf32> to vector<1x10xf32>
    %291 = arith.mulf %289, %237 : vector<1x10xf32>
    %292 = arith.mulf %288, %287 : vector<1x10xf32>
    %293 = arith.addf %291, %292 : vector<1x10xf32>
    %294 = math.tanh %293 : vector<1x10xf32>
    %295 = arith.mulf %290, %294 : vector<1x10xf32>
    %296 = vector.extract_strided_slice %295 {offsets = [0, 0], sizes = [1, 1], strides = [1, 1]} : vector<1x10xf32> to vector<1x1xf32>
    %297 = vector.broadcast %296 : vector<1x1xf32> to vector<1x40xf32>
    %298 = arith.mulf %297, %43 : vector<1x40xf32>
    %299 = vector.extract_strided_slice %295 {offsets = [0, 1], sizes = [1, 1], strides = [1, 1]} : vector<1x10xf32> to vector<1x1xf32>
    %300 = vector.broadcast %299 : vector<1x1xf32> to vector<1x40xf32>
    %301 = arith.mulf %300, %44 : vector<1x40xf32>
    %302 = vector.extract_strided_slice %295 {offsets = [0, 2], sizes = [1, 1], strides = [1, 1]} : vector<1x10xf32> to vector<1x1xf32>
    %303 = vector.broadcast %302 : vector<1x1xf32> to vector<1x40xf32>
    %304 = arith.mulf %303, %45 : vector<1x40xf32>
    %305 = vector.extract_strided_slice %295 {offsets = [0, 3], sizes = [1, 1], strides = [1, 1]} : vector<1x10xf32> to vector<1x1xf32>
    %306 = vector.broadcast %305 : vector<1x1xf32> to vector<1x40xf32>
    %307 = arith.mulf %306, %46 : vector<1x40xf32>
    %308 = vector.extract_strided_slice %295 {offsets = [0, 4], sizes = [1, 1], strides = [1, 1]} : vector<1x10xf32> to vector<1x1xf32>
    %309 = vector.broadcast %308 : vector<1x1xf32> to vector<1x40xf32>
    %310 = arith.mulf %309, %47 : vector<1x40xf32>
    %311 = vector.extract_strided_slice %295 {offsets = [0, 5], sizes = [1, 1], strides = [1, 1]} : vector<1x10xf32> to vector<1x1xf32>
    %312 = vector.broadcast %311 : vector<1x1xf32> to vector<1x40xf32>
    %313 = arith.mulf %312, %48 : vector<1x40xf32>
    %314 = vector.extract_strided_slice %295 {offsets = [0, 6], sizes = [1, 1], strides = [1, 1]} : vector<1x10xf32> to vector<1x1xf32>
    %315 = vector.broadcast %314 : vector<1x1xf32> to vector<1x40xf32>
    %316 = arith.mulf %315, %49 : vector<1x40xf32>
    %317 = vector.extract_strided_slice %295 {offsets = [0, 7], sizes = [1, 1], strides = [1, 1]} : vector<1x10xf32> to vector<1x1xf32>
    %318 = vector.broadcast %317 : vector<1x1xf32> to vector<1x40xf32>
    %319 = arith.mulf %318, %50 : vector<1x40xf32>
    %320 = vector.extract_strided_slice %295 {offsets = [0, 8], sizes = [1, 1], strides = [1, 1]} : vector<1x10xf32> to vector<1x1xf32>
    %321 = vector.broadcast %320 : vector<1x1xf32> to vector<1x40xf32>
    %322 = arith.mulf %321, %51 : vector<1x40xf32>
    %323 = vector.extract_strided_slice %295 {offsets = [0, 9], sizes = [1, 1], strides = [1, 1]} : vector<1x10xf32> to vector<1x1xf32>
    %324 = vector.broadcast %323 : vector<1x1xf32> to vector<1x40xf32>
    %325 = arith.mulf %324, %52 : vector<1x40xf32>
    %326 = arith.addf %57, %298 : vector<1x40xf32>
    %327 = arith.addf %301, %304 : vector<1x40xf32>
    %328 = arith.addf %307, %310 : vector<1x40xf32>
    %329 = arith.addf %313, %316 : vector<1x40xf32>
    %330 = arith.addf %319, %322 : vector<1x40xf32>
    %331 = arith.addf %326, %327 : vector<1x40xf32>
    %332 = arith.addf %328, %329 : vector<1x40xf32>
    %333 = arith.addf %330, %325 : vector<1x40xf32>
    %334 = arith.addf %331, %332 : vector<1x40xf32>
    %335 = arith.addf %334, %333 : vector<1x40xf32>
    %336 = vector.extract_strided_slice %335 {offsets = [0, 0], sizes = [1, 30], strides = [1, 1]} : vector<1x40xf32> to vector<1x30xf32>
    %337 = arith.negf %336 : vector<1x30xf32>
    %338 = math.exp %337 : vector<1x30xf32>
    %cst_14 = arith.constant 1.000000e+00 : f32
    %339 = vector.broadcast %cst_14 : f32 to vector<1x30xf32>
    %340 = arith.addf %339, %338 : vector<1x30xf32>
    %341 = arith.divf %339, %340 : vector<1x30xf32>
    %342 = vector.extract_strided_slice %335 {offsets = [0, 30], sizes = [1, 10], strides = [1, 1]} : vector<1x40xf32> to vector<1x10xf32>
    %343 = math.tanh %342 : vector<1x10xf32>
    %344 = vector.extract_strided_slice %341 {offsets = [0, 0], sizes = [1, 10], strides = [1, 1]} : vector<1x30xf32> to vector<1x10xf32>
    %345 = vector.extract_strided_slice %341 {offsets = [0, 10], sizes = [1, 10], strides = [1, 1]} : vector<1x30xf32> to vector<1x10xf32>
    %346 = vector.extract_strided_slice %341 {offsets = [0, 20], sizes = [1, 10], strides = [1, 1]} : vector<1x30xf32> to vector<1x10xf32>
    %347 = arith.mulf %345, %293 : vector<1x10xf32>
    %348 = arith.mulf %344, %343 : vector<1x10xf32>
    %349 = arith.addf %347, %348 : vector<1x10xf32>
    %350 = math.tanh %349 : vector<1x10xf32>
    %351 = arith.mulf %346, %350 : vector<1x10xf32>
    %352 = vector.extract_strided_slice %351 {offsets = [0, 0], sizes = [1, 1], strides = [1, 1]} : vector<1x10xf32> to vector<1x1xf32>
    %353 = vector.broadcast %352 : vector<1x1xf32> to vector<1x40xf32>
    %354 = arith.mulf %353, %43 : vector<1x40xf32>
    %355 = vector.extract_strided_slice %351 {offsets = [0, 1], sizes = [1, 1], strides = [1, 1]} : vector<1x10xf32> to vector<1x1xf32>
    %356 = vector.broadcast %355 : vector<1x1xf32> to vector<1x40xf32>
    %357 = arith.mulf %356, %44 : vector<1x40xf32>
    %358 = vector.extract_strided_slice %351 {offsets = [0, 2], sizes = [1, 1], strides = [1, 1]} : vector<1x10xf32> to vector<1x1xf32>
    %359 = vector.broadcast %358 : vector<1x1xf32> to vector<1x40xf32>
    %360 = arith.mulf %359, %45 : vector<1x40xf32>
    %361 = vector.extract_strided_slice %351 {offsets = [0, 3], sizes = [1, 1], strides = [1, 1]} : vector<1x10xf32> to vector<1x1xf32>
    %362 = vector.broadcast %361 : vector<1x1xf32> to vector<1x40xf32>
    %363 = arith.mulf %362, %46 : vector<1x40xf32>
    %364 = vector.extract_strided_slice %351 {offsets = [0, 4], sizes = [1, 1], strides = [1, 1]} : vector<1x10xf32> to vector<1x1xf32>
    %365 = vector.broadcast %364 : vector<1x1xf32> to vector<1x40xf32>
    %366 = arith.mulf %365, %47 : vector<1x40xf32>
    %367 = vector.extract_strided_slice %351 {offsets = [0, 5], sizes = [1, 1], strides = [1, 1]} : vector<1x10xf32> to vector<1x1xf32>
    %368 = vector.broadcast %367 : vector<1x1xf32> to vector<1x40xf32>
    %369 = arith.mulf %368, %48 : vector<1x40xf32>
    %370 = vector.extract_strided_slice %351 {offsets = [0, 6], sizes = [1, 1], strides = [1, 1]} : vector<1x10xf32> to vector<1x1xf32>
    %371 = vector.broadcast %370 : vector<1x1xf32> to vector<1x40xf32>
    %372 = arith.mulf %371, %49 : vector<1x40xf32>
    %373 = vector.extract_strided_slice %351 {offsets = [0, 7], sizes = [1, 1], strides = [1, 1]} : vector<1x10xf32> to vector<1x1xf32>
    %374 = vector.broadcast %373 : vector<1x1xf32> to vector<1x40xf32>
    %375 = arith.mulf %374, %50 : vector<1x40xf32>
    %376 = vector.extract_strided_slice %351 {offsets = [0, 8], sizes = [1, 1], strides = [1, 1]} : vector<1x10xf32> to vector<1x1xf32>
    %377 = vector.broadcast %376 : vector<1x1xf32> to vector<1x40xf32>
    %378 = arith.mulf %377, %51 : vector<1x40xf32>
    %379 = vector.extract_strided_slice %351 {offsets = [0, 9], sizes = [1, 1], strides = [1, 1]} : vector<1x10xf32> to vector<1x1xf32>
    %380 = vector.broadcast %379 : vector<1x1xf32> to vector<1x40xf32>
    %381 = arith.mulf %380, %52 : vector<1x40xf32>
    %382 = arith.addf %58, %354 : vector<1x40xf32>
    %383 = arith.addf %357, %360 : vector<1x40xf32>
    %384 = arith.addf %363, %366 : vector<1x40xf32>
    %385 = arith.addf %369, %372 : vector<1x40xf32>
    %386 = arith.addf %375, %378 : vector<1x40xf32>
    %387 = arith.addf %382, %383 : vector<1x40xf32>
    %388 = arith.addf %384, %385 : vector<1x40xf32>
    %389 = arith.addf %386, %381 : vector<1x40xf32>
    %390 = arith.addf %387, %388 : vector<1x40xf32>
    %391 = arith.addf %390, %389 : vector<1x40xf32>
    %392 = vector.extract_strided_slice %391 {offsets = [0, 0], sizes = [1, 30], strides = [1, 1]} : vector<1x40xf32> to vector<1x30xf32>
    %393 = arith.negf %392 : vector<1x30xf32>
    %394 = math.exp %393 : vector<1x30xf32>
    %cst_15 = arith.constant 1.000000e+00 : f32
    %395 = vector.broadcast %cst_15 : f32 to vector<1x30xf32>
    %396 = arith.addf %395, %394 : vector<1x30xf32>
    %397 = arith.divf %395, %396 : vector<1x30xf32>
    %398 = vector.extract_strided_slice %391 {offsets = [0, 30], sizes = [1, 10], strides = [1, 1]} : vector<1x40xf32> to vector<1x10xf32>
    %399 = math.tanh %398 : vector<1x10xf32>
    %400 = vector.extract_strided_slice %397 {offsets = [0, 0], sizes = [1, 10], strides = [1, 1]} : vector<1x30xf32> to vector<1x10xf32>
    %401 = vector.extract_strided_slice %397 {offsets = [0, 10], sizes = [1, 10], strides = [1, 1]} : vector<1x30xf32> to vector<1x10xf32>
    %402 = vector.extract_strided_slice %397 {offsets = [0, 20], sizes = [1, 10], strides = [1, 1]} : vector<1x30xf32> to vector<1x10xf32>
    %403 = arith.mulf %401, %349 : vector<1x10xf32>
    %404 = arith.mulf %400, %399 : vector<1x10xf32>
    %405 = arith.addf %403, %404 : vector<1x10xf32>
    %406 = math.tanh %405 : vector<1x10xf32>
    %407 = arith.mulf %402, %406 : vector<1x10xf32>
    %408 = vector.extract_strided_slice %407 {offsets = [0, 0], sizes = [1, 1], strides = [1, 1]} : vector<1x10xf32> to vector<1x1xf32>
    %409 = vector.broadcast %408 : vector<1x1xf32> to vector<1x40xf32>
    %410 = arith.mulf %409, %43 : vector<1x40xf32>
    %411 = vector.extract_strided_slice %407 {offsets = [0, 1], sizes = [1, 1], strides = [1, 1]} : vector<1x10xf32> to vector<1x1xf32>
    %412 = vector.broadcast %411 : vector<1x1xf32> to vector<1x40xf32>
    %413 = arith.mulf %412, %44 : vector<1x40xf32>
    %414 = vector.extract_strided_slice %407 {offsets = [0, 2], sizes = [1, 1], strides = [1, 1]} : vector<1x10xf32> to vector<1x1xf32>
    %415 = vector.broadcast %414 : vector<1x1xf32> to vector<1x40xf32>
    %416 = arith.mulf %415, %45 : vector<1x40xf32>
    %417 = vector.extract_strided_slice %407 {offsets = [0, 3], sizes = [1, 1], strides = [1, 1]} : vector<1x10xf32> to vector<1x1xf32>
    %418 = vector.broadcast %417 : vector<1x1xf32> to vector<1x40xf32>
    %419 = arith.mulf %418, %46 : vector<1x40xf32>
    %420 = vector.extract_strided_slice %407 {offsets = [0, 4], sizes = [1, 1], strides = [1, 1]} : vector<1x10xf32> to vector<1x1xf32>
    %421 = vector.broadcast %420 : vector<1x1xf32> to vector<1x40xf32>
    %422 = arith.mulf %421, %47 : vector<1x40xf32>
    %423 = vector.extract_strided_slice %407 {offsets = [0, 5], sizes = [1, 1], strides = [1, 1]} : vector<1x10xf32> to vector<1x1xf32>
    %424 = vector.broadcast %423 : vector<1x1xf32> to vector<1x40xf32>
    %425 = arith.mulf %424, %48 : vector<1x40xf32>
    %426 = vector.extract_strided_slice %407 {offsets = [0, 6], sizes = [1, 1], strides = [1, 1]} : vector<1x10xf32> to vector<1x1xf32>
    %427 = vector.broadcast %426 : vector<1x1xf32> to vector<1x40xf32>
    %428 = arith.mulf %427, %49 : vector<1x40xf32>
    %429 = vector.extract_strided_slice %407 {offsets = [0, 7], sizes = [1, 1], strides = [1, 1]} : vector<1x10xf32> to vector<1x1xf32>
    %430 = vector.broadcast %429 : vector<1x1xf32> to vector<1x40xf32>
    %431 = arith.mulf %430, %50 : vector<1x40xf32>
    %432 = vector.extract_strided_slice %407 {offsets = [0, 8], sizes = [1, 1], strides = [1, 1]} : vector<1x10xf32> to vector<1x1xf32>
    %433 = vector.broadcast %432 : vector<1x1xf32> to vector<1x40xf32>
    %434 = arith.mulf %433, %51 : vector<1x40xf32>
    %435 = vector.extract_strided_slice %407 {offsets = [0, 9], sizes = [1, 1], strides = [1, 1]} : vector<1x10xf32> to vector<1x1xf32>
    %436 = vector.broadcast %435 : vector<1x1xf32> to vector<1x40xf32>
    %437 = arith.mulf %436, %52 : vector<1x40xf32>
    %438 = arith.addf %59, %410 : vector<1x40xf32>
    %439 = arith.addf %413, %416 : vector<1x40xf32>
    %440 = arith.addf %419, %422 : vector<1x40xf32>
    %441 = arith.addf %425, %428 : vector<1x40xf32>
    %442 = arith.addf %431, %434 : vector<1x40xf32>
    %443 = arith.addf %438, %439 : vector<1x40xf32>
    %444 = arith.addf %440, %441 : vector<1x40xf32>
    %445 = arith.addf %442, %437 : vector<1x40xf32>
    %446 = arith.addf %443, %444 : vector<1x40xf32>
    %447 = arith.addf %446, %445 : vector<1x40xf32>
    %448 = vector.extract_strided_slice %447 {offsets = [0, 0], sizes = [1, 30], strides = [1, 1]} : vector<1x40xf32> to vector<1x30xf32>
    %449 = arith.negf %448 : vector<1x30xf32>
    %450 = math.exp %449 : vector<1x30xf32>
    %cst_16 = arith.constant 1.000000e+00 : f32
    %451 = vector.broadcast %cst_16 : f32 to vector<1x30xf32>
    %452 = arith.addf %451, %450 : vector<1x30xf32>
    %453 = arith.divf %451, %452 : vector<1x30xf32>
    %454 = vector.extract_strided_slice %447 {offsets = [0, 30], sizes = [1, 10], strides = [1, 1]} : vector<1x40xf32> to vector<1x10xf32>
    %455 = math.tanh %454 : vector<1x10xf32>
    %456 = vector.extract_strided_slice %453 {offsets = [0, 0], sizes = [1, 10], strides = [1, 1]} : vector<1x30xf32> to vector<1x10xf32>
    %457 = vector.extract_strided_slice %453 {offsets = [0, 10], sizes = [1, 10], strides = [1, 1]} : vector<1x30xf32> to vector<1x10xf32>
    %458 = vector.extract_strided_slice %453 {offsets = [0, 20], sizes = [1, 10], strides = [1, 1]} : vector<1x30xf32> to vector<1x10xf32>
    %459 = arith.mulf %457, %405 : vector<1x10xf32>
    %460 = arith.mulf %456, %455 : vector<1x10xf32>
    %461 = arith.addf %459, %460 : vector<1x10xf32>
    %462 = math.tanh %461 : vector<1x10xf32>
    %463 = arith.mulf %458, %462 : vector<1x10xf32>
    %464 = vector.extract_strided_slice %463 {offsets = [0, 0], sizes = [1, 1], strides = [1, 1]} : vector<1x10xf32> to vector<1x1xf32>
    %465 = vector.broadcast %464 : vector<1x1xf32> to vector<1x40xf32>
    %466 = arith.mulf %465, %43 : vector<1x40xf32>
    %467 = vector.extract_strided_slice %463 {offsets = [0, 1], sizes = [1, 1], strides = [1, 1]} : vector<1x10xf32> to vector<1x1xf32>
    %468 = vector.broadcast %467 : vector<1x1xf32> to vector<1x40xf32>
    %469 = arith.mulf %468, %44 : vector<1x40xf32>
    %470 = vector.extract_strided_slice %463 {offsets = [0, 2], sizes = [1, 1], strides = [1, 1]} : vector<1x10xf32> to vector<1x1xf32>
    %471 = vector.broadcast %470 : vector<1x1xf32> to vector<1x40xf32>
    %472 = arith.mulf %471, %45 : vector<1x40xf32>
    %473 = vector.extract_strided_slice %463 {offsets = [0, 3], sizes = [1, 1], strides = [1, 1]} : vector<1x10xf32> to vector<1x1xf32>
    %474 = vector.broadcast %473 : vector<1x1xf32> to vector<1x40xf32>
    %475 = arith.mulf %474, %46 : vector<1x40xf32>
    %476 = vector.extract_strided_slice %463 {offsets = [0, 4], sizes = [1, 1], strides = [1, 1]} : vector<1x10xf32> to vector<1x1xf32>
    %477 = vector.broadcast %476 : vector<1x1xf32> to vector<1x40xf32>
    %478 = arith.mulf %477, %47 : vector<1x40xf32>
    %479 = vector.extract_strided_slice %463 {offsets = [0, 5], sizes = [1, 1], strides = [1, 1]} : vector<1x10xf32> to vector<1x1xf32>
    %480 = vector.broadcast %479 : vector<1x1xf32> to vector<1x40xf32>
    %481 = arith.mulf %480, %48 : vector<1x40xf32>
    %482 = vector.extract_strided_slice %463 {offsets = [0, 6], sizes = [1, 1], strides = [1, 1]} : vector<1x10xf32> to vector<1x1xf32>
    %483 = vector.broadcast %482 : vector<1x1xf32> to vector<1x40xf32>
    %484 = arith.mulf %483, %49 : vector<1x40xf32>
    %485 = vector.extract_strided_slice %463 {offsets = [0, 7], sizes = [1, 1], strides = [1, 1]} : vector<1x10xf32> to vector<1x1xf32>
    %486 = vector.broadcast %485 : vector<1x1xf32> to vector<1x40xf32>
    %487 = arith.mulf %486, %50 : vector<1x40xf32>
    %488 = vector.extract_strided_slice %463 {offsets = [0, 8], sizes = [1, 1], strides = [1, 1]} : vector<1x10xf32> to vector<1x1xf32>
    %489 = vector.broadcast %488 : vector<1x1xf32> to vector<1x40xf32>
    %490 = arith.mulf %489, %51 : vector<1x40xf32>
    %491 = vector.extract_strided_slice %463 {offsets = [0, 9], sizes = [1, 1], strides = [1, 1]} : vector<1x10xf32> to vector<1x1xf32>
    %492 = vector.broadcast %491 : vector<1x1xf32> to vector<1x40xf32>
    %493 = arith.mulf %492, %52 : vector<1x40xf32>
    %494 = arith.addf %60, %466 : vector<1x40xf32>
    %495 = arith.addf %469, %472 : vector<1x40xf32>
    %496 = arith.addf %475, %478 : vector<1x40xf32>
    %497 = arith.addf %481, %484 : vector<1x40xf32>
    %498 = arith.addf %487, %490 : vector<1x40xf32>
    %499 = arith.addf %494, %495 : vector<1x40xf32>
    %500 = arith.addf %496, %497 : vector<1x40xf32>
    %501 = arith.addf %498, %493 : vector<1x40xf32>
    %502 = arith.addf %499, %500 : vector<1x40xf32>
    %503 = arith.addf %502, %501 : vector<1x40xf32>
    %504 = vector.extract_strided_slice %503 {offsets = [0, 0], sizes = [1, 30], strides = [1, 1]} : vector<1x40xf32> to vector<1x30xf32>
    %505 = arith.negf %504 : vector<1x30xf32>
    %506 = math.exp %505 : vector<1x30xf32>
    %cst_17 = arith.constant 1.000000e+00 : f32
    %507 = vector.broadcast %cst_17 : f32 to vector<1x30xf32>
    %508 = arith.addf %507, %506 : vector<1x30xf32>
    %509 = arith.divf %507, %508 : vector<1x30xf32>
    %510 = vector.extract_strided_slice %503 {offsets = [0, 30], sizes = [1, 10], strides = [1, 1]} : vector<1x40xf32> to vector<1x10xf32>
    %511 = math.tanh %510 : vector<1x10xf32>
    %512 = vector.extract_strided_slice %509 {offsets = [0, 0], sizes = [1, 10], strides = [1, 1]} : vector<1x30xf32> to vector<1x10xf32>
    %513 = vector.extract_strided_slice %509 {offsets = [0, 10], sizes = [1, 10], strides = [1, 1]} : vector<1x30xf32> to vector<1x10xf32>
    %514 = vector.extract_strided_slice %509 {offsets = [0, 20], sizes = [1, 10], strides = [1, 1]} : vector<1x30xf32> to vector<1x10xf32>
    %515 = arith.mulf %513, %461 : vector<1x10xf32>
    %516 = arith.mulf %512, %511 : vector<1x10xf32>
    %517 = arith.addf %515, %516 : vector<1x10xf32>
    %518 = math.tanh %517 : vector<1x10xf32>
    %519 = arith.mulf %514, %518 : vector<1x10xf32>
    %520 = vector.extract_strided_slice %519 {offsets = [0, 0], sizes = [1, 1], strides = [1, 1]} : vector<1x10xf32> to vector<1x1xf32>
    %521 = vector.broadcast %520 : vector<1x1xf32> to vector<1x40xf32>
    %522 = arith.mulf %521, %43 : vector<1x40xf32>
    %523 = vector.extract_strided_slice %519 {offsets = [0, 1], sizes = [1, 1], strides = [1, 1]} : vector<1x10xf32> to vector<1x1xf32>
    %524 = vector.broadcast %523 : vector<1x1xf32> to vector<1x40xf32>
    %525 = arith.mulf %524, %44 : vector<1x40xf32>
    %526 = vector.extract_strided_slice %519 {offsets = [0, 2], sizes = [1, 1], strides = [1, 1]} : vector<1x10xf32> to vector<1x1xf32>
    %527 = vector.broadcast %526 : vector<1x1xf32> to vector<1x40xf32>
    %528 = arith.mulf %527, %45 : vector<1x40xf32>
    %529 = vector.extract_strided_slice %519 {offsets = [0, 3], sizes = [1, 1], strides = [1, 1]} : vector<1x10xf32> to vector<1x1xf32>
    %530 = vector.broadcast %529 : vector<1x1xf32> to vector<1x40xf32>
    %531 = arith.mulf %530, %46 : vector<1x40xf32>
    %532 = vector.extract_strided_slice %519 {offsets = [0, 4], sizes = [1, 1], strides = [1, 1]} : vector<1x10xf32> to vector<1x1xf32>
    %533 = vector.broadcast %532 : vector<1x1xf32> to vector<1x40xf32>
    %534 = arith.mulf %533, %47 : vector<1x40xf32>
    %535 = vector.extract_strided_slice %519 {offsets = [0, 5], sizes = [1, 1], strides = [1, 1]} : vector<1x10xf32> to vector<1x1xf32>
    %536 = vector.broadcast %535 : vector<1x1xf32> to vector<1x40xf32>
    %537 = arith.mulf %536, %48 : vector<1x40xf32>
    %538 = vector.extract_strided_slice %519 {offsets = [0, 6], sizes = [1, 1], strides = [1, 1]} : vector<1x10xf32> to vector<1x1xf32>
    %539 = vector.broadcast %538 : vector<1x1xf32> to vector<1x40xf32>
    %540 = arith.mulf %539, %49 : vector<1x40xf32>
    %541 = vector.extract_strided_slice %519 {offsets = [0, 7], sizes = [1, 1], strides = [1, 1]} : vector<1x10xf32> to vector<1x1xf32>
    %542 = vector.broadcast %541 : vector<1x1xf32> to vector<1x40xf32>
    %543 = arith.mulf %542, %50 : vector<1x40xf32>
    %544 = vector.extract_strided_slice %519 {offsets = [0, 8], sizes = [1, 1], strides = [1, 1]} : vector<1x10xf32> to vector<1x1xf32>
    %545 = vector.broadcast %544 : vector<1x1xf32> to vector<1x40xf32>
    %546 = arith.mulf %545, %51 : vector<1x40xf32>
    %547 = vector.extract_strided_slice %519 {offsets = [0, 9], sizes = [1, 1], strides = [1, 1]} : vector<1x10xf32> to vector<1x1xf32>
    %548 = vector.broadcast %547 : vector<1x1xf32> to vector<1x40xf32>
    %549 = arith.mulf %548, %52 : vector<1x40xf32>
    %550 = arith.addf %61, %522 : vector<1x40xf32>
    %551 = arith.addf %525, %528 : vector<1x40xf32>
    %552 = arith.addf %531, %534 : vector<1x40xf32>
    %553 = arith.addf %537, %540 : vector<1x40xf32>
    %554 = arith.addf %543, %546 : vector<1x40xf32>
    %555 = arith.addf %550, %551 : vector<1x40xf32>
    %556 = arith.addf %552, %553 : vector<1x40xf32>
    %557 = arith.addf %554, %549 : vector<1x40xf32>
    %558 = arith.addf %555, %556 : vector<1x40xf32>
    %559 = arith.addf %558, %557 : vector<1x40xf32>
    %560 = vector.extract_strided_slice %559 {offsets = [0, 0], sizes = [1, 30], strides = [1, 1]} : vector<1x40xf32> to vector<1x30xf32>
    %561 = arith.negf %560 : vector<1x30xf32>
    %562 = math.exp %561 : vector<1x30xf32>
    %cst_18 = arith.constant 1.000000e+00 : f32
    %563 = vector.broadcast %cst_18 : f32 to vector<1x30xf32>
    %564 = arith.addf %563, %562 : vector<1x30xf32>
    %565 = arith.divf %563, %564 : vector<1x30xf32>
    %566 = vector.extract_strided_slice %559 {offsets = [0, 30], sizes = [1, 10], strides = [1, 1]} : vector<1x40xf32> to vector<1x10xf32>
    %567 = math.tanh %566 : vector<1x10xf32>
    %568 = vector.extract_strided_slice %565 {offsets = [0, 0], sizes = [1, 10], strides = [1, 1]} : vector<1x30xf32> to vector<1x10xf32>
    %569 = vector.extract_strided_slice %565 {offsets = [0, 10], sizes = [1, 10], strides = [1, 1]} : vector<1x30xf32> to vector<1x10xf32>
    %570 = vector.extract_strided_slice %565 {offsets = [0, 20], sizes = [1, 10], strides = [1, 1]} : vector<1x30xf32> to vector<1x10xf32>
    %571 = arith.mulf %569, %517 : vector<1x10xf32>
    %572 = arith.mulf %568, %567 : vector<1x10xf32>
    %573 = arith.addf %571, %572 : vector<1x10xf32>
    %574 = math.tanh %573 : vector<1x10xf32>
    %575 = arith.mulf %570, %574 : vector<1x10xf32>
    %576 = vector.extract_strided_slice %575 {offsets = [0, 0], sizes = [1, 1], strides = [1, 1]} : vector<1x10xf32> to vector<1x1xf32>
    %577 = vector.broadcast %576 : vector<1x1xf32> to vector<1x40xf32>
    %578 = arith.mulf %577, %43 : vector<1x40xf32>
    %579 = vector.extract_strided_slice %575 {offsets = [0, 1], sizes = [1, 1], strides = [1, 1]} : vector<1x10xf32> to vector<1x1xf32>
    %580 = vector.broadcast %579 : vector<1x1xf32> to vector<1x40xf32>
    %581 = arith.mulf %580, %44 : vector<1x40xf32>
    %582 = vector.extract_strided_slice %575 {offsets = [0, 2], sizes = [1, 1], strides = [1, 1]} : vector<1x10xf32> to vector<1x1xf32>
    %583 = vector.broadcast %582 : vector<1x1xf32> to vector<1x40xf32>
    %584 = arith.mulf %583, %45 : vector<1x40xf32>
    %585 = vector.extract_strided_slice %575 {offsets = [0, 3], sizes = [1, 1], strides = [1, 1]} : vector<1x10xf32> to vector<1x1xf32>
    %586 = vector.broadcast %585 : vector<1x1xf32> to vector<1x40xf32>
    %587 = arith.mulf %586, %46 : vector<1x40xf32>
    %588 = vector.extract_strided_slice %575 {offsets = [0, 4], sizes = [1, 1], strides = [1, 1]} : vector<1x10xf32> to vector<1x1xf32>
    %589 = vector.broadcast %588 : vector<1x1xf32> to vector<1x40xf32>
    %590 = arith.mulf %589, %47 : vector<1x40xf32>
    %591 = vector.extract_strided_slice %575 {offsets = [0, 5], sizes = [1, 1], strides = [1, 1]} : vector<1x10xf32> to vector<1x1xf32>
    %592 = vector.broadcast %591 : vector<1x1xf32> to vector<1x40xf32>
    %593 = arith.mulf %592, %48 : vector<1x40xf32>
    %594 = vector.extract_strided_slice %575 {offsets = [0, 6], sizes = [1, 1], strides = [1, 1]} : vector<1x10xf32> to vector<1x1xf32>
    %595 = vector.broadcast %594 : vector<1x1xf32> to vector<1x40xf32>
    %596 = arith.mulf %595, %49 : vector<1x40xf32>
    %597 = vector.extract_strided_slice %575 {offsets = [0, 7], sizes = [1, 1], strides = [1, 1]} : vector<1x10xf32> to vector<1x1xf32>
    %598 = vector.broadcast %597 : vector<1x1xf32> to vector<1x40xf32>
    %599 = arith.mulf %598, %50 : vector<1x40xf32>
    %600 = vector.extract_strided_slice %575 {offsets = [0, 8], sizes = [1, 1], strides = [1, 1]} : vector<1x10xf32> to vector<1x1xf32>
    %601 = vector.broadcast %600 : vector<1x1xf32> to vector<1x40xf32>
    %602 = arith.mulf %601, %51 : vector<1x40xf32>
    %603 = vector.extract_strided_slice %575 {offsets = [0, 9], sizes = [1, 1], strides = [1, 1]} : vector<1x10xf32> to vector<1x1xf32>
    %604 = vector.broadcast %603 : vector<1x1xf32> to vector<1x40xf32>
    %605 = arith.mulf %604, %52 : vector<1x40xf32>
    %606 = arith.addf %62, %578 : vector<1x40xf32>
    %607 = arith.addf %581, %584 : vector<1x40xf32>
    %608 = arith.addf %587, %590 : vector<1x40xf32>
    %609 = arith.addf %593, %596 : vector<1x40xf32>
    %610 = arith.addf %599, %602 : vector<1x40xf32>
    %611 = arith.addf %606, %607 : vector<1x40xf32>
    %612 = arith.addf %608, %609 : vector<1x40xf32>
    %613 = arith.addf %610, %605 : vector<1x40xf32>
    %614 = arith.addf %611, %612 : vector<1x40xf32>
    %615 = arith.addf %614, %613 : vector<1x40xf32>
    %616 = vector.extract_strided_slice %615 {offsets = [0, 0], sizes = [1, 30], strides = [1, 1]} : vector<1x40xf32> to vector<1x30xf32>
    %617 = arith.negf %616 : vector<1x30xf32>
    %618 = math.exp %617 : vector<1x30xf32>
    %cst_19 = arith.constant 1.000000e+00 : f32
    %619 = vector.broadcast %cst_19 : f32 to vector<1x30xf32>
    %620 = arith.addf %619, %618 : vector<1x30xf32>
    %621 = arith.divf %619, %620 : vector<1x30xf32>
    %622 = vector.extract_strided_slice %615 {offsets = [0, 30], sizes = [1, 10], strides = [1, 1]} : vector<1x40xf32> to vector<1x10xf32>
    %623 = math.tanh %622 : vector<1x10xf32>
    %624 = vector.extract_strided_slice %621 {offsets = [0, 0], sizes = [1, 10], strides = [1, 1]} : vector<1x30xf32> to vector<1x10xf32>
    %625 = vector.extract_strided_slice %621 {offsets = [0, 10], sizes = [1, 10], strides = [1, 1]} : vector<1x30xf32> to vector<1x10xf32>
    %626 = vector.extract_strided_slice %621 {offsets = [0, 20], sizes = [1, 10], strides = [1, 1]} : vector<1x30xf32> to vector<1x10xf32>
    %627 = arith.mulf %625, %573 : vector<1x10xf32>
    %628 = arith.mulf %624, %623 : vector<1x10xf32>
    %629 = arith.addf %627, %628 : vector<1x10xf32>
    %630 = math.tanh %629 : vector<1x10xf32>
    %631 = arith.mulf %626, %630 : vector<1x10xf32>
    %632 = vector.extract_strided_slice %631 {offsets = [0, 0], sizes = [1, 1], strides = [1, 1]} : vector<1x10xf32> to vector<1x1xf32>
    %633 = vector.broadcast %632 : vector<1x1xf32> to vector<1x40xf32>
    %634 = arith.mulf %633, %43 : vector<1x40xf32>
    %635 = vector.extract_strided_slice %631 {offsets = [0, 1], sizes = [1, 1], strides = [1, 1]} : vector<1x10xf32> to vector<1x1xf32>
    %636 = vector.broadcast %635 : vector<1x1xf32> to vector<1x40xf32>
    %637 = arith.mulf %636, %44 : vector<1x40xf32>
    %638 = vector.extract_strided_slice %631 {offsets = [0, 2], sizes = [1, 1], strides = [1, 1]} : vector<1x10xf32> to vector<1x1xf32>
    %639 = vector.broadcast %638 : vector<1x1xf32> to vector<1x40xf32>
    %640 = arith.mulf %639, %45 : vector<1x40xf32>
    %641 = vector.extract_strided_slice %631 {offsets = [0, 3], sizes = [1, 1], strides = [1, 1]} : vector<1x10xf32> to vector<1x1xf32>
    %642 = vector.broadcast %641 : vector<1x1xf32> to vector<1x40xf32>
    %643 = arith.mulf %642, %46 : vector<1x40xf32>
    %644 = vector.extract_strided_slice %631 {offsets = [0, 4], sizes = [1, 1], strides = [1, 1]} : vector<1x10xf32> to vector<1x1xf32>
    %645 = vector.broadcast %644 : vector<1x1xf32> to vector<1x40xf32>
    %646 = arith.mulf %645, %47 : vector<1x40xf32>
    %647 = vector.extract_strided_slice %631 {offsets = [0, 5], sizes = [1, 1], strides = [1, 1]} : vector<1x10xf32> to vector<1x1xf32>
    %648 = vector.broadcast %647 : vector<1x1xf32> to vector<1x40xf32>
    %649 = arith.mulf %648, %48 : vector<1x40xf32>
    %650 = vector.extract_strided_slice %631 {offsets = [0, 6], sizes = [1, 1], strides = [1, 1]} : vector<1x10xf32> to vector<1x1xf32>
    %651 = vector.broadcast %650 : vector<1x1xf32> to vector<1x40xf32>
    %652 = arith.mulf %651, %49 : vector<1x40xf32>
    %653 = vector.extract_strided_slice %631 {offsets = [0, 7], sizes = [1, 1], strides = [1, 1]} : vector<1x10xf32> to vector<1x1xf32>
    %654 = vector.broadcast %653 : vector<1x1xf32> to vector<1x40xf32>
    %655 = arith.mulf %654, %50 : vector<1x40xf32>
    %656 = vector.extract_strided_slice %631 {offsets = [0, 8], sizes = [1, 1], strides = [1, 1]} : vector<1x10xf32> to vector<1x1xf32>
    %657 = vector.broadcast %656 : vector<1x1xf32> to vector<1x40xf32>
    %658 = arith.mulf %657, %51 : vector<1x40xf32>
    %659 = vector.extract_strided_slice %631 {offsets = [0, 9], sizes = [1, 1], strides = [1, 1]} : vector<1x10xf32> to vector<1x1xf32>
    %660 = vector.broadcast %659 : vector<1x1xf32> to vector<1x40xf32>
    %661 = arith.mulf %660, %52 : vector<1x40xf32>
    %662 = arith.addf %63, %634 : vector<1x40xf32>
    %663 = arith.addf %637, %640 : vector<1x40xf32>
    %664 = arith.addf %643, %646 : vector<1x40xf32>
    %665 = arith.addf %649, %652 : vector<1x40xf32>
    %666 = arith.addf %655, %658 : vector<1x40xf32>
    %667 = arith.addf %662, %663 : vector<1x40xf32>
    %668 = arith.addf %664, %665 : vector<1x40xf32>
    %669 = arith.addf %666, %661 : vector<1x40xf32>
    %670 = arith.addf %667, %668 : vector<1x40xf32>
    %671 = arith.addf %670, %669 : vector<1x40xf32>
    %672 = vector.extract_strided_slice %671 {offsets = [0, 0], sizes = [1, 30], strides = [1, 1]} : vector<1x40xf32> to vector<1x30xf32>
    %673 = arith.negf %672 : vector<1x30xf32>
    %674 = math.exp %673 : vector<1x30xf32>
    %cst_20 = arith.constant 1.000000e+00 : f32
    %675 = vector.broadcast %cst_20 : f32 to vector<1x30xf32>
    %676 = arith.addf %675, %674 : vector<1x30xf32>
    %677 = arith.divf %675, %676 : vector<1x30xf32>
    %678 = vector.extract_strided_slice %671 {offsets = [0, 30], sizes = [1, 10], strides = [1, 1]} : vector<1x40xf32> to vector<1x10xf32>
    %679 = math.tanh %678 : vector<1x10xf32>
    %680 = vector.extract_strided_slice %677 {offsets = [0, 0], sizes = [1, 10], strides = [1, 1]} : vector<1x30xf32> to vector<1x10xf32>
    %681 = vector.extract_strided_slice %677 {offsets = [0, 10], sizes = [1, 10], strides = [1, 1]} : vector<1x30xf32> to vector<1x10xf32>
    %682 = vector.extract_strided_slice %677 {offsets = [0, 20], sizes = [1, 10], strides = [1, 1]} : vector<1x30xf32> to vector<1x10xf32>
    %683 = arith.mulf %681, %629 : vector<1x10xf32>
    %684 = arith.mulf %680, %679 : vector<1x10xf32>
    %685 = arith.addf %683, %684 : vector<1x10xf32>
    %686 = math.tanh %685 : vector<1x10xf32>
    %687 = arith.mulf %682, %686 : vector<1x10xf32>
    %688 = vector.extract_strided_slice %687 {offsets = [0, 0], sizes = [1, 1], strides = [1, 1]} : vector<1x10xf32> to vector<1x1xf32>
    %689 = vector.broadcast %688 : vector<1x1xf32> to vector<1x40xf32>
    %690 = arith.mulf %689, %43 : vector<1x40xf32>
    %691 = vector.extract_strided_slice %687 {offsets = [0, 1], sizes = [1, 1], strides = [1, 1]} : vector<1x10xf32> to vector<1x1xf32>
    %692 = vector.broadcast %691 : vector<1x1xf32> to vector<1x40xf32>
    %693 = arith.mulf %692, %44 : vector<1x40xf32>
    %694 = vector.extract_strided_slice %687 {offsets = [0, 2], sizes = [1, 1], strides = [1, 1]} : vector<1x10xf32> to vector<1x1xf32>
    %695 = vector.broadcast %694 : vector<1x1xf32> to vector<1x40xf32>
    %696 = arith.mulf %695, %45 : vector<1x40xf32>
    %697 = vector.extract_strided_slice %687 {offsets = [0, 3], sizes = [1, 1], strides = [1, 1]} : vector<1x10xf32> to vector<1x1xf32>
    %698 = vector.broadcast %697 : vector<1x1xf32> to vector<1x40xf32>
    %699 = arith.mulf %698, %46 : vector<1x40xf32>
    %700 = vector.extract_strided_slice %687 {offsets = [0, 4], sizes = [1, 1], strides = [1, 1]} : vector<1x10xf32> to vector<1x1xf32>
    %701 = vector.broadcast %700 : vector<1x1xf32> to vector<1x40xf32>
    %702 = arith.mulf %701, %47 : vector<1x40xf32>
    %703 = vector.extract_strided_slice %687 {offsets = [0, 5], sizes = [1, 1], strides = [1, 1]} : vector<1x10xf32> to vector<1x1xf32>
    %704 = vector.broadcast %703 : vector<1x1xf32> to vector<1x40xf32>
    %705 = arith.mulf %704, %48 : vector<1x40xf32>
    %706 = vector.extract_strided_slice %687 {offsets = [0, 6], sizes = [1, 1], strides = [1, 1]} : vector<1x10xf32> to vector<1x1xf32>
    %707 = vector.broadcast %706 : vector<1x1xf32> to vector<1x40xf32>
    %708 = arith.mulf %707, %49 : vector<1x40xf32>
    %709 = vector.extract_strided_slice %687 {offsets = [0, 7], sizes = [1, 1], strides = [1, 1]} : vector<1x10xf32> to vector<1x1xf32>
    %710 = vector.broadcast %709 : vector<1x1xf32> to vector<1x40xf32>
    %711 = arith.mulf %710, %50 : vector<1x40xf32>
    %712 = vector.extract_strided_slice %687 {offsets = [0, 8], sizes = [1, 1], strides = [1, 1]} : vector<1x10xf32> to vector<1x1xf32>
    %713 = vector.broadcast %712 : vector<1x1xf32> to vector<1x40xf32>
    %714 = arith.mulf %713, %51 : vector<1x40xf32>
    %715 = vector.extract_strided_slice %687 {offsets = [0, 9], sizes = [1, 1], strides = [1, 1]} : vector<1x10xf32> to vector<1x1xf32>
    %716 = vector.broadcast %715 : vector<1x1xf32> to vector<1x40xf32>
    %717 = arith.mulf %716, %52 : vector<1x40xf32>
    %718 = arith.addf %64, %690 : vector<1x40xf32>
    %719 = arith.addf %693, %696 : vector<1x40xf32>
    %720 = arith.addf %699, %702 : vector<1x40xf32>
    %721 = arith.addf %705, %708 : vector<1x40xf32>
    %722 = arith.addf %711, %714 : vector<1x40xf32>
    %723 = arith.addf %718, %719 : vector<1x40xf32>
    %724 = arith.addf %720, %721 : vector<1x40xf32>
    %725 = arith.addf %722, %717 : vector<1x40xf32>
    %726 = arith.addf %723, %724 : vector<1x40xf32>
    %727 = arith.addf %726, %725 : vector<1x40xf32>
    %728 = vector.extract_strided_slice %727 {offsets = [0, 0], sizes = [1, 30], strides = [1, 1]} : vector<1x40xf32> to vector<1x30xf32>
    %729 = arith.negf %728 : vector<1x30xf32>
    %730 = math.exp %729 : vector<1x30xf32>
    %cst_21 = arith.constant 1.000000e+00 : f32
    %731 = vector.broadcast %cst_21 : f32 to vector<1x30xf32>
    %732 = arith.addf %731, %730 : vector<1x30xf32>
    %733 = arith.divf %731, %732 : vector<1x30xf32>
    %734 = vector.extract_strided_slice %727 {offsets = [0, 30], sizes = [1, 10], strides = [1, 1]} : vector<1x40xf32> to vector<1x10xf32>
    %735 = math.tanh %734 : vector<1x10xf32>
    %736 = vector.extract_strided_slice %733 {offsets = [0, 0], sizes = [1, 10], strides = [1, 1]} : vector<1x30xf32> to vector<1x10xf32>
    %737 = vector.extract_strided_slice %733 {offsets = [0, 10], sizes = [1, 10], strides = [1, 1]} : vector<1x30xf32> to vector<1x10xf32>
    %738 = vector.extract_strided_slice %733 {offsets = [0, 20], sizes = [1, 10], strides = [1, 1]} : vector<1x30xf32> to vector<1x10xf32>
    %739 = arith.mulf %737, %685 : vector<1x10xf32>
    %740 = arith.mulf %736, %735 : vector<1x10xf32>
    %741 = arith.addf %739, %740 : vector<1x10xf32>
    %742 = math.tanh %741 : vector<1x10xf32>
    %743 = arith.mulf %738, %742 : vector<1x10xf32>
    %744 = vector.extract_strided_slice %743 {offsets = [0, 0], sizes = [1, 1], strides = [1, 1]} : vector<1x10xf32> to vector<1x1xf32>
    %745 = vector.broadcast %744 : vector<1x1xf32> to vector<1x40xf32>
    %746 = arith.mulf %745, %43 : vector<1x40xf32>
    %747 = vector.extract_strided_slice %743 {offsets = [0, 1], sizes = [1, 1], strides = [1, 1]} : vector<1x10xf32> to vector<1x1xf32>
    %748 = vector.broadcast %747 : vector<1x1xf32> to vector<1x40xf32>
    %749 = arith.mulf %748, %44 : vector<1x40xf32>
    %750 = vector.extract_strided_slice %743 {offsets = [0, 2], sizes = [1, 1], strides = [1, 1]} : vector<1x10xf32> to vector<1x1xf32>
    %751 = vector.broadcast %750 : vector<1x1xf32> to vector<1x40xf32>
    %752 = arith.mulf %751, %45 : vector<1x40xf32>
    %753 = vector.extract_strided_slice %743 {offsets = [0, 3], sizes = [1, 1], strides = [1, 1]} : vector<1x10xf32> to vector<1x1xf32>
    %754 = vector.broadcast %753 : vector<1x1xf32> to vector<1x40xf32>
    %755 = arith.mulf %754, %46 : vector<1x40xf32>
    %756 = vector.extract_strided_slice %743 {offsets = [0, 4], sizes = [1, 1], strides = [1, 1]} : vector<1x10xf32> to vector<1x1xf32>
    %757 = vector.broadcast %756 : vector<1x1xf32> to vector<1x40xf32>
    %758 = arith.mulf %757, %47 : vector<1x40xf32>
    %759 = vector.extract_strided_slice %743 {offsets = [0, 5], sizes = [1, 1], strides = [1, 1]} : vector<1x10xf32> to vector<1x1xf32>
    %760 = vector.broadcast %759 : vector<1x1xf32> to vector<1x40xf32>
    %761 = arith.mulf %760, %48 : vector<1x40xf32>
    %762 = vector.extract_strided_slice %743 {offsets = [0, 6], sizes = [1, 1], strides = [1, 1]} : vector<1x10xf32> to vector<1x1xf32>
    %763 = vector.broadcast %762 : vector<1x1xf32> to vector<1x40xf32>
    %764 = arith.mulf %763, %49 : vector<1x40xf32>
    %765 = vector.extract_strided_slice %743 {offsets = [0, 7], sizes = [1, 1], strides = [1, 1]} : vector<1x10xf32> to vector<1x1xf32>
    %766 = vector.broadcast %765 : vector<1x1xf32> to vector<1x40xf32>
    %767 = arith.mulf %766, %50 : vector<1x40xf32>
    %768 = vector.extract_strided_slice %743 {offsets = [0, 8], sizes = [1, 1], strides = [1, 1]} : vector<1x10xf32> to vector<1x1xf32>
    %769 = vector.broadcast %768 : vector<1x1xf32> to vector<1x40xf32>
    %770 = arith.mulf %769, %51 : vector<1x40xf32>
    %771 = vector.extract_strided_slice %743 {offsets = [0, 9], sizes = [1, 1], strides = [1, 1]} : vector<1x10xf32> to vector<1x1xf32>
    %772 = vector.broadcast %771 : vector<1x1xf32> to vector<1x40xf32>
    %773 = arith.mulf %772, %52 : vector<1x40xf32>
    %774 = arith.addf %65, %746 : vector<1x40xf32>
    %775 = arith.addf %749, %752 : vector<1x40xf32>
    %776 = arith.addf %755, %758 : vector<1x40xf32>
    %777 = arith.addf %761, %764 : vector<1x40xf32>
    %778 = arith.addf %767, %770 : vector<1x40xf32>
    %779 = arith.addf %774, %775 : vector<1x40xf32>
    %780 = arith.addf %776, %777 : vector<1x40xf32>
    %781 = arith.addf %778, %773 : vector<1x40xf32>
    %782 = arith.addf %779, %780 : vector<1x40xf32>
    %783 = arith.addf %782, %781 : vector<1x40xf32>
    %784 = vector.extract_strided_slice %783 {offsets = [0, 0], sizes = [1, 30], strides = [1, 1]} : vector<1x40xf32> to vector<1x30xf32>
    %785 = arith.negf %784 : vector<1x30xf32>
    %786 = math.exp %785 : vector<1x30xf32>
    %cst_22 = arith.constant 1.000000e+00 : f32
    %787 = vector.broadcast %cst_22 : f32 to vector<1x30xf32>
    %788 = arith.addf %787, %786 : vector<1x30xf32>
    %789 = arith.divf %787, %788 : vector<1x30xf32>
    %790 = vector.extract_strided_slice %783 {offsets = [0, 30], sizes = [1, 10], strides = [1, 1]} : vector<1x40xf32> to vector<1x10xf32>
    %791 = math.tanh %790 : vector<1x10xf32>
    %792 = vector.extract_strided_slice %789 {offsets = [0, 0], sizes = [1, 10], strides = [1, 1]} : vector<1x30xf32> to vector<1x10xf32>
    %793 = vector.extract_strided_slice %789 {offsets = [0, 10], sizes = [1, 10], strides = [1, 1]} : vector<1x30xf32> to vector<1x10xf32>
    %794 = vector.extract_strided_slice %789 {offsets = [0, 20], sizes = [1, 10], strides = [1, 1]} : vector<1x30xf32> to vector<1x10xf32>
    %795 = arith.mulf %793, %741 : vector<1x10xf32>
    %796 = arith.mulf %792, %791 : vector<1x10xf32>
    %797 = arith.addf %795, %796 : vector<1x10xf32>
    %798 = math.tanh %797 : vector<1x10xf32>
    %799 = arith.mulf %794, %798 : vector<1x10xf32>
    %800 = vector.extract_strided_slice %799 {offsets = [0, 0], sizes = [1, 1], strides = [1, 1]} : vector<1x10xf32> to vector<1x1xf32>
    %801 = vector.broadcast %800 : vector<1x1xf32> to vector<1x40xf32>
    %802 = arith.mulf %801, %43 : vector<1x40xf32>
    %803 = vector.extract_strided_slice %799 {offsets = [0, 1], sizes = [1, 1], strides = [1, 1]} : vector<1x10xf32> to vector<1x1xf32>
    %804 = vector.broadcast %803 : vector<1x1xf32> to vector<1x40xf32>
    %805 = arith.mulf %804, %44 : vector<1x40xf32>
    %806 = vector.extract_strided_slice %799 {offsets = [0, 2], sizes = [1, 1], strides = [1, 1]} : vector<1x10xf32> to vector<1x1xf32>
    %807 = vector.broadcast %806 : vector<1x1xf32> to vector<1x40xf32>
    %808 = arith.mulf %807, %45 : vector<1x40xf32>
    %809 = vector.extract_strided_slice %799 {offsets = [0, 3], sizes = [1, 1], strides = [1, 1]} : vector<1x10xf32> to vector<1x1xf32>
    %810 = vector.broadcast %809 : vector<1x1xf32> to vector<1x40xf32>
    %811 = arith.mulf %810, %46 : vector<1x40xf32>
    %812 = vector.extract_strided_slice %799 {offsets = [0, 4], sizes = [1, 1], strides = [1, 1]} : vector<1x10xf32> to vector<1x1xf32>
    %813 = vector.broadcast %812 : vector<1x1xf32> to vector<1x40xf32>
    %814 = arith.mulf %813, %47 : vector<1x40xf32>
    %815 = vector.extract_strided_slice %799 {offsets = [0, 5], sizes = [1, 1], strides = [1, 1]} : vector<1x10xf32> to vector<1x1xf32>
    %816 = vector.broadcast %815 : vector<1x1xf32> to vector<1x40xf32>
    %817 = arith.mulf %816, %48 : vector<1x40xf32>
    %818 = vector.extract_strided_slice %799 {offsets = [0, 6], sizes = [1, 1], strides = [1, 1]} : vector<1x10xf32> to vector<1x1xf32>
    %819 = vector.broadcast %818 : vector<1x1xf32> to vector<1x40xf32>
    %820 = arith.mulf %819, %49 : vector<1x40xf32>
    %821 = vector.extract_strided_slice %799 {offsets = [0, 7], sizes = [1, 1], strides = [1, 1]} : vector<1x10xf32> to vector<1x1xf32>
    %822 = vector.broadcast %821 : vector<1x1xf32> to vector<1x40xf32>
    %823 = arith.mulf %822, %50 : vector<1x40xf32>
    %824 = vector.extract_strided_slice %799 {offsets = [0, 8], sizes = [1, 1], strides = [1, 1]} : vector<1x10xf32> to vector<1x1xf32>
    %825 = vector.broadcast %824 : vector<1x1xf32> to vector<1x40xf32>
    %826 = arith.mulf %825, %51 : vector<1x40xf32>
    %827 = vector.extract_strided_slice %799 {offsets = [0, 9], sizes = [1, 1], strides = [1, 1]} : vector<1x10xf32> to vector<1x1xf32>
    %828 = vector.broadcast %827 : vector<1x1xf32> to vector<1x40xf32>
    %829 = arith.mulf %828, %52 : vector<1x40xf32>
    %830 = arith.addf %66, %802 : vector<1x40xf32>
    %831 = arith.addf %805, %808 : vector<1x40xf32>
    %832 = arith.addf %811, %814 : vector<1x40xf32>
    %833 = arith.addf %817, %820 : vector<1x40xf32>
    %834 = arith.addf %823, %826 : vector<1x40xf32>
    %835 = arith.addf %830, %831 : vector<1x40xf32>
    %836 = arith.addf %832, %833 : vector<1x40xf32>
    %837 = arith.addf %834, %829 : vector<1x40xf32>
    %838 = arith.addf %835, %836 : vector<1x40xf32>
    %839 = arith.addf %838, %837 : vector<1x40xf32>
    %840 = vector.extract_strided_slice %839 {offsets = [0, 0], sizes = [1, 30], strides = [1, 1]} : vector<1x40xf32> to vector<1x30xf32>
    %841 = arith.negf %840 : vector<1x30xf32>
    %842 = math.exp %841 : vector<1x30xf32>
    %cst_23 = arith.constant 1.000000e+00 : f32
    %843 = vector.broadcast %cst_23 : f32 to vector<1x30xf32>
    %844 = arith.addf %843, %842 : vector<1x30xf32>
    %845 = arith.divf %843, %844 : vector<1x30xf32>
    %846 = vector.extract_strided_slice %839 {offsets = [0, 30], sizes = [1, 10], strides = [1, 1]} : vector<1x40xf32> to vector<1x10xf32>
    %847 = math.tanh %846 : vector<1x10xf32>
    %848 = vector.extract_strided_slice %845 {offsets = [0, 0], sizes = [1, 10], strides = [1, 1]} : vector<1x30xf32> to vector<1x10xf32>
    %849 = vector.extract_strided_slice %845 {offsets = [0, 10], sizes = [1, 10], strides = [1, 1]} : vector<1x30xf32> to vector<1x10xf32>
    %850 = vector.extract_strided_slice %845 {offsets = [0, 20], sizes = [1, 10], strides = [1, 1]} : vector<1x30xf32> to vector<1x10xf32>
    %851 = arith.mulf %849, %797 : vector<1x10xf32>
    %852 = arith.mulf %848, %847 : vector<1x10xf32>
    %853 = arith.addf %851, %852 : vector<1x10xf32>
    %854 = math.tanh %853 : vector<1x10xf32>
    %855 = arith.mulf %850, %854 : vector<1x10xf32>
    %856 = vector.extract_strided_slice %855 {offsets = [0, 0], sizes = [1, 1], strides = [1, 1]} : vector<1x10xf32> to vector<1x1xf32>
    %857 = vector.broadcast %856 : vector<1x1xf32> to vector<1x40xf32>
    %858 = arith.mulf %857, %43 : vector<1x40xf32>
    %859 = vector.extract_strided_slice %855 {offsets = [0, 1], sizes = [1, 1], strides = [1, 1]} : vector<1x10xf32> to vector<1x1xf32>
    %860 = vector.broadcast %859 : vector<1x1xf32> to vector<1x40xf32>
    %861 = arith.mulf %860, %44 : vector<1x40xf32>
    %862 = vector.extract_strided_slice %855 {offsets = [0, 2], sizes = [1, 1], strides = [1, 1]} : vector<1x10xf32> to vector<1x1xf32>
    %863 = vector.broadcast %862 : vector<1x1xf32> to vector<1x40xf32>
    %864 = arith.mulf %863, %45 : vector<1x40xf32>
    %865 = vector.extract_strided_slice %855 {offsets = [0, 3], sizes = [1, 1], strides = [1, 1]} : vector<1x10xf32> to vector<1x1xf32>
    %866 = vector.broadcast %865 : vector<1x1xf32> to vector<1x40xf32>
    %867 = arith.mulf %866, %46 : vector<1x40xf32>
    %868 = vector.extract_strided_slice %855 {offsets = [0, 4], sizes = [1, 1], strides = [1, 1]} : vector<1x10xf32> to vector<1x1xf32>
    %869 = vector.broadcast %868 : vector<1x1xf32> to vector<1x40xf32>
    %870 = arith.mulf %869, %47 : vector<1x40xf32>
    %871 = vector.extract_strided_slice %855 {offsets = [0, 5], sizes = [1, 1], strides = [1, 1]} : vector<1x10xf32> to vector<1x1xf32>
    %872 = vector.broadcast %871 : vector<1x1xf32> to vector<1x40xf32>
    %873 = arith.mulf %872, %48 : vector<1x40xf32>
    %874 = vector.extract_strided_slice %855 {offsets = [0, 6], sizes = [1, 1], strides = [1, 1]} : vector<1x10xf32> to vector<1x1xf32>
    %875 = vector.broadcast %874 : vector<1x1xf32> to vector<1x40xf32>
    %876 = arith.mulf %875, %49 : vector<1x40xf32>
    %877 = vector.extract_strided_slice %855 {offsets = [0, 7], sizes = [1, 1], strides = [1, 1]} : vector<1x10xf32> to vector<1x1xf32>
    %878 = vector.broadcast %877 : vector<1x1xf32> to vector<1x40xf32>
    %879 = arith.mulf %878, %50 : vector<1x40xf32>
    %880 = vector.extract_strided_slice %855 {offsets = [0, 8], sizes = [1, 1], strides = [1, 1]} : vector<1x10xf32> to vector<1x1xf32>
    %881 = vector.broadcast %880 : vector<1x1xf32> to vector<1x40xf32>
    %882 = arith.mulf %881, %51 : vector<1x40xf32>
    %883 = vector.extract_strided_slice %855 {offsets = [0, 9], sizes = [1, 1], strides = [1, 1]} : vector<1x10xf32> to vector<1x1xf32>
    %884 = vector.broadcast %883 : vector<1x1xf32> to vector<1x40xf32>
    %885 = arith.mulf %884, %52 : vector<1x40xf32>
    %886 = arith.addf %67, %858 : vector<1x40xf32>
    %887 = arith.addf %861, %864 : vector<1x40xf32>
    %888 = arith.addf %867, %870 : vector<1x40xf32>
    %889 = arith.addf %873, %876 : vector<1x40xf32>
    %890 = arith.addf %879, %882 : vector<1x40xf32>
    %891 = arith.addf %886, %887 : vector<1x40xf32>
    %892 = arith.addf %888, %889 : vector<1x40xf32>
    %893 = arith.addf %890, %885 : vector<1x40xf32>
    %894 = arith.addf %891, %892 : vector<1x40xf32>
    %895 = arith.addf %894, %893 : vector<1x40xf32>
    %896 = vector.extract_strided_slice %895 {offsets = [0, 0], sizes = [1, 30], strides = [1, 1]} : vector<1x40xf32> to vector<1x30xf32>
    %897 = arith.negf %896 : vector<1x30xf32>
    %898 = math.exp %897 : vector<1x30xf32>
    %cst_24 = arith.constant 1.000000e+00 : f32
    %899 = vector.broadcast %cst_24 : f32 to vector<1x30xf32>
    %900 = arith.addf %899, %898 : vector<1x30xf32>
    %901 = arith.divf %899, %900 : vector<1x30xf32>
    %902 = vector.extract_strided_slice %895 {offsets = [0, 30], sizes = [1, 10], strides = [1, 1]} : vector<1x40xf32> to vector<1x10xf32>
    %903 = math.tanh %902 : vector<1x10xf32>
    %904 = vector.extract_strided_slice %901 {offsets = [0, 0], sizes = [1, 10], strides = [1, 1]} : vector<1x30xf32> to vector<1x10xf32>
    %905 = vector.extract_strided_slice %901 {offsets = [0, 10], sizes = [1, 10], strides = [1, 1]} : vector<1x30xf32> to vector<1x10xf32>
    %906 = vector.extract_strided_slice %901 {offsets = [0, 20], sizes = [1, 10], strides = [1, 1]} : vector<1x30xf32> to vector<1x10xf32>
    %907 = arith.mulf %905, %853 : vector<1x10xf32>
    %908 = arith.mulf %904, %903 : vector<1x10xf32>
    %909 = arith.addf %907, %908 : vector<1x10xf32>
    %910 = math.tanh %909 : vector<1x10xf32>
    %911 = arith.mulf %906, %910 : vector<1x10xf32>
    %912 = vector.extract_strided_slice %911 {offsets = [0, 0], sizes = [1, 1], strides = [1, 1]} : vector<1x10xf32> to vector<1x1xf32>
    %913 = vector.broadcast %912 : vector<1x1xf32> to vector<1x40xf32>
    %914 = arith.mulf %913, %43 : vector<1x40xf32>
    %915 = vector.extract_strided_slice %911 {offsets = [0, 1], sizes = [1, 1], strides = [1, 1]} : vector<1x10xf32> to vector<1x1xf32>
    %916 = vector.broadcast %915 : vector<1x1xf32> to vector<1x40xf32>
    %917 = arith.mulf %916, %44 : vector<1x40xf32>
    %918 = vector.extract_strided_slice %911 {offsets = [0, 2], sizes = [1, 1], strides = [1, 1]} : vector<1x10xf32> to vector<1x1xf32>
    %919 = vector.broadcast %918 : vector<1x1xf32> to vector<1x40xf32>
    %920 = arith.mulf %919, %45 : vector<1x40xf32>
    %921 = vector.extract_strided_slice %911 {offsets = [0, 3], sizes = [1, 1], strides = [1, 1]} : vector<1x10xf32> to vector<1x1xf32>
    %922 = vector.broadcast %921 : vector<1x1xf32> to vector<1x40xf32>
    %923 = arith.mulf %922, %46 : vector<1x40xf32>
    %924 = vector.extract_strided_slice %911 {offsets = [0, 4], sizes = [1, 1], strides = [1, 1]} : vector<1x10xf32> to vector<1x1xf32>
    %925 = vector.broadcast %924 : vector<1x1xf32> to vector<1x40xf32>
    %926 = arith.mulf %925, %47 : vector<1x40xf32>
    %927 = vector.extract_strided_slice %911 {offsets = [0, 5], sizes = [1, 1], strides = [1, 1]} : vector<1x10xf32> to vector<1x1xf32>
    %928 = vector.broadcast %927 : vector<1x1xf32> to vector<1x40xf32>
    %929 = arith.mulf %928, %48 : vector<1x40xf32>
    %930 = vector.extract_strided_slice %911 {offsets = [0, 6], sizes = [1, 1], strides = [1, 1]} : vector<1x10xf32> to vector<1x1xf32>
    %931 = vector.broadcast %930 : vector<1x1xf32> to vector<1x40xf32>
    %932 = arith.mulf %931, %49 : vector<1x40xf32>
    %933 = vector.extract_strided_slice %911 {offsets = [0, 7], sizes = [1, 1], strides = [1, 1]} : vector<1x10xf32> to vector<1x1xf32>
    %934 = vector.broadcast %933 : vector<1x1xf32> to vector<1x40xf32>
    %935 = arith.mulf %934, %50 : vector<1x40xf32>
    %936 = vector.extract_strided_slice %911 {offsets = [0, 8], sizes = [1, 1], strides = [1, 1]} : vector<1x10xf32> to vector<1x1xf32>
    %937 = vector.broadcast %936 : vector<1x1xf32> to vector<1x40xf32>
    %938 = arith.mulf %937, %51 : vector<1x40xf32>
    %939 = vector.extract_strided_slice %911 {offsets = [0, 9], sizes = [1, 1], strides = [1, 1]} : vector<1x10xf32> to vector<1x1xf32>
    %940 = vector.broadcast %939 : vector<1x1xf32> to vector<1x40xf32>
    %941 = arith.mulf %940, %52 : vector<1x40xf32>
    %942 = arith.addf %68, %914 : vector<1x40xf32>
    %943 = arith.addf %917, %920 : vector<1x40xf32>
    %944 = arith.addf %923, %926 : vector<1x40xf32>
    %945 = arith.addf %929, %932 : vector<1x40xf32>
    %946 = arith.addf %935, %938 : vector<1x40xf32>
    %947 = arith.addf %942, %943 : vector<1x40xf32>
    %948 = arith.addf %944, %945 : vector<1x40xf32>
    %949 = arith.addf %946, %941 : vector<1x40xf32>
    %950 = arith.addf %947, %948 : vector<1x40xf32>
    %951 = arith.addf %950, %949 : vector<1x40xf32>
    %952 = vector.extract_strided_slice %951 {offsets = [0, 0], sizes = [1, 30], strides = [1, 1]} : vector<1x40xf32> to vector<1x30xf32>
    %953 = arith.negf %952 : vector<1x30xf32>
    %954 = math.exp %953 : vector<1x30xf32>
    %cst_25 = arith.constant 1.000000e+00 : f32
    %955 = vector.broadcast %cst_25 : f32 to vector<1x30xf32>
    %956 = arith.addf %955, %954 : vector<1x30xf32>
    %957 = arith.divf %955, %956 : vector<1x30xf32>
    %958 = vector.extract_strided_slice %951 {offsets = [0, 30], sizes = [1, 10], strides = [1, 1]} : vector<1x40xf32> to vector<1x10xf32>
    %959 = math.tanh %958 : vector<1x10xf32>
    %960 = vector.extract_strided_slice %957 {offsets = [0, 0], sizes = [1, 10], strides = [1, 1]} : vector<1x30xf32> to vector<1x10xf32>
    %961 = vector.extract_strided_slice %957 {offsets = [0, 10], sizes = [1, 10], strides = [1, 1]} : vector<1x30xf32> to vector<1x10xf32>
    %962 = vector.extract_strided_slice %957 {offsets = [0, 20], sizes = [1, 10], strides = [1, 1]} : vector<1x30xf32> to vector<1x10xf32>
    %963 = arith.mulf %961, %909 : vector<1x10xf32>
    %964 = arith.mulf %960, %959 : vector<1x10xf32>
    %965 = arith.addf %963, %964 : vector<1x10xf32>
    %966 = math.tanh %965 : vector<1x10xf32>
    %967 = arith.mulf %962, %966 : vector<1x10xf32>
    %c152 = arith.constant 152 : index
    %c0_26 = arith.constant 0 : index
    %968 = vector.load %arg1[%c152, %c0_26] : memref<176x40xf32, #tpu.memory_space<vmem>>, vector<10x2xf32>
    %c168 = arith.constant 168 : index
    %c0_27 = arith.constant 0 : index
    %969 = vector.load %arg1[%c168, %c0_27] : memref<176x40xf32, #tpu.memory_space<vmem>>, vector<1x2xf32>
    %970 = vector.extract_strided_slice %967 {offsets = [0, 0], sizes = [1, 1], strides = [1, 1]} : vector<1x10xf32> to vector<1x1xf32>
    %971 = vector.extract_strided_slice %968 {offsets = [0, 0], sizes = [1, 2], strides = [1, 1]} : vector<10x2xf32> to vector<1x2xf32>
    %972 = vector.broadcast %970 : vector<1x1xf32> to vector<1x2xf32>
    %973 = arith.mulf %972, %971 : vector<1x2xf32>
    %974 = vector.extract_strided_slice %967 {offsets = [0, 1], sizes = [1, 1], strides = [1, 1]} : vector<1x10xf32> to vector<1x1xf32>
    %975 = vector.extract_strided_slice %968 {offsets = [1, 0], sizes = [1, 2], strides = [1, 1]} : vector<10x2xf32> to vector<1x2xf32>
    %976 = vector.broadcast %974 : vector<1x1xf32> to vector<1x2xf32>
    %977 = arith.mulf %976, %975 : vector<1x2xf32>
    %978 = vector.extract_strided_slice %967 {offsets = [0, 2], sizes = [1, 1], strides = [1, 1]} : vector<1x10xf32> to vector<1x1xf32>
    %979 = vector.extract_strided_slice %968 {offsets = [2, 0], sizes = [1, 2], strides = [1, 1]} : vector<10x2xf32> to vector<1x2xf32>
    %980 = vector.broadcast %978 : vector<1x1xf32> to vector<1x2xf32>
    %981 = arith.mulf %980, %979 : vector<1x2xf32>
    %982 = vector.extract_strided_slice %967 {offsets = [0, 3], sizes = [1, 1], strides = [1, 1]} : vector<1x10xf32> to vector<1x1xf32>
    %983 = vector.extract_strided_slice %968 {offsets = [3, 0], sizes = [1, 2], strides = [1, 1]} : vector<10x2xf32> to vector<1x2xf32>
    %984 = vector.broadcast %982 : vector<1x1xf32> to vector<1x2xf32>
    %985 = arith.mulf %984, %983 : vector<1x2xf32>
    %986 = vector.extract_strided_slice %967 {offsets = [0, 4], sizes = [1, 1], strides = [1, 1]} : vector<1x10xf32> to vector<1x1xf32>
    %987 = vector.extract_strided_slice %968 {offsets = [4, 0], sizes = [1, 2], strides = [1, 1]} : vector<10x2xf32> to vector<1x2xf32>
    %988 = vector.broadcast %986 : vector<1x1xf32> to vector<1x2xf32>
    %989 = arith.mulf %988, %987 : vector<1x2xf32>
    %990 = vector.extract_strided_slice %967 {offsets = [0, 5], sizes = [1, 1], strides = [1, 1]} : vector<1x10xf32> to vector<1x1xf32>
    %991 = vector.extract_strided_slice %968 {offsets = [5, 0], sizes = [1, 2], strides = [1, 1]} : vector<10x2xf32> to vector<1x2xf32>
    %992 = vector.broadcast %990 : vector<1x1xf32> to vector<1x2xf32>
    %993 = arith.mulf %992, %991 : vector<1x2xf32>
    %994 = vector.extract_strided_slice %967 {offsets = [0, 6], sizes = [1, 1], strides = [1, 1]} : vector<1x10xf32> to vector<1x1xf32>
    %995 = vector.extract_strided_slice %968 {offsets = [6, 0], sizes = [1, 2], strides = [1, 1]} : vector<10x2xf32> to vector<1x2xf32>
    %996 = vector.broadcast %994 : vector<1x1xf32> to vector<1x2xf32>
    %997 = arith.mulf %996, %995 : vector<1x2xf32>
    %998 = vector.extract_strided_slice %967 {offsets = [0, 7], sizes = [1, 1], strides = [1, 1]} : vector<1x10xf32> to vector<1x1xf32>
    %999 = vector.extract_strided_slice %968 {offsets = [7, 0], sizes = [1, 2], strides = [1, 1]} : vector<10x2xf32> to vector<1x2xf32>
    %1000 = vector.broadcast %998 : vector<1x1xf32> to vector<1x2xf32>
    %1001 = arith.mulf %1000, %999 : vector<1x2xf32>
    %1002 = vector.extract_strided_slice %967 {offsets = [0, 8], sizes = [1, 1], strides = [1, 1]} : vector<1x10xf32> to vector<1x1xf32>
    %1003 = vector.extract_strided_slice %968 {offsets = [8, 0], sizes = [1, 2], strides = [1, 1]} : vector<10x2xf32> to vector<1x2xf32>
    %1004 = vector.broadcast %1002 : vector<1x1xf32> to vector<1x2xf32>
    %1005 = arith.mulf %1004, %1003 : vector<1x2xf32>
    %1006 = vector.extract_strided_slice %967 {offsets = [0, 9], sizes = [1, 1], strides = [1, 1]} : vector<1x10xf32> to vector<1x1xf32>
    %1007 = vector.extract_strided_slice %968 {offsets = [9, 0], sizes = [1, 2], strides = [1, 1]} : vector<10x2xf32> to vector<1x2xf32>
    %1008 = vector.broadcast %1006 : vector<1x1xf32> to vector<1x2xf32>
    %1009 = arith.mulf %1008, %1007 : vector<1x2xf32>
    %1010 = arith.addf %969, %973 : vector<1x2xf32>
    %1011 = arith.addf %977, %981 : vector<1x2xf32>
    %1012 = arith.addf %985, %989 : vector<1x2xf32>
    %1013 = arith.addf %993, %997 : vector<1x2xf32>
    %1014 = arith.addf %1001, %1005 : vector<1x2xf32>
    %1015 = arith.addf %1010, %1011 : vector<1x2xf32>
    %1016 = arith.addf %1012, %1013 : vector<1x2xf32>
    %1017 = arith.addf %1014, %1009 : vector<1x2xf32>
    %1018 = arith.addf %1015, %1016 : vector<1x2xf32>
    %1019 = arith.addf %1018, %1017 : vector<1x2xf32>
    %c0_28 = arith.constant 0 : index
    %c0_29 = arith.constant 0 : index
    %1020 = vector.load %arg2[%c0_28, %c0_29] : memref<1x2xf32, #tpu.memory_space<vmem>>, vector<1x2xf32>
    tpu.vector_store %arg2[%c0_28, %c0_29], %1019 {strides = array<i32>} : memref<1x2xf32, #tpu.memory_space<vmem>>, vector<1x2xf32>,
    return
  }
}

</mosaic_0001>

<bundles_post_ra>
// kernel: deepconvlstm_forward.1
= control target key start
LH: loop header
LB: loop body
LE: loop exit
PB: predicated region body
PF: predicated region fallthrough
CT: control target
= control target key end

     0   :  { %v2394_v2 = vmov 0   ;;  %s3052_s0 = inlined_call_operand.vmem [shape: f32[2,100], index: 0, kind: input, shape index: {}]   ;;  %s3053_s1 = inlined_call_operand.vmem [shape: f32[176,40], index: 1, kind: input, shape index: {}]   ;;  %s3054_s2 = inlined_call_operand.hbm [shape: f32[1,2], index: 2, kind: output, shape index: {}]  }
   0x1   :  { %v20_v0 = vld [vmem:[%s3053_s1 + $0x88] sm:$0xff]  ;;  %v19_v1 = vld [vmem:[%s3053_s1 + $0x80] sm:$0xff]  ;;  %2061 = vset.pattern.permute.xlu1 %v2394_v2  ;;  %2059 = vset.pattern.permute.xlu0 %v2394_v2 }
   0x2   :  { %7 = vsyncpa [#allocation3], 0  ;;  %28 = vperm.xlu1 %2061, %v20_v0   ;;  %23 = vperm.xlu0 %2059, %v19_v1   ;;  %v2395_v3 = vmov 1   ;;  %v2396_v4 = vmov 2   ;;  %v12_v5 = vld [vmem:[%s3052_s0] sm:$0x3]  ;;  %v31_v23 = vlaneseq }
   0x3   :  { %v2397_v6 = vmov 3   ;;  %s2398_s15 = smov 127   ;;  %v2399_v7 = vmov 4   ;;  %v109_v8 = vld [vmem:[%s3053_s1] sm:$0xff]  ;;  %v110_v9 = vld [vmem:[%s3053_s1 + $0x8] sm:$0xff]  ;;  %v111_v10 = vld [vmem:[%s3053_s1 + $0x10] sm:$0xff] }
   0x4   :  { %v2011_v11 = vpack.c.bf16 %v110_v9, %v109_v8  ;;  %v112_v12 = vld [vmem:[%s3053_s1 + $0x18] sm:$0xff]  ;;  %v113_v14 = vld [vmem:[%s3053_s1 + $0x20] sm:$0xff]  ;;  %v114_v15 = vld [vmem:[%s3053_s1 + $0x28] sm:$0xff]  ;;  %v32_v26 = vshrl.u32 %v31_v23, 7  ;;  %vm17_vm0 = vcmask 809984   ;;  %vm134_vm1 = vcmask 1043456  }
   0x5   :  { %v2015_v13 = vpack.c.bf16 %v112_v12, %v111_v10  ;;  %v2019_v16 = vpack.c.bf16 %v114_v15, %v113_v14  ;;  %v115_v17 = vld [vmem:[%s3053_s1 + $0x30] sm:$0xff]  ;;  %v116_v18 = vld [vmem:[%s3053_s1 + $0x38] sm:$0xff]  ;;  %v117_v20 = vld [vmem:[%s3053_s1 + $0x40] sm:$0xff]  ;;  %v2404_v8 = vmov 8   ;;  %vm127_vm2 = vcmask 818176   ;;  %s2405_s20 = smov 98  }
   0x6   :  { %2062 = vset.pattern.permute.xlu1 %v2395_v3  ;;  %2060 = vset.pattern.permute.xlu0 %v2395_v3  ;;  %v2023_v19 = vpack.c.bf16 %v116_v18, %v115_v17  ;;  %v118_v21 = vld [vmem:[%s3053_s1 + $0x48] sm:$0xff]  ;;  %v47_v29 = vsub.s32 1, %v32_v26  ;;  %v33_v30 = vsub.s32 0, %v32_v26  ;;  %v119_v38 = vld [vmem:[%s3053_s1 + $0x50] sm:$0xff]  ;;  %v120_v39 = vld [vmem:[%s3053_s1 + $0x58] sm:$0xff]  ;;  %s2406_s21 = smov 10  }
   0x7   :  { %42 = vperm.xlu1 %2062, %v20_v0   ;;  %38 = vperm.xlu0 %2060, %v19_v1   ;;  %v2027_v22 = vpack.c.bf16 %v118_v21, %v117_v20  ;;  %v2031_v42 = vpack.c.bf16 %v120_v39, %v119_v38  ;;  %v121_v56 = vld [vmem:[%s3053_s1 + $0x60] sm:$0xf]  ;;  %v2491_v59 = vld [vmem:[%s3053_s1 + $0x90] sm:$0x3]  ;;  %v2513_v20 = vld [vmem:[%s3053_s1 + $0x68] sm:$0xff]  ;;  %s2417_s6 = smov [#allocation2]  }
   0x8   :  { %2012 = vmatprep.subr.bf16.mxu0 %v2011_v11  ;;  %v48_v31 = vrot.slane %v12_v5, %v47_v29  ;;  %v34_v34 = vrot.slane %v12_v5, %v33_v30  ;;  %v2516_v21 = vrot.slane %v2513_v20, 3  ;;  %v2522_v23 = vrot.slane %v2513_v20, 6  ;;  %s1939_s7 = sshll.u32 %s2417_s6, 4  ;;  %s1940_s7 = int_to_ptr.vmem [resolvable:$true] %s1939_s7 }
   0x9   :  { %2014 = vmatpush3.bf16.msra.mxu0 %v2011_v11  ;;  %v2528_v26 = vrot.slane %v2513_v20, 1  ;;  %vm1931_vm3 = vcmask 8192   ;;  %s2370_s8 = scalar_lea.vmem %s1940_s7, 16  ;;  %p2375_p1 = scmp.lt.s32.totalorder %s1940_s7, %s1940_s7 }
   0xa   :  { %2016 = vmatprep.subr.bf16.mxu0 %v2015_v13  ;;  %p2371_p0 = scmp.ne.s32.totalorder %s1940_s7, %s2370_s8 }
   0xb   :  { %2063 = vset.pattern.permute.xlu1 %v2396_v4  ;;  %2064 = vset.pattern.permute.xlu0 %v2396_v4 }
   0xc   :  { %54 = vperm.xlu1 %2063, %v19_v1   ;;  %58 = vperm.xlu0 %2064, %v20_v0  }
   0xd   :  { %2018 = vmatpush3.bf16.msra.mxu0 %v2015_v13 }
   0xe   :  { %2020 = vmatprep.subr.bf16.mxu0 %v2019_v16 }
  0x10   :  { %2065 = vset.pattern.permute.xlu1 %v2397_v6  ;;  %14 = vrot.lane.b32.xlu0 %v12_v5, %s2398_s15  ;;  %v2402_v5 = vmov 5  }
  0x11   :  { %70 = vperm.xlu1 %2065, %v19_v1   ;;  %2067 = vset.pattern.permute.xlu0 %v2399_v7 }
  0x12   :  { %2022 = vmatpush3.bf16.msra.mxu0 %v2019_v16 }
  0x13   :  { %2024 = vmatprep.subr.bf16.mxu0 %v2023_v19 }
  0x14   :  { %90 = vperm.xlu0 %2067, %v20_v0  }
  0x15   :  { %74 = vperm.xlu1 %2065, %v20_v0  }
  0x16   :  { %2026 = vmatpush3.bf16.msra.mxu0 %v2023_v19 }
  0x17   :  { %2028 = vmatprep.subr.bf16.mxu0 %v2027_v22 }
  0x18   :  { %2068 = vset.pattern.permute.xlu0 %v2394_v2  ;;  %v2400_v2 = vmov 6  }
  0x19   :  { %2066 = vset.pattern.permute.xlu1 %v2399_v7  ;;  %218 = vperm.xlu0 %2068, %v2491_v59  }
  0x1a   :  { %86 = vperm.xlu1 %2066, %v19_v1   ;;  %2030 = vmatpush3.bf16.msra.mxu0 %v2027_v22  ;;  %v2519_v22 = vrot.slane %v2513_v20, 4 }
  0x1b   :  { %2032 = vmatprep.subr.bf16.mxu0 %v2031_v42 }
  0x1d   :  { %2071 = vset.pattern.permute.xlu0 %v2397_v6  ;;  %v2403_v6 = vmov 7  }
  0x1e   :  { %2069 = vset.pattern.permute.xlu1 %v2395_v3  ;;  %2034 = vmatpush3.bf16.msra.mxu0 %v2031_v42  ;;  %v2401_v3 = vmov 9  }
  0x1f   :  { %2006 = vmatprep.subr.msk.mxu0 %vm134_vm1, %v121_v56  ;;  %238 = vperm.xlu0 %2071, %v2491_v59  }
  0x22   :  { %2007 = vmatpush3.msk.msra.mxu0 %vm134_vm1, %v121_v56 }
  0x23   :  { %2074 = vset.pattern.permute.xlu0 %v2400_v2 }
  0x24   :  { %259 = vperm.xlu0 %2074, %v2491_v59  }
  0x28   :  { %2077 = vset.pattern.permute.xlu0 %v2401_v3 }
  0x29   :  { %278 = vperm.xlu0 %2077, %v2491_v59  }
  0x81   :  { %v29_v24 = vpop.permute.xlu1 %28  ;;  %v24_v25 = vpop.permute.xlu0 %23 }
  0x82   :  { %v36_v43 = vmul.f32 %v34_v34, %v29_v24  ;;  %v35_v44 = vmul.f32 %v34_v34, %v24_v25  ;;  %v2525_v24 = vrot.slane %v2513_v20, 5 }
  0x86   :  { %v43_v27 = vpop.permute.xlu1 %42  ;;  %v39_v28 = vpop.permute.xlu0 %38 }
  0x87   :  { %v50_v35 = vmul.f32 %v48_v31, %v43_v27  ;;  %v49_v36 = vmul.f32 %v48_v31, %v39_v28  ;;  %v2531_v27 = vrot.slane %v2513_v20, 2  ;;  %v2534_v28 = vrot.slane %v2513_v20, 7 }
  0x89   :  { %v52_v47 = vadd.f32 %v50_v35, %v36_v43  ;;  %v51_v48 = vadd.f32 %v49_v36, %v35_v44  ;;  %v1947_v35 = vld [vmem:[%s3053_s1 + $0x78] ss:$0 sm:$0xff] }
  0x8b   :  { %v55_v32 = vpop.permute.xlu1 %54  ;;  %v59_v33 = vpop.permute.xlu0 %58 }
  0x8f   :  { %v15_v37 = vpop.permute.xlu0 %14 }
  0x90   :  { %v18_v40 = vsel %vm17_vm0, %v15_v37, 0.0  ;;  %v71_v41 = vpop.permute.xlu1 %70 }
  0x91   :  { %v64_v45 = vrot.slane %v18_v40, %v33_v30  ;;  %v80_v46 = vrot.slane %v18_v40, %v47_v29  ;;  %v2539_v29 = vld [vmem:[%s3053_s1 + $0x70] sm:$0x3] }
  0x92   :  { %v2549_v36 = vrot.slane %v2539_v29, 1 }
  0x93   :  { %v65_v49 = vmul.f32 %v64_v45, %v55_v32  ;;  %v66_v50 = vmul.f32 %v64_v45, %v59_v33  ;;  %v81_v51 = vmul.f32 %v80_v46, %v71_v41  ;;  %v91_v60 = vpop.permute.xlu0 %90 }
  0x94   :  { %v75_v52 = vpop.permute.xlu1 %74 }
  0x95   :  { %v82_v53 = vmul.f32 %v80_v46, %v75_v52  ;;  %v68_v54 = vadd.f32 %v66_v50, %v52_v47  ;;  %v67_v55 = vadd.f32 %v65_v49, %v51_v48 }
  0x97   :  { %v83_v57 = vadd.f32 %v81_v51, %v67_v55  ;;  %v84_v58 = vadd.f32 %v82_v53, %v68_v54 }
  0x98   :  { %v219_v16 = vpop.permute.xlu0 %218 }
  0x99   :  { %v87_v61 = vpop.permute.xlu1 %86  ;;  %v94_v63 = vadd.f32 %v91_v60, %v84_v58  ;;  %v221_v45 = vmul.f32 %v219_v16, %v2513_v20  ;;  %v302_v60 = vrot.slane %v2491_v59, 1  ;;  %v2414_v16 = vmov 29  }
  0x9a   :  { %v93_v62 = vadd.f32 %v87_v61, %v83_v57 }
  0x9b   :  { %v96_v1 = vmax.f32 %v94_v63, 0.0 }
  0x9c   :  { %v95_v0 = vmax.f32 %v93_v62, 0.0 }
  0x9e   :  { %99 = vrot.lane.b32.xlu1 %v95_v0, %s2398_s15  ;;  %v239_v18 = vpop.permute.xlu0 %238 }
  0x9f   :  { %v243_v31 = vmul.f32 %v2516_v21, %v239_v18  ;;  %v2416_v18 = vmov 28  }
  0xa2   :  { %101 = vrot.lane.b32.xlu1 %v96_v1, %s2398_s15 }
  0xa3   :  { %v260_v25 = vpop.permute.xlu0 %259 }
  0xa4   :  { %v264_v33 = vmul.f32 %v2522_v23, %v260_v25 }
  0xa6   :  { %223 = vperm.xlu1 %2069, %v2491_v59  }
  0xa8   :  { %v279_v42 = vpop.permute.xlu0 %278 }
  0xa9   :  { %v284_v51 = vmul.f32 %v2549_v36, %v279_v42 }
  0xaa   :  { %2070 = vset.pattern.permute.xlu1 %v2396_v4 }
  0xab   :  { %231 = vperm.xlu1 %2070, %v2491_v59  }
  0xaf   :  { %2072 = vset.pattern.permute.xlu1 %v2399_v7 }
  0xb0   :  { %245 = vperm.xlu1 %2072, %v2491_v59  }
  0xb4   :  { %2073 = vset.pattern.permute.xlu1 %v2402_v5 }
  0xb5   :  { %252 = vperm.xlu1 %2073, %v2491_v59  }
  0xb9   :  { %2075 = vset.pattern.permute.xlu1 %v2403_v6 }
  0xba   :  { %266 = vperm.xlu1 %2075, %v2491_v59  }
  0xbe   :  { %2076 = vset.pattern.permute.xlu1 %v2404_v8 }
  0xbf   :  { %273 = vperm.xlu1 %2076, %v2491_v59   ;;  %v2408_v59 = vmov 21  }
  0xc3   :  { %2079 = vset.pattern.permute.xlu1 %v2408_v59 }
 0x110   :  { %v100_v9 = vpop.permute.xlu1 %99 }
 0x111   :  { %v105_v4 = vsel %vm17_vm0, %v100_v9, 0.0  ;;  %v2407_v9 = vmov 20  }
 0x112   :  { %v107_v10 = vmax.f32 %v95_v0, %v105_v4  ;;  %2078 = vset.pattern.permute.xlu0 %v2407_v9 }
 0x114   :  { %2008 = vmatprep.mubr.msk.f32.mxu0 %vm127_vm2, %v107_v10  ;;  %v102_v7 = vpop.permute.xlu1 %101 }
 0x115   :  { %v106_v11 = vsel %vm17_vm0, %v102_v7, 0.0 }
 0x116   :  { %v108_v12 = vmax.f32 %v96_v1, %v106_v11  ;;  %v2409_v11 = vmov 22  }
 0x118   :  { %2009 = vmatmul.mubr.msk.f32.vlgmr.msra.gmra.mrb[0].mxu0 %vm127_vm2, %v108_v12  ;;  %v2410_v12 = vmov 23  }
 0x125   :  { %v224_v13 = vpop.permute.xlu1 %223 }
 0x126   :  { %v229_v37 = vmul.f32 %v2528_v26, %v224_v13  ;;  %v2411_v13 = vmov 24  }
 0x12a   :  { %v232_v14 = vpop.permute.xlu1 %231 }
 0x12b   :  { %v236_v38 = vmul.f32 %v2531_v27, %v232_v14  ;;  %v2412_v14 = vmov 26  }
 0x12d   :  { %v286_v49 = vadd.f32 %v236_v38, %v229_v37 }
 0x12f   :  { %v246_v15 = vpop.permute.xlu1 %245 }
 0x130   :  { %v250_v32 = vmul.f32 %v2519_v22, %v246_v15  ;;  %v2413_v15 = vmov 25  }
 0x132   :  { %v287_v46 = vadd.f32 %v250_v32, %v243_v31 }
 0x134   :  { %v253_v17 = vpop.permute.xlu1 %252 }
 0x135   :  { %v257_v34 = vmul.f32 %v2525_v24, %v253_v17  ;;  %v2415_v17 = vmov 27  }
 0x137   :  { %v288_v47 = vadd.f32 %v264_v33, %v257_v34 }
 0x139   :  { %v267_v19 = vpop.permute.xlu1 %266  ;;  %v291_v53 = vadd.f32 %v288_v47, %v287_v46 }
 0x13a   :  { %v271_v39 = vmul.f32 %v2534_v28, %v267_v19 }
 0x13e   :  { %v274_v30 = vpop.permute.xlu1 %273 }
 0x13f   :  { %v276_v40 = vmul.f32 %v274_v30, %v2539_v29 }
 0x141   :  { %v289_v50 = vadd.f32 %v276_v40, %v271_v39 }
 0x143   :  { %v292_v55 = vadd.f32 %v289_v50, %v284_v51 }
 0x1eb   :  { %v2010_v41 = vpop.f32.mrb[0].mxu0 }
 0x1ec   :  { %v2555_v43 = vadd.f32 %v2010_v41, %v1947_v35  ;;  %v204_v44 = vpop.f32.mrb[1].mxu0 }
 0x1ed   :  { %v2558_v48 = vadd.f32 %v1947_v35, %v204_v44 }
 0x1ef   :  { %v285_v52 = vadd.f32 %v221_v45, %v2558_v48 }
 0x1f1   :  { %v290_v54 = vadd.f32 %v286_v49, %v285_v52 }
 0x1f3   :  { %v293_v56 = vadd.f32 %v291_v53, %v290_v54 }
 0x1f5   :  { %v294_v57 = vadd.f32 %v293_v56, %v292_v55 }
 0x1f7   :  { %2239 = vtanh.f32 %v294_v57  ;;  %v1951_v61 = vmul.f32 -1.442695, %v294_v57 }
 0x1f9   :  { %2241 = vpow2.f32 %v1951_v61 }
 0x201   :  { %v2240_v58 = vpop.eup %2239 }
 0x202   :  { %308 = vrot.lane.b32.xlu1 %v2240_v58, %s2405_s20 }
 0x203   :  { %v2242_v62 = vpop.eup %2241 }
 0x204   :  { %v298_v63 = vadd.f32 1.0, %v2242_v62 }
 0x206   :  { %303 = vrot.lane.b32.xlu1 %v302_v60, %s2406_s21  ;;  %2243 = vrcp.f32 %v298_v63 }
 0x210   :  { %v2244_v0 = vpop.eup %2243 }
 0x274   :  { %v309_v1 = vpop.permute.xlu1 %308 }
 0x275   :  { %v311_v2 = vmul.f32 %v2244_v0, %v309_v1 }
 0x277   :  { %313 = vrot.lane.b32.xlu0 %v311_v2, %s2406_s21 }
 0x278   :  { %v304_v3 = vpop.permute.xlu1 %303 }
 0x279   :  { %v306_v5 = vmul.f32 %v2244_v0, %v304_v3 }
 0x2e9   :  { %v314_v6 = vpop.permute.xlu0 %313 }
 0x2ea   :  { %v2566_v8 = vadd.f32 %v314_v6, %v306_v5 }
 0x2ec   :  { %2245 = vtanh.f32 %v2566_v8 }
 0x2f6   :  { %v2246_v4 = vpop.eup %2245 }
 0x2f7   :  { %319 = vrot.lane.b32.xlu1 %v2246_v4, %s2406_s21 }
 0x369   :  { %v320_v10 = vpop.permute.xlu1 %319 }
 0x36a   :  { %v322_v7 = vmul.f32 %v2244_v0, %v320_v10 }
 0x36c   :  { %330 = vperm.xlu1 %2079, %v322_v7   ;;  %325 = vperm.xlu0 %2078, %v322_v7  }
 0x370   :  { %2080 = vset.pattern.permute.xlu1 %v2409_v11  ;;  %2081 = vset.pattern.permute.xlu0 %v2410_v12 }
 0x371   :  { %335 = vperm.xlu1 %2080, %v322_v7   ;;  %340 = vperm.xlu0 %2081, %v322_v7  }
 0x375   :  { %2082 = vset.pattern.permute.xlu1 %v2411_v13  ;;  %2084 = vset.pattern.permute.xlu0 %v2412_v14 }
 0x376   :  { %345 = vperm.xlu1 %2082, %v322_v7   ;;  %355 = vperm.xlu0 %2084, %v322_v7  }
 0x37a   :  { %2083 = vset.pattern.permute.xlu1 %v2413_v15  ;;  %2087 = vset.pattern.permute.xlu0 %v2414_v16 }
 0x37b   :  { %350 = vperm.xlu1 %2083, %v322_v7   ;;  %370 = vperm.xlu0 %2087, %v322_v7  }
 0x37f   :  { %2085 = vset.pattern.permute.xlu1 %v2415_v17  ;;  %2089 = vset.pattern.permute.xlu0 %v2408_v59 }
 0x380   :  { %360 = vperm.xlu1 %2085, %v322_v7  }
 0x384   :  { %2086 = vset.pattern.permute.xlu1 %v2416_v18 }
 0x385   :  { %365 = vperm.xlu1 %2086, %v322_v7  }
 0x389   :  { %2088 = vset.pattern.permute.xlu1 %v2407_v9 }
 0x3eb   :  { %v331_v19 = vpop.permute.xlu1 %330  ;;  %v326_v25 = vpop.permute.xlu0 %325 }
 0x3ec   :  { %v333_v40 = vmul.f32 %v331_v19, %v2528_v26  ;;  %v328_v41 = vmul.f32 %v326_v25, %v2513_v20  ;;  %v404_v19 = vrot.slane %v2566_v8, 7 }
 0x3ee   :  { %v375_v49 = vrot.slane %v328_v41, 7 }
 0x3f0   :  { %v336_v30 = vpop.permute.xlu1 %335  ;;  %v341_v31 = vpop.permute.xlu0 %340  ;;  %v377_v56 = vadd.f32 %v375_v49, %v2558_v48 }
 0x3f1   :  { %v338_v37 = vmul.f32 %v336_v30, %v2531_v27  ;;  %v343_v42 = vmul.f32 %v341_v31, %v2516_v21 }
 0x3f3   :  { %v378_v46 = vadd.f32 %v338_v37, %v333_v40 }
 0x3f5   :  { %v346_v32 = vpop.permute.xlu1 %345  ;;  %v356_v33 = vpop.permute.xlu0 %355  ;;  %v383_v53 = vrot.slane %v378_v46, 7 }
 0x3f6   :  { %v348_v38 = vmul.f32 %v346_v32, %v2519_v22  ;;  %v358_v39 = vmul.f32 %v356_v33, %v2522_v23 }
 0x3f7   :  { %v385_v61 = vadd.f32 %v383_v53, %v377_v56 }
 0x3f8   :  { %v379_v47 = vadd.f32 %v348_v38, %v343_v42 }
 0x3fa   :  { %v351_v34 = vpop.permute.xlu1 %350  ;;  %v371_v51 = vpop.permute.xlu0 %370 }
 0x3fb   :  { %v353_v35 = vmul.f32 %v351_v34, %v2525_v24  ;;  %v373_v58 = vmul.f32 %v371_v51, %v2549_v36 }
 0x3fd   :  { %v380_v44 = vadd.f32 %v358_v39, %v353_v35 }
 0x3ff   :  { %v361_v45 = vpop.permute.xlu1 %360  ;;  %v386_v50 = vadd.f32 %v380_v44, %v379_v47  ;;  %v2615_v47 = vrot.slane %v2539_v29, 7 }
 0x400   :  { %v363_v54 = vmul.f32 %v361_v45, %v2534_v28 }
 0x401   :  { %v389_v57 = vrot.slane %v386_v50, 7 }
 0x403   :  { %v391_v63 = vadd.f32 %v389_v57, %v385_v61 }
 0x404   :  { %v366_v52 = vpop.permute.xlu1 %365 }
 0x405   :  { %v368_v55 = vmul.f32 %v366_v52, %v2539_v29 }
 0x407   :  { %v381_v60 = vadd.f32 %v368_v55, %v363_v54 }
 0x409   :  { %v387_v62 = vadd.f32 %v381_v60, %v373_v58 }
 0x40b   :  { %v393_v0 = vrot.slane %v387_v62, 7 }
 0x40d   :  { %v395_v1 = vadd.f32 %v393_v0, %v391_v63 }
 0x40f   :  { %2247 = vtanh.f32 %v395_v1  ;;  %v1952_v3 = vmul.f32 -1.442695, %v395_v1 }
 0x411   :  { %2249 = vpow2.f32 %v1952_v3 }
 0x419   :  { %v2248_v2 = vpop.eup %2247 }
 0x41a   :  { %408 = vrot.lane.b32.xlu1 %v2248_v2, %s2405_s20 }
 0x41b   :  { %v2250_v5 = vpop.eup %2249 }
 0x41c   :  { %v399_v6 = vadd.f32 1.0, %v2250_v5 }
 0x41e   :  { %2251 = vrcp.f32 %v399_v6 }
 0x428   :  { %v2252_v4 = vpop.eup %2251 }
 0x429   :  { %v406_v25 = vmul.f32 %v2252_v4, %v404_v19 }
 0x48c   :  { %v409_v10 = vpop.permute.xlu1 %408 }
 0x48d   :  { %v411_v7 = vmul.f32 %v2252_v4, %v409_v10 }
 0x48f   :  { %413 = vrot.lane.b32.xlu1 %v411_v7, %s2406_s21 }
 0x501   :  { %v414_v30 = vpop.permute.xlu1 %413 }
 0x502   :  { %v2596_v31 = vadd.f32 %v414_v30, %v406_v25 }
 0x504   :  { %2253 = vtanh.f32 %v2596_v31 }
 0x50e   :  { %v2254_v32 = vpop.eup %2253 }
 0x50f   :  { %419 = vrot.lane.b32.xlu0 %v2254_v32, %s2406_s21 }
 0x581   :  { %v420_v33 = vpop.permute.xlu0 %419 }
 0x582   :  { %v422_v34 = vmul.f32 %v2252_v4, %v420_v33 }
 0x584   :  { %430 = vperm.xlu0 %2089, %v422_v34   ;;  %425 = vperm.xlu1 %2088, %v422_v34  }
 0x588   :  { %2092 = vset.pattern.permute.xlu0 %v2411_v13  ;;  %2090 = vset.pattern.permute.xlu1 %v2409_v11 }
 0x589   :  { %445 = vperm.xlu0 %2092, %v422_v34   ;;  %435 = vperm.xlu1 %2090, %v422_v34  }
 0x58d   :  { %2095 = vset.pattern.permute.xlu0 %v2415_v17  ;;  %2091 = vset.pattern.permute.xlu1 %v2410_v12 }
 0x58e   :  { %460 = vperm.xlu0 %2095, %v422_v34   ;;  %440 = vperm.xlu1 %2091, %v422_v34  }
 0x592   :  { %2093 = vset.pattern.permute.xlu1 %v2413_v15  ;;  %2099 = vset.pattern.permute.xlu0 %v2408_v59 }
 0x593   :  { %450 = vperm.xlu1 %2093, %v422_v34  }
 0x597   :  { %2094 = vset.pattern.permute.xlu1 %v2412_v14 }
 0x598   :  { %455 = vperm.xlu1 %2094, %v422_v34  }
 0x59c   :  { %2096 = vset.pattern.permute.xlu1 %v2416_v18 }
 0x59d   :  { %465 = vperm.xlu1 %2096, %v422_v34  }
 0x5a1   :  { %2097 = vset.pattern.permute.xlu1 %v2414_v16 }
 0x5a2   :  { %472 = vperm.xlu1 %2097, %v422_v34  }
 0x5a6   :  { %2098 = vset.pattern.permute.xlu1 %v2407_v9 }
 0x603   :  { %v426_v8 = vpop.permute.xlu1 %425  ;;  %v431_v38 = vpop.permute.xlu0 %430 }
 0x604   :  { %v433_v49 = vmul.f32 %v431_v38, %v2513_v20  ;;  %v428_v50 = vmul.f32 %v426_v8, %v2534_v28 }
 0x606   :  { %v477_v57 = vrot.slane %v428_v50, 7 }
 0x608   :  { %v436_v35 = vpop.permute.xlu1 %435  ;;  %v446_v40 = vpop.permute.xlu0 %445  ;;  %v479_v0 = vadd.f32 %v477_v57, %v2558_v48 }
 0x609   :  { %v438_v42 = vmul.f32 %v436_v35, %v2528_v26  ;;  %v448_v51 = vmul.f32 %v446_v40, %v2516_v21  ;;  %v506_v35 = vrot.slane %v2596_v31, 7 }
 0x60b   :  { %v480_v53 = vadd.f32 %v438_v42, %v433_v49 }
 0x60d   :  { %v441_v37 = vpop.permute.xlu1 %440  ;;  %v461_v56 = vpop.permute.xlu0 %460  ;;  %v485_v61 = vrot.slane %v480_v53, 7 }
 0x60e   :  { %v443_v44 = vmul.f32 %v441_v37, %v2531_v27  ;;  %v463_v62 = vmul.f32 %v461_v56, %v2522_v23  ;;  %v2646_v56 = vrot.slane %v2539_v29, 6 }
 0x60f   :  { %v487_v5 = vadd.f32 %v485_v61, %v479_v0 }
 0x610   :  { %v481_v54 = vadd.f32 %v448_v51, %v443_v44 }
 0x612   :  { %v451_v39 = vpop.permute.xlu1 %450 }
 0x613   :  { %v453_v45 = vmul.f32 %v451_v39, %v2519_v22 }
 0x617   :  { %v456_v41 = vpop.permute.xlu1 %455 }
 0x618   :  { %v458_v46 = vmul.f32 %v456_v41, %v2525_v24 }
 0x61a   :  { %v482_v52 = vadd.f32 %v458_v46, %v453_v45 }
 0x61c   :  { %v466_v55 = vpop.permute.xlu1 %465  ;;  %v488_v58 = vadd.f32 %v482_v52, %v481_v54 }
 0x61d   :  { %v470_v60 = vmul.f32 %v2615_v47, %v466_v55 }
 0x61e   :  { %v491_v1 = vrot.slane %v488_v58, 7 }
 0x61f   :  { %v483_v2 = vadd.f32 %v470_v60, %v463_v62 }
 0x620   :  { %v493_v4 = vadd.f32 %v491_v1, %v487_v5 }
 0x621   :  { %v473_v63 = vpop.permute.xlu1 %472 }
 0x622   :  { %v475_v3 = vmul.f32 %v473_v63, %v2539_v29 }
 0x624   :  { %v489_v6 = vadd.f32 %v483_v2, %v475_v3 }
 0x626   :  { %v495_v10 = vrot.slane %v489_v6, 7 }
 0x628   :  { %v497_v7 = vadd.f32 %v495_v10, %v493_v4 }
 0x62a   :  { %2255 = vtanh.f32 %v497_v7  ;;  %v1953_v25 = vmul.f32 -1.442695, %v497_v7 }
 0x62c   :  { %2257 = vpow2.f32 %v1953_v25 }
 0x634   :  { %v2256_v19 = vpop.eup %2255 }
 0x635   :  { %510 = vrot.lane.b32.xlu0 %v2256_v19, %s2405_s20 }
 0x636   :  { %v2258_v30 = vpop.eup %2257 }
 0x637   :  { %v501_v32 = vadd.f32 1.0, %v2258_v30 }
 0x639   :  { %2259 = vrcp.f32 %v501_v32 }
 0x643   :  { %v2260_v33 = vpop.eup %2259 }
 0x644   :  { %v508_v37 = vmul.f32 %v2260_v33, %v506_v35 }
 0x6a7   :  { %v511_v34 = vpop.permute.xlu0 %510 }
 0x6a8   :  { %v513_v8 = vmul.f32 %v2260_v33, %v511_v34 }
 0x6aa   :  { %515 = vrot.lane.b32.xlu1 %v513_v8, %s2406_s21 }
 0x71c   :  { %v516_v38 = vpop.permute.xlu1 %515 }
 0x71d   :  { %v2627_v39 = vadd.f32 %v516_v38, %v508_v37 }
 0x71f   :  { %2261 = vtanh.f32 %v2627_v39 }
 0x729   :  { %v2262_v40 = vpop.eup %2261 }
 0x72a   :  { %521 = vrot.lane.b32.xlu0 %v2262_v40, %s2406_s21 }
 0x79c   :  { %v522_v41 = vpop.permute.xlu0 %521 }
 0x79d   :  { %v524_v42 = vmul.f32 %v2260_v33, %v522_v41 }
 0x79f   :  { %532 = vperm.xlu0 %2099, %v524_v42   ;;  %527 = vperm.xlu1 %2098, %v524_v42  }
 0x7a3   :  { %2102 = vset.pattern.permute.xlu0 %v2411_v13  ;;  %2100 = vset.pattern.permute.xlu1 %v2409_v11 }
 0x7a4   :  { %547 = vperm.xlu0 %2102, %v524_v42   ;;  %537 = vperm.xlu1 %2100, %v524_v42  }
 0x7a8   :  { %2105 = vset.pattern.permute.xlu0 %v2415_v17  ;;  %2101 = vset.pattern.permute.xlu1 %v2410_v12 }
 0x7a9   :  { %562 = vperm.xlu0 %2105, %v524_v42   ;;  %542 = vperm.xlu1 %2101, %v524_v42  }
 0x7ad   :  { %2103 = vset.pattern.permute.xlu1 %v2413_v15  ;;  %2109 = vset.pattern.permute.xlu0 %v2408_v59 }
 0x7ae   :  { %552 = vperm.xlu1 %2103, %v524_v42  }
 0x7b2   :  { %2104 = vset.pattern.permute.xlu1 %v2412_v14 }
 0x7b3   :  { %557 = vperm.xlu1 %2104, %v524_v42  }
 0x7b7   :  { %2106 = vset.pattern.permute.xlu1 %v2416_v18 }
 0x7b8   :  { %567 = vperm.xlu1 %2106, %v524_v42  }
 0x7bc   :  { %2107 = vset.pattern.permute.xlu1 %v2414_v16 }
 0x7bd   :  { %574 = vperm.xlu1 %2107, %v524_v42  }
 0x7c1   :  { %2108 = vset.pattern.permute.xlu1 %v2407_v9 }
 0x81e   :  { %v528_v31 = vpop.permute.xlu1 %527  ;;  %v533_v46 = vpop.permute.xlu0 %532 }
 0x81f   :  { %v535_v57 = vmul.f32 %v533_v46, %v2534_v28  ;;  %v530_v58 = vmul.f32 %v528_v31, %v2522_v23 }
 0x821   :  { %v579_v2 = vrot.slane %v530_v58, 7 }
 0x823   :  { %v538_v44 = vpop.permute.xlu1 %537  ;;  %v548_v50 = vpop.permute.xlu0 %547  ;;  %v581_v7 = vadd.f32 %v579_v2, %v2558_v48  ;;  %v2677_v2 = vrot.slane %v2539_v29, 5 }
 0x824   :  { %v540_v52 = vmul.f32 %v538_v44, %v2513_v20  ;;  %v550_v60 = vmul.f32 %v548_v50, %v2531_v27 }
 0x826   :  { %v582_v62 = vadd.f32 %v540_v52, %v535_v57 }
 0x828   :  { %v543_v45 = vpop.permute.xlu1 %542  ;;  %v563_v1 = vpop.permute.xlu0 %562  ;;  %v587_v6 = vrot.slane %v582_v62, 7 }
 0x829   :  { %v545_v53 = vmul.f32 %v543_v45, %v2528_v26  ;;  %v565_v4 = vmul.f32 %v563_v1, %v2525_v24  ;;  %v608_v45 = vrot.slane %v2627_v39, 7 }
 0x82a   :  { %v589_v32 = vadd.f32 %v587_v6, %v581_v7 }
 0x82b   :  { %v583_v63 = vadd.f32 %v550_v60, %v545_v53 }
 0x82d   :  { %v553_v49 = vpop.permute.xlu1 %552 }
 0x82e   :  { %v555_v54 = vmul.f32 %v553_v49, %v2516_v21 }
 0x832   :  { %v558_v51 = vpop.permute.xlu1 %557 }
 0x833   :  { %v560_v55 = vmul.f32 %v558_v51, %v2519_v22 }
 0x835   :  { %v584_v61 = vadd.f32 %v560_v55, %v555_v54 }
 0x837   :  { %v568_v0 = vpop.permute.xlu1 %567  ;;  %v590_v3 = vadd.f32 %v584_v61, %v583_v63 }
 0x838   :  { %v572_v5 = vmul.f32 %v2646_v56, %v568_v0 }
 0x839   :  { %v593_v19 = vrot.slane %v590_v3, 7 }
 0x83a   :  { %v585_v25 = vadd.f32 %v572_v5, %v565_v4 }
 0x83b   :  { %v595_v34 = vadd.f32 %v593_v19, %v589_v32 }
 0x83c   :  { %v575_v10 = vpop.permute.xlu1 %574 }
 0x83d   :  { %v577_v30 = vmul.f32 %v575_v10, %v2615_v47 }
 0x83f   :  { %v591_v33 = vadd.f32 %v585_v25, %v577_v30 }
 0x841   :  { %v597_v8 = vrot.slane %v591_v33, 7 }
 0x843   :  { %v599_v35 = vadd.f32 %v597_v8, %v595_v34 }
 0x845   :  { %2263 = vtanh.f32 %v599_v35  ;;  %v1954_v38 = vmul.f32 -1.442695, %v599_v35 }
 0x847   :  { %2265 = vpow2.f32 %v1954_v38 }
 0x84f   :  { %v2264_v37 = vpop.eup %2263 }
 0x850   :  { %612 = vrot.lane.b32.xlu0 %v2264_v37, %s2405_s20 }
 0x851   :  { %v2266_v40 = vpop.eup %2265 }
 0x852   :  { %v603_v41 = vadd.f32 1.0, %v2266_v40 }
 0x854   :  { %2267 = vrcp.f32 %v603_v41 }
 0x85e   :  { %v2268_v42 = vpop.eup %2267 }
 0x85f   :  { %v610_v46 = vmul.f32 %v2268_v42, %v608_v45 }
 0x8c2   :  { %v613_v31 = vpop.permute.xlu0 %612 }
 0x8c3   :  { %v615_v44 = vmul.f32 %v2268_v42, %v613_v31 }
 0x8c5   :  { %617 = vrot.lane.b32.xlu1 %v615_v44, %s2406_s21 }
 0x937   :  { %v618_v49 = vpop.permute.xlu1 %617 }
 0x938   :  { %v2658_v50 = vadd.f32 %v618_v49, %v610_v46 }
 0x93a   :  { %2269 = vtanh.f32 %v2658_v50 }
 0x944   :  { %v2270_v51 = vpop.eup %2269 }
 0x945   :  { %623 = vrot.lane.b32.xlu0 %v2270_v51, %s2406_s21 }
 0x9b7   :  { %v624_v52 = vpop.permute.xlu0 %623 }
 0x9b8   :  { %v626_v53 = vmul.f32 %v2268_v42, %v624_v52 }
 0x9ba   :  { %634 = vperm.xlu0 %2109, %v626_v53   ;;  %629 = vperm.xlu1 %2108, %v626_v53  }
 0x9be   :  { %2112 = vset.pattern.permute.xlu0 %v2411_v13  ;;  %2110 = vset.pattern.permute.xlu1 %v2409_v11 }
 0x9bf   :  { %649 = vperm.xlu0 %2112, %v626_v53   ;;  %639 = vperm.xlu1 %2110, %v626_v53  }
 0x9c3   :  { %2115 = vset.pattern.permute.xlu0 %v2415_v17  ;;  %2111 = vset.pattern.permute.xlu1 %v2410_v12 }
 0x9c4   :  { %664 = vperm.xlu0 %2115, %v626_v53   ;;  %644 = vperm.xlu1 %2111, %v626_v53  }
 0x9c8   :  { %2113 = vset.pattern.permute.xlu1 %v2413_v15  ;;  %2119 = vset.pattern.permute.xlu0 %v2408_v59 }
 0x9c9   :  { %654 = vperm.xlu1 %2113, %v626_v53  }
 0x9cd   :  { %2114 = vset.pattern.permute.xlu1 %v2412_v14 }
 0x9ce   :  { %659 = vperm.xlu1 %2114, %v626_v53  }
 0x9d2   :  { %2116 = vset.pattern.permute.xlu1 %v2416_v18 }
 0x9d3   :  { %669 = vperm.xlu1 %2116, %v626_v53  }
 0x9d7   :  { %2117 = vset.pattern.permute.xlu1 %v2414_v16 }
 0x9d8   :  { %676 = vperm.xlu1 %2117, %v626_v53  }
 0x9dc   :  { %2118 = vset.pattern.permute.xlu1 %v2407_v9 }
 0xa39   :  { %v630_v39 = vpop.permute.xlu1 %629  ;;  %v635_v57 = vpop.permute.xlu0 %634 }
 0xa3a   :  { %v637_v3 = vmul.f32 %v635_v57, %v2522_v23  ;;  %v632_v5 = vmul.f32 %v630_v39, %v2525_v24  ;;  %v710_v57 = vrot.slane %v2658_v50, 7 }
 0xa3c   :  { %v681_v30 = vrot.slane %v632_v5, 7 }
 0xa3e   :  { %v640_v54 = vpop.permute.xlu1 %639  ;;  %v650_v60 = vpop.permute.xlu0 %649  ;;  %v683_v37 = vadd.f32 %v681_v30, %v2558_v48 }
 0xa3f   :  { %v642_v62 = vmul.f32 %v640_v54, %v2534_v28  ;;  %v652_v6 = vmul.f32 %v650_v60, %v2528_v26 }
 0xa41   :  { %v684_v10 = vadd.f32 %v642_v62, %v637_v3 }
 0xa43   :  { %v645_v55 = vpop.permute.xlu1 %644  ;;  %v665_v25 = vpop.permute.xlu0 %664  ;;  %v689_v34 = vrot.slane %v684_v10, 7 }
 0xa44   :  { %v647_v63 = vmul.f32 %v645_v55, %v2513_v20  ;;  %v667_v8 = vmul.f32 %v665_v25, %v2519_v22 }
 0xa45   :  { %v691_v42 = vadd.f32 %v689_v34, %v683_v37 }
 0xa46   :  { %v685_v7 = vadd.f32 %v652_v6, %v647_v63 }
 0xa48   :  { %v655_v58 = vpop.permute.xlu1 %654 }
 0xa49   :  { %v657_v0 = vmul.f32 %v655_v58, %v2531_v27 }
 0xa4d   :  { %v660_v61 = vpop.permute.xlu1 %659 }
 0xa4e   :  { %v662_v1 = vmul.f32 %v660_v61, %v2516_v21 }
 0xa50   :  { %v686_v4 = vadd.f32 %v662_v1, %v657_v0 }
 0xa52   :  { %v670_v19 = vpop.permute.xlu1 %669  ;;  %v692_v32 = vadd.f32 %v686_v4, %v685_v7 }
 0xa53   :  { %v674_v33 = vmul.f32 %v2677_v2, %v670_v19 }
 0xa54   :  { %v695_v38 = vrot.slane %v692_v32, 7  ;;  %v2708_v32 = vrot.slane %v2539_v29, 4 }
 0xa55   :  { %v687_v40 = vadd.f32 %v674_v33, %v667_v8 }
 0xa56   :  { %v697_v44 = vadd.f32 %v695_v38, %v691_v42 }
 0xa57   :  { %v677_v35 = vpop.permute.xlu1 %676 }
 0xa58   :  { %v679_v41 = vmul.f32 %v677_v35, %v2646_v56 }
 0xa5a   :  { %v693_v31 = vadd.f32 %v687_v40, %v679_v41 }
 0xa5c   :  { %v699_v45 = vrot.slane %v693_v31, 7 }
 0xa5e   :  { %v701_v46 = vadd.f32 %v699_v45, %v697_v44 }
 0xa60   :  { %2271 = vtanh.f32 %v701_v46  ;;  %v1955_v51 = vmul.f32 -1.442695, %v701_v46 }
 0xa62   :  { %2273 = vpow2.f32 %v1955_v51 }
 0xa6a   :  { %v2272_v49 = vpop.eup %2271 }
 0xa6b   :  { %714 = vrot.lane.b32.xlu0 %v2272_v49, %s2405_s20 }
 0xa6c   :  { %v2274_v52 = vpop.eup %2273 }
 0xa6d   :  { %v705_v53 = vadd.f32 1.0, %v2274_v52 }
 0xa6f   :  { %2275 = vrcp.f32 %v705_v53 }
 0xa79   :  { %v2276_v39 = vpop.eup %2275 }
 0xa7a   :  { %v712_v58 = vmul.f32 %v2276_v39, %v710_v57 }
 0xadd   :  { %v715_v54 = vpop.permute.xlu0 %714 }
 0xade   :  { %v717_v55 = vmul.f32 %v2276_v39, %v715_v54 }
 0xae0   :  { %719 = vrot.lane.b32.xlu1 %v717_v55, %s2406_s21 }
 0xb52   :  { %v720_v60 = vpop.permute.xlu1 %719 }
 0xb53   :  { %v2689_v61 = vadd.f32 %v720_v60, %v712_v58 }
 0xb55   :  { %2277 = vtanh.f32 %v2689_v61 }
 0xb5f   :  { %v2278_v62 = vpop.eup %2277 }
 0xb60   :  { %725 = vrot.lane.b32.xlu0 %v2278_v62, %s2406_s21 }
 0xbd2   :  { %v726_v63 = vpop.permute.xlu0 %725 }
 0xbd3   :  { %v728_v0 = vmul.f32 %v2276_v39, %v726_v63 }
 0xbd5   :  { %736 = vperm.xlu0 %2119, %v728_v0   ;;  %731 = vperm.xlu1 %2118, %v728_v0  }
 0xbd9   :  { %2122 = vset.pattern.permute.xlu0 %v2411_v13  ;;  %2120 = vset.pattern.permute.xlu1 %v2409_v11 }
 0xbda   :  { %751 = vperm.xlu0 %2122, %v728_v0   ;;  %741 = vperm.xlu1 %2120, %v728_v0  }
 0xbde   :  { %2125 = vset.pattern.permute.xlu0 %v2415_v17  ;;  %2121 = vset.pattern.permute.xlu1 %v2410_v12 }
 0xbdf   :  { %766 = vperm.xlu0 %2125, %v728_v0   ;;  %746 = vperm.xlu1 %2121, %v728_v0  }
 0xbe3   :  { %2123 = vset.pattern.permute.xlu1 %v2413_v15  ;;  %2129 = vset.pattern.permute.xlu0 %v2408_v59 }
 0xbe4   :  { %756 = vperm.xlu1 %2123, %v728_v0  }
 0xbe8   :  { %2124 = vset.pattern.permute.xlu1 %v2412_v14 }
 0xbe9   :  { %761 = vperm.xlu1 %2124, %v728_v0  }
 0xbed   :  { %2126 = vset.pattern.permute.xlu1 %v2416_v18 }
 0xbee   :  { %771 = vperm.xlu1 %2126, %v728_v0  }
 0xbf2   :  { %2127 = vset.pattern.permute.xlu1 %v2414_v16 }
 0xbf3   :  { %778 = vperm.xlu1 %2127, %v728_v0  }
 0xbf7   :  { %2128 = vset.pattern.permute.xlu1 %v2407_v9 }
 0xc54   :  { %v732_v50 = vpop.permute.xlu1 %731  ;;  %v737_v5 = vpop.permute.xlu0 %736 }
 0xc55   :  { %v739_v33 = vmul.f32 %v737_v5, %v2525_v24  ;;  %v734_v34 = vmul.f32 %v732_v50, %v2519_v22 }
 0xc57   :  { %v783_v42 = vrot.slane %v734_v34, 7 }
 0xc59   :  { %v742_v1 = vpop.permute.xlu1 %741  ;;  %v752_v4 = vpop.permute.xlu0 %751  ;;  %v785_v51 = vadd.f32 %v783_v42, %v2558_v48 }
 0xc5a   :  { %v744_v7 = vmul.f32 %v742_v1, %v2522_v23  ;;  %v754_v8 = vmul.f32 %v752_v4, %v2513_v20 }
 0xc5c   :  { %v786_v37 = vadd.f32 %v744_v7, %v739_v33 }
 0xc5e   :  { %v747_v3 = vpop.permute.xlu1 %746  ;;  %v767_v41 = vpop.permute.xlu0 %766  ;;  %v791_v45 = vrot.slane %v786_v37, 7 }
 0xc5f   :  { %v749_v19 = vmul.f32 %v747_v3, %v2534_v28  ;;  %v769_v46 = vmul.f32 %v767_v41, %v2516_v21 }
 0xc60   :  { %v793_v54 = vadd.f32 %v791_v45, %v785_v51 }
 0xc61   :  { %v787_v38 = vadd.f32 %v754_v8, %v749_v19 }
 0xc63   :  { %v757_v6 = vpop.permute.xlu1 %756 }
 0xc64   :  { %v759_v25 = vmul.f32 %v757_v6, %v2528_v26  ;;  %v812_v6 = vrot.slane %v2689_v61, 7 }
 0xc68   :  { %v762_v10 = vpop.permute.xlu1 %761 }
 0xc69   :  { %v764_v30 = vmul.f32 %v762_v10, %v2531_v27 }
 0xc6b   :  { %v788_v35 = vadd.f32 %v764_v30, %v759_v25 }
 0xc6d   :  { %v772_v40 = vpop.permute.xlu1 %771  ;;  %v794_v31 = vadd.f32 %v788_v35, %v787_v38 }
 0xc6e   :  { %v776_v44 = vmul.f32 %v2708_v32, %v772_v40 }
 0xc6f   :  { %v797_v52 = vrot.slane %v794_v31, 7 }
 0xc70   :  { %v789_v53 = vadd.f32 %v776_v44, %v769_v46  ;;  %v2739_v44 = vrot.slane %v2539_v29, 3 }
 0xc71   :  { %v799_v57 = vadd.f32 %v797_v52, %v793_v54 }
 0xc72   :  { %v779_v49 = vpop.permute.xlu1 %778 }
 0xc73   :  { %v781_v39 = vmul.f32 %v779_v49, %v2677_v2 }
 0xc75   :  { %v795_v55 = vadd.f32 %v789_v53, %v781_v39 }
 0xc77   :  { %v801_v58 = vrot.slane %v795_v55, 7 }
 0xc79   :  { %v803_v60 = vadd.f32 %v801_v58, %v799_v57 }
 0xc7b   :  { %2279 = vtanh.f32 %v803_v60  ;;  %v1956_v63 = vmul.f32 -1.442695, %v803_v60 }
 0xc7d   :  { %2281 = vpow2.f32 %v1956_v63 }
 0xc85   :  { %v2280_v62 = vpop.eup %2279 }
 0xc86   :  { %816 = vrot.lane.b32.xlu0 %v2280_v62, %s2405_s20 }
 0xc87   :  { %v2282_v0 = vpop.eup %2281 }
 0xc88   :  { %v807_v50 = vadd.f32 1.0, %v2282_v0 }
 0xc8a   :  { %2283 = vrcp.f32 %v807_v50 }
 0xc94   :  { %v2284_v1 = vpop.eup %2283 }
 0xc95   :  { %v814_v4 = vmul.f32 %v2284_v1, %v812_v6 }
 0xcf8   :  { %v817_v3 = vpop.permute.xlu0 %816 }
 0xcf9   :  { %v819_v5 = vmul.f32 %v2284_v1, %v817_v3 }
 0xcfb   :  { %821 = vrot.lane.b32.xlu1 %v819_v5, %s2406_s21 }
 0xd6d   :  { %v822_v10 = vpop.permute.xlu1 %821 }
 0xd6e   :  { %v2720_v7 = vadd.f32 %v822_v10, %v814_v4 }
 0xd70   :  { %2285 = vtanh.f32 %v2720_v7 }
 0xd7a   :  { %v2286_v19 = vpop.eup %2285 }
 0xd7b   :  { %827 = vrot.lane.b32.xlu0 %v2286_v19, %s2406_s21 }
 0xded   :  { %v828_v25 = vpop.permute.xlu0 %827 }
 0xdee   :  { %v830_v30 = vmul.f32 %v2284_v1, %v828_v25 }
 0xdf0   :  { %838 = vperm.xlu0 %2129, %v830_v30   ;;  %833 = vperm.xlu1 %2128, %v830_v30  }
 0xdf4   :  { %2132 = vset.pattern.permute.xlu0 %v2411_v13  ;;  %2130 = vset.pattern.permute.xlu1 %v2409_v11 }
 0xdf5   :  { %853 = vperm.xlu0 %2132, %v830_v30   ;;  %843 = vperm.xlu1 %2130, %v830_v30  }
 0xdf9   :  { %2135 = vset.pattern.permute.xlu0 %v2415_v17  ;;  %2131 = vset.pattern.permute.xlu1 %v2410_v12 }
 0xdfa   :  { %868 = vperm.xlu0 %2135, %v830_v30   ;;  %848 = vperm.xlu1 %2131, %v830_v30  }
 0xdfe   :  { %2133 = vset.pattern.permute.xlu1 %v2413_v15  ;;  %2139 = vset.pattern.permute.xlu0 %v2408_v59 }
 0xdff   :  { %858 = vperm.xlu1 %2133, %v830_v30  }
 0xe03   :  { %2134 = vset.pattern.permute.xlu1 %v2412_v14 }
 0xe04   :  { %863 = vperm.xlu1 %2134, %v830_v30  }
 0xe08   :  { %2136 = vset.pattern.permute.xlu1 %v2416_v18 }
 0xe09   :  { %873 = vperm.xlu1 %2136, %v830_v30  }
 0xe0d   :  { %2137 = vset.pattern.permute.xlu1 %v2414_v16 }
 0xe0e   :  { %880 = vperm.xlu1 %2137, %v830_v30  }
 0xe12   :  { %2138 = vset.pattern.permute.xlu1 %v2407_v9 }
 0xe6f   :  { %v834_v61 = vpop.permute.xlu1 %833  ;;  %v839_v8 = vpop.permute.xlu0 %838 }
 0xe70   :  { %v841_v45 = vmul.f32 %v839_v8, %v2519_v22  ;;  %v836_v46 = vmul.f32 %v834_v61, %v2516_v21  ;;  %v914_v8 = vrot.slane %v2720_v7, 7 }
 0xe72   :  { %v885_v55 = vrot.slane %v836_v46, 7 }
 0xe74   :  { %v844_v33 = vpop.permute.xlu1 %843  ;;  %v854_v37 = vpop.permute.xlu0 %853  ;;  %v887_v62 = vadd.f32 %v885_v55, %v2558_v48  ;;  %v2771_v55 = vld [vmem:[%s3053_s1 + $0x68] sm:$0xff] }
 0xe75   :  { %v846_v40 = vmul.f32 %v844_v33, %v2525_v24  ;;  %v856_v49 = vmul.f32 %v854_v37, %v2534_v28 }
 0xe77   :  { %v888_v52 = vadd.f32 %v846_v40, %v841_v45 }
 0xe79   :  { %v849_v34 = vpop.permute.xlu1 %848  ;;  %v869_v54 = vpop.permute.xlu0 %868  ;;  %v893_v58 = vrot.slane %v888_v52, 7 }
 0xe7a   :  { %v851_v41 = vmul.f32 %v849_v34, %v2522_v23  ;;  %v871_v60 = vmul.f32 %v869_v54, %v2531_v27 }
 0xe7b   :  { %v895_v1 = vadd.f32 %v893_v58, %v887_v62 }
 0xe7c   :  { %v889_v53 = vadd.f32 %v856_v49, %v851_v41 }
 0xe7e   :  { %v859_v35 = vpop.permute.xlu1 %858 }
 0xe7f   :  { %v861_v42 = vmul.f32 %v859_v35, %v2513_v20 }
 0xe83   :  { %v864_v38 = vpop.permute.xlu1 %863 }
 0xe84   :  { %v866_v31 = vmul.f32 %v864_v38, %v2528_v26 }
 0xe86   :  { %v890_v51 = vadd.f32 %v866_v31, %v861_v42 }
 0xe88   :  { %v874_v39 = vpop.permute.xlu1 %873  ;;  %v896_v57 = vadd.f32 %v890_v51, %v889_v53 }
 0xe89   :  { %v878_v20 = vmul.f32 %v2739_v44, %v874_v39 }
 0xe8a   :  { %v899_v63 = vrot.slane %v896_v57, 7 }
 0xe8b   :  { %v891_v0 = vadd.f32 %v878_v20, %v871_v60  ;;  %v2777_v20 = vld [vmem:[%s3053_s1 + $0x70] sm:$0x3] }
 0xe8c   :  { %v901_v5 = vadd.f32 %v899_v63, %v895_v1  ;;  %v2780_v58 = vrot.slane %v2777_v20, 2 }
 0xe8d   :  { %v881_v29 = vpop.permute.xlu1 %880 }
 0xe8e   :  { %v883_v50 = vmul.f32 %v881_v29, %v2708_v32 }
 0xe90   :  { %v897_v3 = vadd.f32 %v891_v0, %v883_v50 }
 0xe92   :  { %v903_v6 = vrot.slane %v897_v3, 7 }
 0xe94   :  { %v905_v4 = vadd.f32 %v903_v6, %v901_v5 }
 0xe96   :  { %2287 = vtanh.f32 %v905_v4  ;;  %v1957_v19 = vmul.f32 -1.442695, %v905_v4 }
 0xe98   :  { %2289 = vpow2.f32 %v1957_v19 }
 0xea0   :  { %v2288_v10 = vpop.eup %2287 }
 0xea1   :  { %918 = vrot.lane.b32.xlu0 %v2288_v10, %s2405_s20 }
 0xea2   :  { %v2290_v25 = vpop.eup %2289 }
 0xea3   :  { %v909_v30 = vadd.f32 1.0, %v2290_v25 }
 0xea5   :  { %2291 = vrcp.f32 %v909_v30 }
 0xeaf   :  { %v2292_v61 = vpop.eup %2291 }
 0xeb0   :  { %v916_v35 = vmul.f32 %v2292_v61, %v914_v8 }
 0xf13   :  { %v919_v33 = vpop.permute.xlu0 %918 }
 0xf14   :  { %v921_v34 = vmul.f32 %v2292_v61, %v919_v33 }
 0xf16   :  { %923 = vrot.lane.b32.xlu1 %v921_v34, %s2406_s21 }
 0xf88   :  { %v924_v37 = vpop.permute.xlu1 %923 }
 0xf89   :  { %v2751_v38 = vadd.f32 %v924_v37, %v916_v35 }
 0xf8b   :  { %2293 = vtanh.f32 %v2751_v38 }
 0xf95   :  { %v2294_v40 = vpop.eup %2293 }
 0xf96   :  { %929 = vrot.lane.b32.xlu0 %v2294_v40, %s2406_s21 }
0x1008   :  { %v930_v41 = vpop.permute.xlu0 %929 }
0x1009   :  { %v932_v42 = vmul.f32 %v2292_v61, %v930_v41 }
0x100b   :  { %940 = vperm.xlu0 %2139, %v932_v42   ;;  %935 = vperm.xlu1 %2138, %v932_v42  }
0x100f   :  { %2142 = vset.pattern.permute.xlu0 %v2411_v13  ;;  %2140 = vset.pattern.permute.xlu1 %v2409_v11 }
0x1010   :  { %955 = vperm.xlu0 %2142, %v932_v42   ;;  %945 = vperm.xlu1 %2140, %v932_v42  }
0x1014   :  { %2145 = vset.pattern.permute.xlu0 %v2415_v17  ;;  %2141 = vset.pattern.permute.xlu1 %v2410_v12 }
0x1015   :  { %970 = vperm.xlu0 %2145, %v932_v42   ;;  %950 = vperm.xlu1 %2141, %v932_v42  }
0x1019   :  { %2143 = vset.pattern.permute.xlu1 %v2413_v15  ;;  %2149 = vset.pattern.permute.xlu0 %v2408_v59 }
0x101a   :  { %960 = vperm.xlu1 %2143, %v932_v42  }
0x101e   :  { %2144 = vset.pattern.permute.xlu1 %v2412_v14 }
0x101f   :  { %965 = vperm.xlu1 %2144, %v932_v42  }
0x1023   :  { %2146 = vset.pattern.permute.xlu1 %v2416_v18 }
0x1024   :  { %975 = vperm.xlu1 %2146, %v932_v42  }
0x1028   :  { %2147 = vset.pattern.permute.xlu1 %v2414_v16 }
0x1029   :  { %982 = vperm.xlu1 %2147, %v932_v42  }
0x102d   :  { %2148 = vset.pattern.permute.xlu1 %v2407_v9 }
0x108a   :  { %v936_v7 = vpop.permute.xlu1 %935  ;;  %v941_v46 = vpop.permute.xlu0 %940 }
0x108b   :  { %v943_v60 = vmul.f32 %v941_v46, %v2516_v21  ;;  %v938_v29 = vmul.f32 %v936_v7, %v2531_v27 }
0x108d   :  { %v987_v5 = vrot.slane %v938_v29, 7 }
0x108f   :  { %v946_v31 = vpop.permute.xlu1 %945  ;;  %v956_v51 = vpop.permute.xlu0 %955  ;;  %v989_v30 = vadd.f32 %v987_v5, %v2558_v48 }
0x1090   :  { %v948_v53 = vmul.f32 %v946_v31, %v2519_v22  ;;  %v958_v62 = vmul.f32 %v956_v51, %v2522_v23  ;;  %v1016_v51 = vrot.slane %v2751_v38, 7 }
0x1092   :  { %v990_v0 = vadd.f32 %v948_v53, %v943_v60 }
0x1094   :  { %v951_v45 = vpop.permute.xlu1 %950  ;;  %v971_v3 = vpop.permute.xlu0 %970  ;;  %v995_v10 = vrot.slane %v990_v0, 7 }
0x1095   :  { %v953_v39 = vmul.f32 %v951_v45, %v2525_v24  ;;  %v973_v19 = vmul.f32 %v971_v3, %v2528_v26 }
0x1096   :  { %v997_v8 = vadd.f32 %v995_v10, %v989_v30 }
0x1097   :  { %v991_v50 = vadd.f32 %v958_v62, %v953_v39 }
0x1099   :  { %v961_v49 = vpop.permute.xlu1 %960 }
0x109a   :  { %v963_v54 = vmul.f32 %v961_v49, %v2534_v28 }
0x109e   :  { %v966_v52 = vpop.permute.xlu1 %965 }
0x109f   :  { %v968_v57 = vmul.f32 %v2771_v55, %v966_v52 }
0x10a1   :  { %v992_v63 = vadd.f32 %v968_v57, %v963_v54 }
0x10a3   :  { %v976_v1 = vpop.permute.xlu1 %975  ;;  %v998_v6 = vadd.f32 %v992_v63, %v991_v50 }
0x10a4   :  { %v980_v4 = vmul.f32 %v2780_v58, %v976_v1 }
0x10a5   :  { %v1001_v61 = vrot.slane %v998_v6, 7 }
0x10a6   :  { %v993_v33 = vadd.f32 %v980_v4, %v973_v19 }
0x10a7   :  { %v1003_v37 = vadd.f32 %v1001_v61, %v997_v8 }
0x10a8   :  { %v983_v25 = vpop.permute.xlu1 %982 }
0x10a9   :  { %v985_v34 = vmul.f32 %v983_v25, %v2739_v44 }
0x10ab   :  { %v999_v35 = vadd.f32 %v993_v33, %v985_v34 }
0x10ad   :  { %v1005_v40 = vrot.slane %v999_v35, 7 }
0x10af   :  { %v1007_v41 = vadd.f32 %v1005_v40, %v1003_v37 }
0x10b1   :  { %2295 = vtanh.f32 %v1007_v41  ;;  %v1958_v7 = vmul.f32 -1.442695, %v1007_v41 }
0x10b3   :  { %2297 = vpow2.f32 %v1958_v7 }
0x10bb   :  { %v2296_v42 = vpop.eup %2295 }
0x10bc   :  { %1020 = vrot.lane.b32.xlu0 %v2296_v42, %s2405_s20 }
0x10bd   :  { %v2298_v31 = vpop.eup %2297 }
0x10be   :  { %v1011_v45 = vadd.f32 1.0, %v2298_v31 }
0x10c0   :  { %2299 = vrcp.f32 %v1011_v45 }
0x10ca   :  { %v2300_v46 = vpop.eup %2299 }
0x10cb   :  { %v1018_v52 = vmul.f32 %v2300_v46, %v1016_v51 }
0x112e   :  { %v1021_v48 = vpop.permute.xlu0 %1020 }
0x112f   :  { %v1023_v49 = vmul.f32 %v2300_v46, %v1021_v48 }
0x1131   :  { %1025 = vrot.lane.b32.xlu1 %v1023_v49, %s2406_s21 }
0x11a3   :  { %v1026_v53 = vpop.permute.xlu1 %1025 }
0x11a4   :  { %v2792_v39 = vadd.f32 %v1026_v53, %v1018_v52 }
0x11a6   :  { %2301 = vtanh.f32 %v2792_v39 }
0x11b0   :  { %v2302_v54 = vpop.eup %2301 }
0x11b1   :  { %1031 = vrot.lane.b32.xlu0 %v2302_v54, %s2406_s21 }
0x1223   :  { %v1032_v57 = vpop.permute.xlu0 %1031 }
0x1224   :  { %v1034_v60 = vmul.f32 %v2300_v46, %v1032_v57 }
0x1226   :  { %1042 = vperm.xlu0 %2149, %v1034_v60   ;;  %1037 = vperm.xlu1 %2148, %v1034_v60  }
0x122a   :  { %2152 = vset.pattern.permute.xlu0 %v2411_v13  ;;  %2150 = vset.pattern.permute.xlu1 %v2409_v11 }
0x122b   :  { %1057 = vperm.xlu0 %2152, %v1034_v60   ;;  %1047 = vperm.xlu1 %2150, %v1034_v60  }
0x122f   :  { %2155 = vset.pattern.permute.xlu0 %v2415_v17  ;;  %2151 = vset.pattern.permute.xlu1 %v2410_v12 }
0x1230   :  { %1072 = vperm.xlu0 %2155, %v1034_v60   ;;  %1052 = vperm.xlu1 %2151, %v1034_v60  }
0x1234   :  { %2153 = vset.pattern.permute.xlu1 %v2413_v15  ;;  %2159 = vset.pattern.permute.xlu0 %v2408_v59 }
0x1235   :  { %1062 = vperm.xlu1 %2153, %v1034_v60  }
0x1239   :  { %2154 = vset.pattern.permute.xlu1 %v2412_v14 }
0x123a   :  { %1067 = vperm.xlu1 %2154, %v1034_v60  }
0x123e   :  { %2156 = vset.pattern.permute.xlu1 %v2416_v18 }
0x123f   :  { %1077 = vperm.xlu1 %2156, %v1034_v60  }
0x1243   :  { %2157 = vset.pattern.permute.xlu1 %v2414_v16 }
0x1244   :  { %1082 = vperm.xlu1 %2157, %v1034_v60  }
0x1248   :  { %2158 = vset.pattern.permute.xlu1 %v2407_v9 }
0x12a5   :  { %v1038_v38 = vpop.permute.xlu1 %1037  ;;  %v1043_v63 = vpop.permute.xlu0 %1042 }
0x12a6   :  { %v1045_v10 = vmul.f32 %v1043_v63, %v2531_v27  ;;  %v1040_v19 = vmul.f32 %v1038_v38, %v2528_v26 }
0x12a8   :  { %v1087_v35 = vrot.slane %v1040_v19, 7 }
0x12aa   :  { %v1048_v29 = vpop.permute.xlu1 %1047  ;;  %v1058_v50 = vpop.permute.xlu0 %1057  ;;  %v1089_v31 = vadd.f32 %v1087_v35, %v2555_v43 }
0x12ab   :  { %v1050_v3 = vmul.f32 %v1048_v29, %v2516_v21  ;;  %v1060_v25 = vmul.f32 %v1058_v50, %v2525_v24  ;;  %v1116_v50 = vrot.slane %v2792_v39, 7 }
0x12ad   :  { %v1090_v61 = vadd.f32 %v1050_v3, %v1045_v10 }
0x12af   :  { %v1053_v62 = vpop.permute.xlu1 %1052  ;;  %v1073_v8 = vpop.permute.xlu0 %1072  ;;  %v1095_v41 = vrot.slane %v1090_v61, 7 }
0x12b0   :  { %v1055_v5 = vmul.f32 %v1053_v62, %v2519_v22  ;;  %v1075_v42 = vmul.f32 %v2771_v55, %v1073_v8 }
0x12b1   :  { %v1097_v49 = vadd.f32 %v1095_v41, %v1089_v31 }
0x12b2   :  { %v1091_v33 = vadd.f32 %v1060_v25, %v1055_v5 }
0x12b4   :  { %v1063_v0 = vpop.permute.xlu1 %1062 }
0x12b5   :  { %v1065_v6 = vmul.f32 %v1063_v0, %v2522_v23 }
0x12b9   :  { %v1068_v1 = vpop.permute.xlu1 %1067 }
0x12ba   :  { %v1070_v4 = vmul.f32 %v1068_v1, %v2534_v28 }
0x12bc   :  { %v1092_v30 = vadd.f32 %v1070_v4, %v1065_v6 }
0x12be   :  { %v1078_v34 = vpop.permute.xlu1 %1077  ;;  %v1098_v37 = vadd.f32 %v1092_v30, %v1091_v33 }
0x12bf   :  { %v1080_v40 = vmul.f32 %v1078_v34, %v2549_v36 }
0x12c0   :  { %v1101_v45 = vrot.slane %v1098_v37, 7 }
0x12c1   :  { %v1093_v46 = vadd.f32 %v1080_v40, %v1075_v42 }
0x12c2   :  { %v1103_v52 = vadd.f32 %v1101_v45, %v1097_v49 }
0x12c3   :  { %v1083_v7 = vpop.permute.xlu1 %1082 }
0x12c4   :  { %v1085_v48 = vmul.f32 %v1083_v7, %v2780_v58 }
0x12c6   :  { %v1099_v51 = vadd.f32 %v1093_v46, %v1085_v48 }
0x12c8   :  { %v1105_v53 = vrot.slane %v1099_v51, 7 }
0x12ca   :  { %v1107_v54 = vadd.f32 %v1105_v53, %v1103_v52 }
0x12cc   :  { %2303 = vtanh.f32 %v1107_v54  ;;  %v1959_v60 = vmul.f32 -1.442695, %v1107_v54 }
0x12ce   :  { %2305 = vpow2.f32 %v1959_v60 }
0x12d6   :  { %v2304_v57 = vpop.eup %2303 }
0x12d7   :  { %1120 = vrot.lane.b32.xlu0 %v2304_v57, %s2405_s20 }
0x12d8   :  { %v2306_v38 = vpop.eup %2305 }
0x12d9   :  { %v1111_v29 = vadd.f32 1.0, %v2306_v38 }
0x12db   :  { %2307 = vrcp.f32 %v1111_v29 }
0x12e5   :  { %v2308_v62 = vpop.eup %2307 }
0x12e6   :  { %v1118_v1 = vmul.f32 %v2308_v62, %v1116_v50 }
0x1349   :  { %v1121_v63 = vpop.permute.xlu0 %1120 }
0x134a   :  { %v1123_v0 = vmul.f32 %v2308_v62, %v1121_v63 }
0x134c   :  { %1125 = vrot.lane.b32.xlu1 %v1123_v0, %s2406_s21 }
0x13be   :  { %v1126_v3 = vpop.permute.xlu1 %1125 }
0x13bf   :  { %v2820_v5 = vadd.f32 %v1126_v3, %v1118_v1 }
0x13c1   :  { %2309 = vtanh.f32 %v2820_v5 }
0x13cb   :  { %v2310_v6 = vpop.eup %2309 }
0x13cc   :  { %1131 = vrot.lane.b32.xlu0 %v2310_v6, %s2406_s21 }
0x143e   :  { %v1132_v4 = vpop.permute.xlu0 %1131 }
0x143f   :  { %v1134_v10 = vmul.f32 %v2308_v62, %v1132_v4 }
0x1441   :  { %1142 = vperm.xlu0 %2159, %v1134_v10   ;;  %1137 = vperm.xlu1 %2158, %v1134_v10  }
0x1445   :  { %2162 = vset.pattern.permute.xlu0 %v2411_v13  ;;  %2160 = vset.pattern.permute.xlu1 %v2409_v11 }
0x1446   :  { %1157 = vperm.xlu0 %2162, %v1134_v10   ;;  %1147 = vperm.xlu1 %2160, %v1134_v10  }
0x144a   :  { %2165 = vset.pattern.permute.xlu0 %v2415_v17  ;;  %2161 = vset.pattern.permute.xlu1 %v2410_v12 }
0x144b   :  { %1172 = vperm.xlu0 %2165, %v1134_v10   ;;  %1152 = vperm.xlu1 %2161, %v1134_v10  }
0x144f   :  { %2163 = vset.pattern.permute.xlu1 %v2413_v15  ;;  %2169 = vset.pattern.permute.xlu0 %v2408_v59 }
0x1450   :  { %1162 = vperm.xlu1 %2163, %v1134_v10  }
0x1454   :  { %2164 = vset.pattern.permute.xlu1 %v2412_v14 }
0x1455   :  { %1167 = vperm.xlu1 %2164, %v1134_v10  }
0x1459   :  { %2166 = vset.pattern.permute.xlu1 %v2416_v18 }
0x145a   :  { %1177 = vperm.xlu1 %2166, %v1134_v10  }
0x145e   :  { %2167 = vset.pattern.permute.xlu1 %v2414_v16 }
0x145f   :  { %1182 = vperm.xlu1 %2167, %v1134_v10  }
0x1463   :  { %2168 = vset.pattern.permute.xlu1 %v2407_v9 }
0x14c0   :  { %v1138_v39 = vpop.permute.xlu1 %1137  ;;  %v1143_v30 = vpop.permute.xlu0 %1142 }
0x14c1   :  { %v1145_v41 = vmul.f32 %v1143_v30, %v2528_v26  ;;  %v1140_v42 = vmul.f32 %v2771_v55, %v1138_v39 }
0x14c3   :  { %v1187_v51 = vrot.slane %v1140_v42, 7 }
0x14c5   :  { %v1148_v19 = vpop.permute.xlu1 %1147  ;;  %v1158_v33 = vpop.permute.xlu0 %1157  ;;  %v1189_v38 = vadd.f32 %v1187_v51, %v2555_v43 }
0x14c6   :  { %v1150_v8 = vmul.f32 %v1148_v19, %v2531_v27  ;;  %v1160_v7 = vmul.f32 %v1158_v33, %v2519_v22 }
0x14c8   :  { %v1190_v45 = vadd.f32 %v1150_v8, %v1145_v41 }
0x14ca   :  { %v1153_v25 = vpop.permute.xlu1 %1152  ;;  %v1173_v49 = vpop.permute.xlu0 %1172  ;;  %v1195_v54 = vrot.slane %v1190_v45, 7 }
0x14cb   :  { %v1155_v35 = vmul.f32 %v1153_v25, %v2516_v21  ;;  %v1175_v57 = vmul.f32 %v1173_v49, %v2534_v28 }
0x14cc   :  { %v1197_v0 = vadd.f32 %v1195_v54, %v1189_v38 }
0x14cd   :  { %v1191_v46 = vadd.f32 %v1160_v7, %v1155_v35 }
0x14cf   :  { %v1163_v61 = vpop.permute.xlu1 %1162 }
0x14d0   :  { %v1165_v37 = vmul.f32 %v1163_v61, %v2525_v24 }
0x14d4   :  { %v1168_v34 = vpop.permute.xlu1 %1167 }
0x14d5   :  { %v1170_v40 = vmul.f32 %v1168_v34, %v2522_v23 }
0x14d7   :  { %v1192_v31 = vadd.f32 %v1170_v40, %v1165_v37 }
0x14d9   :  { %v1178_v48 = vpop.permute.xlu1 %1177  ;;  %v1198_v52 = vadd.f32 %v1192_v31, %v1191_v46 }
0x14da   :  { %v1180_v53 = vmul.f32 %v2777_v20, %v1178_v48 }
0x14db   :  { %v1201_v29 = vrot.slane %v1198_v52, 7 }
0x14dc   :  { %v1193_v62 = vadd.f32 %v1180_v53, %v1175_v57 }
0x14dd   :  { %v1203_v1 = vadd.f32 %v1201_v29, %v1197_v0 }
0x14de   :  { %v1183_v60 = vpop.permute.xlu1 %1182 }
0x14df   :  { %v1185_v63 = vmul.f32 %v1183_v60, %v2549_v36  ;;  %v1216_v36 = vrot.slane %v2820_v5, 7 }
0x14e1   :  { %v1199_v50 = vadd.f32 %v1193_v62, %v1185_v63 }
0x14e3   :  { %v1205_v3 = vrot.slane %v1199_v50, 7 }
0x14e5   :  { %v1207_v6 = vadd.f32 %v1205_v3, %v1203_v1 }
0x14e7   :  { %2311 = vtanh.f32 %v1207_v6  ;;  %v1960_v10 = vmul.f32 -1.442695, %v1207_v6 }
0x14e9   :  { %2313 = vpow2.f32 %v1960_v10 }
0x14f1   :  { %v2312_v4 = vpop.eup %2311 }
0x14f2   :  { %1220 = vrot.lane.b32.xlu0 %v2312_v4, %s2405_s20 }
0x14f3   :  { %v2314_v39 = vpop.eup %2313 }
0x14f4   :  { %v1211_v19 = vadd.f32 1.0, %v2314_v39 }
0x14f6   :  { %2315 = vrcp.f32 %v1211_v19 }
0x1500   :  { %v2316_v25 = vpop.eup %2315 }
0x1501   :  { %v1218_v33 = vmul.f32 %v2316_v25, %v1216_v36 }
0x1564   :  { %v1221_v30 = vpop.permute.xlu0 %1220 }
0x1565   :  { %v1223_v61 = vmul.f32 %v2316_v25, %v1221_v30 }
0x1567   :  { %1225 = vrot.lane.b32.xlu1 %v1223_v61, %s2406_s21 }
0x15d9   :  { %v1226_v34 = vpop.permute.xlu1 %1225 }
0x15da   :  { %v2848_v8 = vadd.f32 %v1226_v34, %v1218_v33 }
0x15dc   :  { %2317 = vtanh.f32 %v2848_v8 }
0x15e6   :  { %v2318_v35 = vpop.eup %2317 }
0x15e7   :  { %1231 = vrot.lane.b32.xlu0 %v2318_v35, %s2406_s21 }
0x1659   :  { %v1232_v37 = vpop.permute.xlu0 %1231 }
0x165a   :  { %v1234_v40 = vmul.f32 %v2316_v25, %v1232_v37 }
0x165c   :  { %1242 = vperm.xlu0 %2169, %v1234_v40   ;;  %1237 = vperm.xlu1 %2168, %v1234_v40  }
0x1660   :  { %2172 = vset.pattern.permute.xlu0 %v2411_v13  ;;  %2170 = vset.pattern.permute.xlu1 %v2409_v11 }
0x1661   :  { %1257 = vperm.xlu0 %2172, %v1234_v40   ;;  %1247 = vperm.xlu1 %2170, %v1234_v40  }
0x1665   :  { %2175 = vset.pattern.permute.xlu0 %v2415_v17  ;;  %2171 = vset.pattern.permute.xlu1 %v2410_v12 }
0x1666   :  { %1272 = vperm.xlu0 %2175, %v1234_v40   ;;  %1252 = vperm.xlu1 %2171, %v1234_v40  }
0x166a   :  { %2173 = vset.pattern.permute.xlu1 %v2413_v15  ;;  %2179 = vset.pattern.permute.xlu0 %v2408_v59 }
0x166b   :  { %1262 = vperm.xlu1 %2173, %v1234_v40  }
0x166f   :  { %2174 = vset.pattern.permute.xlu1 %v2412_v14 }
0x1670   :  { %1267 = vperm.xlu1 %2174, %v1234_v40  }
0x1674   :  { %2176 = vset.pattern.permute.xlu1 %v2416_v18 }
0x1675   :  { %1277 = vperm.xlu1 %2176, %v1234_v40  }
0x1679   :  { %2177 = vset.pattern.permute.xlu1 %v2414_v16 }
0x167a   :  { %1282 = vperm.xlu1 %2177, %v1234_v40  }
0x167e   :  { %2178 = vset.pattern.permute.xlu1 %v2407_v9 }
0x16db   :  { %v1238_v5 = vpop.permute.xlu1 %1237  ;;  %v1243_v7 = vpop.permute.xlu0 %1242 }
0x16dc   :  { %v1245_v53 = vmul.f32 %v2771_v55, %v1243_v7  ;;  %v1240_v54 = vmul.f32 %v1238_v5, %v2534_v28 }
0x16de   :  { %v1287_v0 = vrot.slane %v1240_v54, 7 }
0x16e0   :  { %v1248_v41 = vpop.permute.xlu1 %1247  ;;  %v1258_v45 = vpop.permute.xlu0 %1257  ;;  %v1289_v10 = vadd.f32 %v1287_v0, %v2555_v43 }
0x16e1   :  { %v1250_v48 = vmul.f32 %v1248_v41, %v2528_v26  ;;  %v1260_v57 = vmul.f32 %v1258_v45, %v2516_v21 }
0x16e3   :  { %v1290_v38 = vadd.f32 %v1250_v48, %v1245_v53 }
0x16e5   :  { %v1253_v42 = vpop.permute.xlu1 %1252  ;;  %v1273_v63 = vpop.permute.xlu0 %1272  ;;  %v1295_v3 = vrot.slane %v1290_v38, 7 }
0x16e6   :  { %v1255_v49 = vmul.f32 %v1253_v42, %v2531_v27  ;;  %v1275_v6 = vmul.f32 %v1273_v63, %v2522_v23 }
0x16e7   :  { %v1297_v30 = vadd.f32 %v1295_v3, %v1289_v10 }
0x16e8   :  { %v1291_v29 = vadd.f32 %v1260_v57, %v1255_v49 }
0x16ea   :  { %v1263_v31 = vpop.permute.xlu1 %1262 }
0x16eb   :  { %v1265_v51 = vmul.f32 %v1263_v31, %v2519_v22 }
0x16ef   :  { %v1268_v46 = vpop.permute.xlu1 %1267 }
0x16f0   :  { %v1270_v52 = vmul.f32 %v1268_v46, %v2525_v24 }
0x16f2   :  { %v1292_v60 = vadd.f32 %v1270_v52, %v1265_v51 }
0x16f4   :  { %v1278_v62 = vpop.permute.xlu1 %1277  ;;  %v1298_v50 = vadd.f32 %v1292_v60, %v1291_v29 }
0x16f5   :  { %v1280_v1 = vmul.f32 %v1278_v62, %v2615_v47 }
0x16f6   :  { %v1301_v39 = vrot.slane %v1298_v50, 7 }
0x16f7   :  { %v1293_v19 = vadd.f32 %v1280_v1, %v1275_v6 }
0x16f8   :  { %v1303_v36 = vadd.f32 %v1301_v39, %v1297_v30 }
0x16f9   :  { %v1283_v4 = vpop.permute.xlu1 %1282 }
0x16fa   :  { %v1285_v25 = vmul.f32 %v2777_v20, %v1283_v4  ;;  %v1316_v20 = vrot.slane %v2848_v8, 7 }
0x16fc   :  { %v1299_v61 = vadd.f32 %v1293_v19, %v1285_v25 }
0x16fe   :  { %v1305_v33 = vrot.slane %v1299_v61, 7 }
0x1700   :  { %v1307_v34 = vadd.f32 %v1305_v33, %v1303_v36 }
0x1702   :  { %2319 = vtanh.f32 %v1307_v34  ;;  %v1961_v37 = vmul.f32 -1.442695, %v1307_v34 }
0x1704   :  { %2321 = vpow2.f32 %v1961_v37 }
0x170c   :  { %v2320_v35 = vpop.eup %2319 }
0x170d   :  { %1320 = vrot.lane.b32.xlu0 %v2320_v35, %s2405_s20 }
0x170e   :  { %v2322_v40 = vpop.eup %2321 }
0x170f   :  { %v1311_v5 = vadd.f32 1.0, %v2322_v40 }
0x1711   :  { %2323 = vrcp.f32 %v1311_v5 }
0x171b   :  { %v2324_v41 = vpop.eup %2323 }
0x171c   :  { %v1318_v31 = vmul.f32 %v2324_v41, %v1316_v20 }
0x177f   :  { %v1321_v42 = vpop.permute.xlu0 %1320 }
0x1780   :  { %v1323_v7 = vmul.f32 %v2324_v41, %v1321_v42 }
0x1782   :  { %1325 = vrot.lane.b32.xlu1 %v1323_v7, %s2406_s21 }
0x17f4   :  { %v1326_v45 = vpop.permute.xlu1 %1325 }
0x17f5   :  { %v2876_v46 = vadd.f32 %v1326_v45, %v1318_v31 }
0x17f7   :  { %2325 = vtanh.f32 %v2876_v46 }
0x1801   :  { %v2326_v48 = vpop.eup %2325 }
0x1802   :  { %1331 = vrot.lane.b32.xlu0 %v2326_v48, %s2406_s21 }
0x1874   :  { %v1332_v49 = vpop.permute.xlu0 %1331 }
0x1875   :  { %v1334_v51 = vmul.f32 %v2324_v41, %v1332_v49 }
0x1877   :  { %1342 = vperm.xlu0 %2179, %v1334_v51   ;;  %1337 = vperm.xlu1 %2178, %v1334_v51  }
0x187b   :  { %2182 = vset.pattern.permute.xlu0 %v2411_v13  ;;  %2180 = vset.pattern.permute.xlu1 %v2409_v11 }
0x187c   :  { %1357 = vperm.xlu0 %2182, %v1334_v51   ;;  %1347 = vperm.xlu1 %2180, %v1334_v51  }
0x1880   :  { %2185 = vset.pattern.permute.xlu0 %v2415_v17  ;;  %2181 = vset.pattern.permute.xlu1 %v2410_v12 }
0x1881   :  { %1372 = vperm.xlu0 %2185, %v1334_v51   ;;  %1352 = vperm.xlu1 %2181, %v1334_v51  }
0x1885   :  { %2183 = vset.pattern.permute.xlu1 %v2413_v15  ;;  %2189 = vset.pattern.permute.xlu0 %v2408_v59 }
0x1886   :  { %1362 = vperm.xlu1 %2183, %v1334_v51  }
0x188a   :  { %2184 = vset.pattern.permute.xlu1 %v2412_v14 }
0x188b   :  { %1367 = vperm.xlu1 %2184, %v1334_v51  }
0x188f   :  { %2186 = vset.pattern.permute.xlu1 %v2416_v18 }
0x1890   :  { %1377 = vperm.xlu1 %2186, %v1334_v51  }
0x1894   :  { %2187 = vset.pattern.permute.xlu1 %v2414_v16 }
0x1895   :  { %1382 = vperm.xlu1 %2187, %v1334_v51  }
0x1899   :  { %2188 = vset.pattern.permute.xlu1 %v2407_v9 }
0x18f6   :  { %v1338_v8 = vpop.permute.xlu1 %1337  ;;  %v1343_v54 = vpop.permute.xlu0 %1342 }
0x18f7   :  { %v1345_v50 = vmul.f32 %v1343_v54, %v2534_v28  ;;  %v1340_v1 = vmul.f32 %v1338_v8, %v2522_v23 }
0x18f9   :  { %v1387_v25 = vrot.slane %v1340_v1, 7 }
0x18fb   :  { %v1348_v52 = vpop.permute.xlu1 %1347  ;;  %v1358_v60 = vpop.permute.xlu0 %1357  ;;  %v1389_v35 = vadd.f32 %v1387_v25, %v2555_v43 }
0x18fc   :  { %v1350_v29 = vmul.f32 %v2771_v55, %v1348_v52  ;;  %v1360_v3 = vmul.f32 %v1358_v60, %v2531_v27 }
0x18fe   :  { %v1390_v4 = vadd.f32 %v1350_v29, %v1345_v50 }
0x1900   :  { %v1353_v53 = vpop.permute.xlu1 %1352  ;;  %v1373_v19 = vpop.permute.xlu0 %1372  ;;  %v1395_v36 = vrot.slane %v1390_v4, 7 }
0x1901   :  { %v1355_v62 = vmul.f32 %v1353_v53, %v2528_v26  ;;  %v1375_v33 = vmul.f32 %v1373_v19, %v2525_v24 }
0x1902   :  { %v1397_v41 = vadd.f32 %v1395_v36, %v1389_v35 }
0x1903   :  { %v1391_v10 = vadd.f32 %v1360_v3, %v1355_v62 }
0x1905   :  { %v1363_v57 = vpop.permute.xlu1 %1362 }
0x1906   :  { %v1365_v63 = vmul.f32 %v1363_v57, %v2516_v21 }
0x190a   :  { %v1368_v38 = vpop.permute.xlu1 %1367 }
0x190b   :  { %v1370_v0 = vmul.f32 %v1368_v38, %v2519_v22 }
0x190d   :  { %v1392_v6 = vadd.f32 %v1370_v0, %v1365_v63 }
0x190f   :  { %v1378_v39 = vpop.permute.xlu1 %1377  ;;  %v1398_v30 = vadd.f32 %v1392_v6, %v1391_v10 }
0x1910   :  { %v1380_v61 = vmul.f32 %v1378_v39, %v2646_v56 }
0x1911   :  { %v1401_v37 = vrot.slane %v1398_v30, 7 }
0x1912   :  { %v1393_v40 = vadd.f32 %v1380_v61, %v1375_v33 }
0x1913   :  { %v1403_v7 = vadd.f32 %v1401_v37, %v1397_v41 }
0x1914   :  { %v1383_v34 = vpop.permute.xlu1 %1382 }
0x1915   :  { %v1385_v5 = vmul.f32 %v1383_v34, %v2615_v47  ;;  %v1416_v47 = vrot.slane %v2876_v46, 7 }
0x1917   :  { %v1399_v42 = vadd.f32 %v1393_v40, %v1385_v5 }
0x1919   :  { %v1405_v20 = vrot.slane %v1399_v42, 7 }
0x191b   :  { %v1407_v31 = vadd.f32 %v1405_v20, %v1403_v7 }
0x191d   :  { %2327 = vtanh.f32 %v1407_v31  ;;  %v1962_v48 = vmul.f32 -1.442695, %v1407_v31 }
0x191f   :  { %2329 = vpow2.f32 %v1962_v48 }
0x1927   :  { %v2328_v45 = vpop.eup %2327 }
0x1928   :  { %1420 = vrot.lane.b32.xlu0 %v2328_v45, %s2405_s20 }
0x1929   :  { %v2330_v49 = vpop.eup %2329 }
0x192a   :  { %v1411_v51 = vadd.f32 1.0, %v2330_v49 }
0x192c   :  { %2331 = vrcp.f32 %v1411_v51 }
0x1936   :  { %v2332_v8 = vpop.eup %2331 }
0x1937   :  { %v1418_v54 = vmul.f32 %v2332_v8, %v1416_v47 }
0x199a   :  { %v1421_v52 = vpop.permute.xlu0 %1420 }
0x199b   :  { %v1423_v53 = vmul.f32 %v2332_v8, %v1421_v52 }
0x199d   :  { %1425 = vrot.lane.b32.xlu1 %v1423_v53, %s2406_s21 }
0x1a0f   :  { %v1426_v57 = vpop.permute.xlu1 %1425 }
0x1a10   :  { %v2904_v60 = vadd.f32 %v1426_v57, %v1418_v54 }
0x1a12   :  { %2333 = vtanh.f32 %v2904_v60 }
0x1a1c   :  { %v2334_v38 = vpop.eup %2333 }
0x1a1d   :  { %1431 = vrot.lane.b32.xlu0 %v2334_v38, %s2406_s21 }
0x1a8f   :  { %v1432_v29 = vpop.permute.xlu0 %1431 }
0x1a90   :  { %v1434_v62 = vmul.f32 %v2332_v8, %v1432_v29 }
0x1a92   :  { %1442 = vperm.xlu0 %2189, %v1434_v62   ;;  %1437 = vperm.xlu1 %2188, %v1434_v62  }
0x1a96   :  { %2192 = vset.pattern.permute.xlu0 %v2411_v13  ;;  %2190 = vset.pattern.permute.xlu1 %v2409_v11 }
0x1a97   :  { %1457 = vperm.xlu0 %2192, %v1434_v62   ;;  %1447 = vperm.xlu1 %2190, %v1434_v62  }
0x1a9b   :  { %2195 = vset.pattern.permute.xlu0 %v2415_v17  ;;  %2191 = vset.pattern.permute.xlu1 %v2410_v12 }
0x1a9c   :  { %1472 = vperm.xlu0 %2195, %v1434_v62   ;;  %1452 = vperm.xlu1 %2191, %v1434_v62  }
0x1aa0   :  { %2193 = vset.pattern.permute.xlu1 %v2413_v15  ;;  %2199 = vset.pattern.permute.xlu0 %v2408_v59 }
0x1aa1   :  { %1462 = vperm.xlu1 %2193, %v1434_v62  }
0x1aa5   :  { %2194 = vset.pattern.permute.xlu1 %v2412_v14 }
0x1aa6   :  { %1467 = vperm.xlu1 %2194, %v1434_v62  }
0x1aaa   :  { %2196 = vset.pattern.permute.xlu1 %v2416_v18 }
0x1aab   :  { %1477 = vperm.xlu1 %2196, %v1434_v62  }
0x1aaf   :  { %2197 = vset.pattern.permute.xlu1 %v2414_v16 }
0x1ab0   :  { %1482 = vperm.xlu1 %2197, %v1434_v62  }
0x1ab4   :  { %2198 = vset.pattern.permute.xlu1 %v2407_v9 }
0x1b11   :  { %v1438_v46 = vpop.permute.xlu1 %1437  ;;  %v1443_v50 = vpop.permute.xlu0 %1442 }
0x1b12   :  { %v1445_v25 = vmul.f32 %v1443_v50, %v2522_v23  ;;  %v1440_v30 = vmul.f32 %v1438_v46, %v2525_v24 }
0x1b14   :  { %v1487_v40 = vrot.slane %v1440_v30, 7 }
0x1b16   :  { %v1448_v63 = vpop.permute.xlu1 %1447  ;;  %v1458_v3 = vpop.permute.xlu0 %1457  ;;  %v1489_v31 = vadd.f32 %v1487_v40, %v2555_v43 }
0x1b17   :  { %v1450_v4 = vmul.f32 %v1448_v63, %v2534_v28  ;;  %v1460_v61 = vmul.f32 %v1458_v3, %v2528_v26 }
0x1b19   :  { %v1490_v33 = vadd.f32 %v1450_v4, %v1445_v25 }
0x1b1b   :  { %v1453_v0 = vpop.permute.xlu1 %1452  ;;  %v1473_v37 = vpop.permute.xlu0 %1472  ;;  %v1495_v42 = vrot.slane %v1490_v33, 7 }
0x1b1c   :  { %v1455_v10 = vmul.f32 %v2771_v55, %v1453_v0  ;;  %v1475_v7 = vmul.f32 %v1473_v37, %v2519_v22 }
0x1b1d   :  { %v1497_v51 = vadd.f32 %v1495_v42, %v1489_v31 }
0x1b1e   :  { %v1491_v34 = vadd.f32 %v1460_v61, %v1455_v10 }
0x1b20   :  { %v1463_v1 = vpop.permute.xlu1 %1462 }
0x1b21   :  { %v1465_v39 = vmul.f32 %v1463_v1, %v2531_v27 }
0x1b25   :  { %v1468_v6 = vpop.permute.xlu1 %1467 }
0x1b26   :  { %v1470_v19 = vmul.f32 %v1468_v6, %v2516_v21 }
0x1b28   :  { %v1492_v36 = vadd.f32 %v1470_v19, %v1465_v39 }
0x1b2a   :  { %v1478_v35 = vpop.permute.xlu1 %1477  ;;  %v1498_v5 = vadd.f32 %v1492_v36, %v1491_v34 }
0x1b2b   :  { %v1480_v41 = vmul.f32 %v1478_v35, %v2677_v2 }
0x1b2c   :  { %v1501_v45 = vrot.slane %v1498_v5, 7 }
0x1b2d   :  { %v1493_v48 = vadd.f32 %v1480_v41, %v1475_v7 }
0x1b2e   :  { %v1503_v52 = vadd.f32 %v1501_v45, %v1497_v51 }
0x1b2f   :  { %v1483_v20 = vpop.permute.xlu1 %1482 }
0x1b30   :  { %v1485_v49 = vmul.f32 %v1483_v20, %v2646_v56  ;;  %v1516_v56 = vrot.slane %v2904_v60, 7 }
0x1b32   :  { %v1499_v8 = vadd.f32 %v1493_v48, %v1485_v49 }
0x1b34   :  { %v1505_v53 = vrot.slane %v1499_v8, 7 }
0x1b36   :  { %v1507_v47 = vadd.f32 %v1505_v53, %v1503_v52 }
0x1b38   :  { %2335 = vtanh.f32 %v1507_v47  ;;  %v1963_v57 = vmul.f32 -1.442695, %v1507_v47 }
0x1b3a   :  { %2337 = vpow2.f32 %v1963_v57 }
0x1b42   :  { %v2336_v54 = vpop.eup %2335 }
0x1b43   :  { %1520 = vrot.lane.b32.xlu0 %v2336_v54, %s2405_s20 }
0x1b44   :  { %v2338_v38 = vpop.eup %2337 }
0x1b45   :  { %v1511_v29 = vadd.f32 1.0, %v2338_v38 }
0x1b47   :  { %2339 = vrcp.f32 %v1511_v29 }
0x1b51   :  { %v2340_v62 = vpop.eup %2339 }
0x1b52   :  { %v1518_v0 = vmul.f32 %v2340_v62, %v1516_v56 }
0x1bb5   :  { %v1521_v46 = vpop.permute.xlu0 %1520 }
0x1bb6   :  { %v1523_v63 = vmul.f32 %v2340_v62, %v1521_v46 }
0x1bb8   :  { %1525 = vrot.lane.b32.xlu1 %v1523_v63, %s2406_s21 }
0x1c2a   :  { %v1526_v50 = vpop.permute.xlu1 %1525 }
0x1c2b   :  { %v2932_v1 = vadd.f32 %v1526_v50, %v1518_v0 }
0x1c2d   :  { %2341 = vtanh.f32 %v2932_v1 }
0x1c37   :  { %v2342_v3 = vpop.eup %2341 }
0x1c38   :  { %1531 = vrot.lane.b32.xlu0 %v2342_v3, %s2406_s21 }
0x1caa   :  { %v1532_v6 = vpop.permute.xlu0 %1531 }
0x1cab   :  { %v1534_v4 = vmul.f32 %v2340_v62, %v1532_v6 }
0x1cad   :  { %1542 = vperm.xlu0 %2199, %v1534_v4   ;;  %1537 = vperm.xlu1 %2198, %v1534_v4  }
0x1cb1   :  { %2202 = vset.pattern.permute.xlu0 %v2411_v13  ;;  %2200 = vset.pattern.permute.xlu1 %v2409_v11 }
0x1cb2   :  { %1557 = vperm.xlu0 %2202, %v1534_v4   ;;  %1547 = vperm.xlu1 %2200, %v1534_v4  }
0x1cb6   :  { %2205 = vset.pattern.permute.xlu0 %v2415_v17  ;;  %2201 = vset.pattern.permute.xlu1 %v2410_v12 }
0x1cb7   :  { %1572 = vperm.xlu0 %2205, %v1534_v4   ;;  %1552 = vperm.xlu1 %2201, %v1534_v4  }
0x1cbb   :  { %2203 = vset.pattern.permute.xlu1 %v2413_v15  ;;  %2209 = vset.pattern.permute.xlu0 %v2408_v59 }
0x1cbc   :  { %1562 = vperm.xlu1 %2203, %v1534_v4  }
0x1cc0   :  { %2204 = vset.pattern.permute.xlu1 %v2412_v14 }
0x1cc1   :  { %1567 = vperm.xlu1 %2204, %v1534_v4  }
0x1cc5   :  { %2206 = vset.pattern.permute.xlu1 %v2416_v18 }
0x1cc6   :  { %1577 = vperm.xlu1 %2206, %v1534_v4  }
0x1cca   :  { %2207 = vset.pattern.permute.xlu1 %v2414_v16 }
0x1ccb   :  { %1582 = vperm.xlu1 %2207, %v1534_v4  }
0x1ccf   :  { %2208 = vset.pattern.permute.xlu1 %v2407_v9 }
0x1d2c   :  { %v1538_v60 = vpop.permute.xlu1 %1537  ;;  %v1543_v19 = vpop.permute.xlu0 %1542 }
0x1d2d   :  { %v1545_v37 = vmul.f32 %v1543_v19, %v2525_v24  ;;  %v1540_v40 = vmul.f32 %v1538_v60, %v2519_v22 }
0x1d2f   :  { %v1587_v45 = vrot.slane %v1540_v40, 7 }
0x1d31   :  { %v1548_v10 = vpop.permute.xlu1 %1547  ;;  %v1558_v30 = vpop.permute.xlu0 %1557  ;;  %v1589_v53 = vadd.f32 %v1587_v45, %v2555_v43 }
0x1d32   :  { %v1550_v36 = vmul.f32 %v1548_v10, %v2522_v23  ;;  %v1560_v5 = vmul.f32 %v2771_v55, %v1558_v30 }
0x1d34   :  { %v1590_v42 = vadd.f32 %v1550_v36, %v1545_v37 }
0x1d36   :  { %v1553_v39 = vpop.permute.xlu1 %1552  ;;  %v1573_v31 = vpop.permute.xlu0 %1572  ;;  %v1595_v51 = vrot.slane %v1590_v42, 7 }
0x1d37   :  { %v1555_v33 = vmul.f32 %v1553_v39, %v2534_v28  ;;  %v1575_v8 = vmul.f32 %v1573_v31, %v2516_v21 }
0x1d38   :  { %v1597_v55 = vadd.f32 %v1595_v51, %v1589_v53 }
0x1d39   :  { %v1591_v7 = vadd.f32 %v1560_v5, %v1555_v33 }
0x1d3b   :  { %v1563_v25 = vpop.permute.xlu1 %1562 }
0x1d3c   :  { %v1565_v34 = vmul.f32 %v1563_v25, %v2528_v26 }
0x1d40   :  { %v1568_v61 = vpop.permute.xlu1 %1567 }
0x1d41   :  { %v1570_v35 = vmul.f32 %v1568_v61, %v2531_v27 }
0x1d43   :  { %v1592_v41 = vadd.f32 %v1570_v35, %v1565_v34 }
0x1d45   :  { %v1578_v20 = vpop.permute.xlu1 %1577  ;;  %v1598_v48 = vadd.f32 %v1592_v41, %v1591_v7  ;;  %v2979_v41 = vld [vmem:[%s3053_s1 + $0x68] sm:$0xff] }
0x1d46   :  { %v1580_v49 = vmul.f32 %v1578_v20, %v2708_v32 }
0x1d47   :  { %v1601_v47 = vrot.slane %v1598_v48, 7 }
0x1d48   :  { %v1593_v54 = vadd.f32 %v1580_v49, %v1575_v8 }
0x1d49   :  { %v1603_v29 = vadd.f32 %v1601_v47, %v1597_v55 }
0x1d4a   :  { %v1583_v52 = vpop.permute.xlu1 %1582 }
0x1d4b   :  { %v1585_v57 = vmul.f32 %v1583_v52, %v2677_v2  ;;  %v1616_v2 = vrot.slane %v2932_v1, 7 }
0x1d4d   :  { %v1599_v38 = vadd.f32 %v1593_v54, %v1585_v57 }
0x1d4f   :  { %v1605_v62 = vrot.slane %v1599_v38, 7 }
0x1d51   :  { %v1607_v46 = vadd.f32 %v1605_v62, %v1603_v29 }
0x1d53   :  { %2343 = vtanh.f32 %v1607_v46  ;;  %v1964_v56 = vmul.f32 -1.442695, %v1607_v46 }
0x1d55   :  { %2345 = vpow2.f32 %v1964_v56 }
0x1d5d   :  { %v2344_v63 = vpop.eup %2343 }
0x1d5e   :  { %1620 = vrot.lane.b32.xlu0 %v2344_v63, %s2405_s20 }
0x1d5f   :  { %v2346_v0 = vpop.eup %2345 }
0x1d60   :  { %v1611_v50 = vadd.f32 1.0, %v2346_v0 }
0x1d62   :  { %2347 = vrcp.f32 %v1611_v50 }
0x1d6c   :  { %v2348_v3 = vpop.eup %2347 }
0x1d6d   :  { %v1618_v60 = vmul.f32 %v2348_v3, %v1616_v2 }
0x1dd0   :  { %v1621_v6 = vpop.permute.xlu0 %1620 }
0x1dd1   :  { %v1623_v4 = vmul.f32 %v2348_v3, %v1621_v6 }
0x1dd3   :  { %1625 = vrot.lane.b32.xlu1 %v1623_v4, %s2406_s21 }
0x1e45   :  { %v1626_v10 = vpop.permute.xlu1 %1625 }
0x1e46   :  { %v2960_v39 = vadd.f32 %v1626_v10, %v1618_v60 }
0x1e48   :  { %2349 = vtanh.f32 %v2960_v39 }
0x1e52   :  { %v2350_v19 = vpop.eup %2349 }
0x1e53   :  { %1631 = vrot.lane.b32.xlu0 %v2350_v19, %s2406_s21 }
0x1ec5   :  { %v1632_v25 = vpop.permute.xlu0 %1631 }
0x1ec6   :  { %v1634_v30 = vmul.f32 %v2348_v3, %v1632_v25 }
0x1ec8   :  { %1642 = vperm.xlu0 %2209, %v1634_v30   ;;  %1637 = vperm.xlu1 %2208, %v1634_v30  }
0x1ecc   :  { %2212 = vset.pattern.permute.xlu0 %v2411_v13  ;;  %2210 = vset.pattern.permute.xlu1 %v2409_v11 }
0x1ecd   :  { %1657 = vperm.xlu0 %2212, %v1634_v30   ;;  %1647 = vperm.xlu1 %2210, %v1634_v30  }
0x1ed1   :  { %2215 = vset.pattern.permute.xlu0 %v2415_v17  ;;  %2211 = vset.pattern.permute.xlu1 %v2410_v12 }
0x1ed2   :  { %1672 = vperm.xlu0 %2215, %v1634_v30   ;;  %1652 = vperm.xlu1 %2211, %v1634_v30  }
0x1ed6   :  { %2213 = vset.pattern.permute.xlu1 %v2413_v15  ;;  %2219 = vset.pattern.permute.xlu0 %v2408_v59 }
0x1ed7   :  { %1662 = vperm.xlu1 %2213, %v1634_v30  }
0x1edb   :  { %2214 = vset.pattern.permute.xlu1 %v2412_v14 }
0x1edc   :  { %1667 = vperm.xlu1 %2214, %v1634_v30  }
0x1ee0   :  { %2216 = vset.pattern.permute.xlu1 %v2416_v18 }
0x1ee1   :  { %1677 = vperm.xlu1 %2216, %v1634_v30  }
0x1ee5   :  { %2217 = vset.pattern.permute.xlu1 %v2414_v16 }
0x1ee6   :  { %1682 = vperm.xlu1 %2217, %v1634_v30  }
0x1eea   :  { %2218 = vset.pattern.permute.xlu1 %v2407_v9 }
0x1f47   :  { %v1638_v1 = vpop.permute.xlu1 %1637  ;;  %v1643_v33 = vpop.permute.xlu0 %1642 }
0x1f48   :  { %v1645_v20 = vmul.f32 %v1643_v33, %v2519_v22  ;;  %v1640_v31 = vmul.f32 %v1638_v1, %v2516_v21 }
0x1f4a   :  { %v1687_v53 = vrot.slane %v1640_v31, 7 }
0x1f4c   :  { %v1648_v61 = vpop.permute.xlu1 %1647  ;;  %v1658_v35 = vpop.permute.xlu0 %1657  ;;  %v1689_v29 = vadd.f32 %v1687_v53, %v2555_v43 }
0x1f4d   :  { %v1650_v40 = vmul.f32 %v1648_v61, %v2525_v24  ;;  %v1660_v45 = vmul.f32 %v1658_v35, %v2534_v28 }
0x1f4f   :  { %v1690_v49 = vadd.f32 %v1650_v40, %v1645_v20 }
0x1f51   :  { %v1653_v36 = vpop.permute.xlu1 %1652  ;;  %v1673_v52 = vpop.permute.xlu0 %1672  ;;  %v1695_v57 = vrot.slane %v1690_v49, 7 }
0x1f52   :  { %v1655_v5 = vmul.f32 %v1653_v36, %v2522_v23  ;;  %v1675_v55 = vmul.f32 %v1673_v52, %v2531_v27 }
0x1f53   :  { %v1697_v56 = vadd.f32 %v1695_v57, %v1689_v29 }
0x1f54   :  { %v1691_v51 = vadd.f32 %v1660_v45, %v1655_v5 }
0x1f56   :  { %v1663_v34 = vpop.permute.xlu1 %1662 }
0x1f57   :  { %v1665_v42 = vmul.f32 %v2979_v41, %v1663_v34 }
0x1f5b   :  { %v1668_v37 = vpop.permute.xlu1 %1667 }
0x1f5c   :  { %v1670_v7 = vmul.f32 %v1668_v37, %v2528_v26 }
0x1f5e   :  { %v1692_v48 = vadd.f32 %v1670_v7, %v1665_v42 }
0x1f60   :  { %v1678_v8 = vpop.permute.xlu1 %1677  ;;  %v1698_v47 = vadd.f32 %v1692_v48, %v1691_v51 }
0x1f61   :  { %v1680_v54 = vmul.f32 %v1678_v8, %v2739_v44 }
0x1f62   :  { %v1701_v62 = vrot.slane %v1698_v47, 7 }
0x1f63   :  { %v1693_v46 = vadd.f32 %v1680_v54, %v1675_v55 }
0x1f64   :  { %v1703_v50 = vadd.f32 %v1701_v62, %v1697_v56 }
0x1f65   :  { %v1683_v38 = vpop.permute.xlu1 %1682 }
0x1f66   :  { %v1685_v63 = vmul.f32 %v1683_v38, %v2708_v32  ;;  %v1716_v32 = vrot.slane %v2960_v39, 7 }
0x1f68   :  { %v1699_v0 = vadd.f32 %v1693_v46, %v1685_v63 }
0x1f6a   :  { %v1705_v3 = vrot.slane %v1699_v0, 7 }
0x1f6c   :  { %v1707_v6 = vadd.f32 %v1705_v3, %v1703_v50 }
0x1f6e   :  { %2351 = vtanh.f32 %v1707_v6  ;;  %v1965_v2 = vmul.f32 -1.442695, %v1707_v6 }
0x1f70   :  { %2353 = vpow2.f32 %v1965_v2 }
0x1f78   :  { %v2352_v4 = vpop.eup %2351 }
0x1f79   :  { %1720 = vrot.lane.b32.xlu0 %v2352_v4, %s2405_s20 }
0x1f7a   :  { %v2354_v60 = vpop.eup %2353 }
0x1f7b   :  { %v1711_v10 = vadd.f32 1.0, %v2354_v60 }
0x1f7d   :  { %2355 = vrcp.f32 %v1711_v10 }
0x1f87   :  { %v2356_v19 = vpop.eup %2355 }
0x1f88   :  { %v1718_v1 = vmul.f32 %v2356_v19, %v1716_v32 }
0x1feb   :  { %v1721_v25 = vpop.permute.xlu0 %1720 }
0x1fec   :  { %v1723_v30 = vmul.f32 %v2356_v19, %v1721_v25 }
0x1fee   :  { %1725 = vrot.lane.b32.xlu1 %v1723_v30, %s2406_s21 }
0x2060   :  { %v1726_v61 = vpop.permute.xlu1 %1725 }
0x2061   :  { %v2993_v36 = vadd.f32 %v1726_v61, %v1718_v1 }
0x2063   :  { %2357 = vtanh.f32 %v2993_v36 }
0x206d   :  { %v2358_v33 = vpop.eup %2357 }
0x206e   :  { %1731 = vrot.lane.b32.xlu0 %v2358_v33, %s2406_s21 }
0x20e0   :  { %v1732_v34 = vpop.permute.xlu0 %1731 }
0x20e1   :  { %v1734_v35 = vmul.f32 %v2356_v19, %v1732_v34 }
0x20e3   :  { %1742 = vperm.xlu0 %2219, %v1734_v35   ;;  %1737 = vperm.xlu1 %2218, %v1734_v35  }
0x20e7   :  { %2222 = vset.pattern.permute.xlu0 %v2411_v13  ;;  %2220 = vset.pattern.permute.xlu1 %v2409_v11 }
0x20e8   :  { %1757 = vperm.xlu0 %2222, %v1734_v35   ;;  %1747 = vperm.xlu1 %2220, %v1734_v35  }
0x20ec   :  { %2225 = vset.pattern.permute.xlu0 %v2415_v17  ;;  %2221 = vset.pattern.permute.xlu1 %v2410_v12 }
0x20ed   :  { %1772 = vperm.xlu0 %2225, %v1734_v35   ;;  %1752 = vperm.xlu1 %2221, %v1734_v35  }
0x20f1   :  { %2223 = vset.pattern.permute.xlu1 %v2413_v15  ;;  %2229 = vset.pattern.permute.xlu0 %v2408_v59 }
0x20f2   :  { %1762 = vperm.xlu1 %2223, %v1734_v35  }
0x20f6   :  { %2224 = vset.pattern.permute.xlu1 %v2412_v14 }
0x20f7   :  { %1767 = vperm.xlu1 %2224, %v1734_v35  }
0x20fb   :  { %2226 = vset.pattern.permute.xlu1 %v2416_v18 }
0x20fc   :  { %1777 = vperm.xlu1 %2226, %v1734_v35  }
0x2100   :  { %2227 = vset.pattern.permute.xlu1 %v2414_v16 }
0x2101   :  { %1782 = vperm.xlu1 %2227, %v1734_v35  }
0x2105   :  { %2228 = vset.pattern.permute.xlu1 %v2407_v9 }
0x2162   :  { %v1738_v39 = vpop.permute.xlu1 %1737  ;;  %v1743_v5 = vpop.permute.xlu0 %1742 }
0x2163   :  { %v1745_v49 = vmul.f32 %v1743_v5, %v2516_v21  ;;  %v1740_v51 = vmul.f32 %v1738_v39, %v2531_v27 }
0x2165   :  { %v1787_v57 = vrot.slane %v1740_v51, 7 }
0x2167   :  { %v1748_v37 = vpop.permute.xlu1 %1747  ;;  %v1758_v7 = vpop.permute.xlu0 %1757 }
0x2168   :  { %v1750_v59 = vmul.f32 %v1748_v37, %v2519_v22  ;;  %v1760_v9 = vmul.f32 %v1758_v7, %v2522_v23 }
0x216a   :  { %v1790_v52 = vadd.f32 %v1750_v59, %v1745_v49 }
0x216c   :  { %v1753_v40 = vpop.permute.xlu1 %1752  ;;  %v1773_v54 = vpop.permute.xlu0 %1772 }
0x216d   :  { %v1755_v31 = vmul.f32 %v1753_v40, %v2525_v24  ;;  %v1795_v24 = vrot.slane %v1790_v52, 7 }
0x216f   :  { %v1791_v53 = vadd.f32 %v1760_v9, %v1755_v31 }
0x2171   :  { %v1763_v42 = vpop.permute.xlu1 %1762 }
0x2172   :  { %v1765_v45 = vmul.f32 %v1763_v42, %v2534_v28  ;;  %v1775_v28 = vmul.f32 %v1773_v54, %v2528_v26 }
0x2176   :  { %v1768_v20 = vpop.permute.xlu1 %1767 }
0x2177   :  { %v1770_v48 = vmul.f32 %v2979_v41, %v1768_v20  ;;  %v1789_v41 = vadd.f32 %v1787_v57, %v2555_v43 }
0x2179   :  { %v1792_v8 = vadd.f32 %v1770_v48, %v1765_v45  ;;  %v1797_v23 = vadd.f32 %v1795_v24, %v1789_v41 }
0x217b   :  { %v1778_v47 = vpop.permute.xlu1 %1777  ;;  %v1798_v55 = vadd.f32 %v1792_v8, %v1791_v53 }
0x217c   :  { %v1780_v22 = vmul.f32 %v1778_v47, %v2780_v58  ;;  %v1837_v47 = vld [vmem:[%s3053_s1 + $0xa8] sm:$0x1] }
0x217d   :  { %v1801_v21 = vrot.slane %v1798_v55, 7 }
0x217e   :  { %v1793_v29 = vadd.f32 %v1780_v22, %v1775_v28 }
0x217f   :  { %v1803_v46 = vadd.f32 %v1801_v21, %v1797_v23 }
0x2180   :  { %v1783_v38 = vpop.permute.xlu1 %1782 }
0x2181   :  { %v1785_v27 = vmul.f32 %v1783_v38, %v2739_v44  ;;  %v1816_v44 = vrot.slane %v2993_v36, 7 }
0x2183   :  { %v1799_v62 = vadd.f32 %v1793_v29, %v1785_v27 }
0x2185   :  { %v1805_v63 = vrot.slane %v1799_v62, 7 }
0x2187   :  { %v1807_v56 = vadd.f32 %v1805_v63, %v1803_v46 }
0x2189   :  { %2359 = vtanh.f32 %v1807_v56  ;;  %v1966_v58 = vmul.f32 -1.442695, %v1807_v56 }
0x218b   :  { %2361 = vpow2.f32 %v1966_v58 }
0x2193   :  { %v2360_v0 = vpop.eup %2359 }
0x2194   :  { %1820 = vrot.lane.b32.xlu0 %v2360_v0, %s2405_s20 }
0x2195   :  { %v2362_v50 = vpop.eup %2361 }
0x2196   :  { %v1811_v26 = vadd.f32 1.0, %v2362_v50 }
0x2198   :  { %2363 = vrcp.f32 %v1811_v26 }
0x21a2   :  { %v2364_v3 = vpop.eup %2363 }
0x21a3   :  { %v1818_v4 = vmul.f32 %v2364_v3, %v1816_v44 }
0x2206   :  { %v1821_v43 = vpop.permute.xlu0 %1820 }
0x2207   :  { %v1823_v6 = vmul.f32 %v2364_v3, %v1821_v43 }
0x2209   :  { %1825 = vrot.lane.b32.xlu1 %v1823_v6, %s2406_s21 }
0x227b   :  { %v1826_v2 = vpop.permute.xlu1 %1825 }
0x227c   :  { %v1828_v60 = vadd.f32 %v1826_v2, %v1818_v4 }
0x227e   :  { %2365 = vtanh.f32 %v1828_v60 }
0x2288   :  { %v2366_v10 = vpop.eup %2365 }
0x2289   :  { %1831 = vrot.lane.b32.xlu0 %v2366_v10, %s2406_s21 }
0x22fb   :  { %v1832_v19 = vpop.permute.xlu0 %1831 }
0x22fc   :  { %v1834_v25 = vmul.f32 %v2364_v3, %v1832_v19 }
0x22fe   :  { %1848 = vperm.xlu0 %2229, %v1834_v25   ;;  %1840 = vperm.xlu1 %2228, %v1834_v25  }
0x2302   :  { %2232 = vset.pattern.permute.xlu0 %v2411_v13  ;;  %2230 = vset.pattern.permute.xlu1 %v2409_v11 }
0x2303   :  { %1869 = vperm.xlu0 %2232, %v1834_v25   ;;  %1855 = vperm.xlu1 %2230, %v1834_v25  }
0x2307   :  { %2235 = vset.pattern.permute.xlu0 %v2415_v17  ;;  %2231 = vset.pattern.permute.xlu1 %v2410_v12 }
0x2308   :  { %1890 = vperm.xlu0 %2235, %v1834_v25   ;;  %1862 = vperm.xlu1 %2231, %v1834_v25  }
0x230c   :  { %2233 = vset.pattern.permute.xlu1 %v2413_v15  ;;  %2238 = vset.pattern.permute.xlu0 %v2414_v16  ;;  %v1835_v15 = vld [vmem:[%s3053_s1 + $0x98] sm:$0xff] }
0x230d   :  { %1876 = vperm.xlu1 %2233, %v1834_v25   ;;  %v1858_v32 = vrot.slane %v1835_v15, 3  ;;  %v1865_v1 = vrot.slane %v1835_v15, 4  ;;  %v1879_v61 = vrot.slane %v1835_v15, 6  ;;  %v1851_v36 = vrot.slane %v1835_v15, 2 }
0x230e   :  { %v1844_v33 = vrot.slane %v1835_v15, 1 }
0x2311   :  { %2234 = vset.pattern.permute.xlu1 %v2412_v14  ;;  %v1886_v14 = vrot.slane %v1835_v15, 7 }
0x2312   :  { %1883 = vperm.xlu1 %2234, %v1834_v25  }
0x2316   :  { %2236 = vset.pattern.permute.xlu1 %v2416_v18  ;;  %v1872_v18 = vrot.slane %v1835_v15, 5 }
0x2317   :  { %1895 = vperm.xlu1 %2236, %v1834_v25  }
0x231b   :  { %2237 = vset.pattern.permute.xlu1 %v2414_v16  ;;  %v1836_v16 = vld [vmem:[%s3053_s1 + $0xa0] sm:$0x3]  ;;  %s2374_s1 = scalar_lea.vmem %s1940_s7, 32 }
0x231c   :  { %1903 = vperm.xlu1 %2237, %v1834_v25   ;;  %v1899_v42 = vrot.slane %v1836_v16, 1  ;;  %v1906_v53 = vrot.slane %v1836_v16, 2  ;;  %p2376_p2 = scmp.lt.s32.totalorder %s2374_s1, %s2370_s8 }
0x231e   :  { %p2377_p3 = por %p2376_p2, %p2375_p1 }
0x2320   :  { %p2378_p4 = pnand %p2377_p3, %p2371_p0 }
0x237d   :  { %v1841_v11 = vpop.permute.xlu1 %1840  ;;  %v1849_v12 = vpop.permute.xlu0 %1848 }
0x237e   :  { %v1853_v7 = vmul.f32 %v1851_v36, %v1849_v12  ;;  %v1846_v20 = vmul.f32 %v1844_v33, %v1841_v11 }
0x2380   :  { %v1910_v9 = vrot.slane %v1846_v20, 7 }
0x2382   :  { %v1856_v13 = vpop.permute.xlu1 %1855  ;;  %v1870_v34 = vpop.permute.xlu0 %1869  ;;  %v1912_v22 = vadd.f32 %v1910_v9, %v1837_v47 }
0x2383   :  { %v1860_v39 = vmul.f32 %v1858_v32, %v1856_v13  ;;  %v1874_v59 = vmul.f32 %v1872_v18, %v1870_v34 }
0x2385   :  { %v1913_v45 = vadd.f32 %v1860_v39, %v1853_v7 }
0x2387   :  { %v1863_v17 = vpop.permute.xlu1 %1862  ;;  %v1891_v51 = vpop.permute.xlu0 %1890  ;;  %v1918_v54 = vrot.slane %v1913_v45, 7 }
0x2388   :  { %v1867_v37 = vmul.f32 %v1865_v1, %v1863_v17  ;;  %v1893_v57 = vmul.f32 %v1891_v51, %v1835_v15 }
0x2389   :  { %v1920_v41 = vadd.f32 %v1918_v54, %v1912_v22 }
0x238a   :  { %v1914_v48 = vadd.f32 %v1874_v59, %v1867_v37 }
0x238c   :  { %v1877_v30 = vpop.permute.xlu1 %1876 }
0x238d   :  { %v1881_v40 = vmul.f32 %v1879_v61, %v1877_v30 }
0x2391   :  { %v1884_v35 = vpop.permute.xlu1 %1883 }
0x2392   :  { %v1888_v5 = vmul.f32 %v1886_v14, %v1884_v35 }
0x2394   :  { %v1915_v31 = vadd.f32 %v1888_v5, %v1881_v40 }
0x2396   :  { %v1896_v49 = vpop.permute.xlu1 %1895  ;;  %v1921_v8 = vadd.f32 %v1915_v31, %v1914_v48 }
0x2397   :  { %v1901_v52 = vmul.f32 %v1899_v42, %v1896_v49 }
0x2398   :  { %v1924_v24 = vrot.slane %v1921_v8, 7 }
0x2399   :  { %v1916_v28 = vadd.f32 %v1901_v52, %v1893_v57 }
0x239a   :  { %v1926_v27 = vadd.f32 %v1924_v24, %v1920_v41 }
0x239b   :  { %v1904_v55 = vpop.permute.xlu1 %1903 }
0x239c   :  { %v1908_v38 = vmul.f32 %v1906_v53, %v1904_v55 }
0x239e   :  { %v1922_v21 = vadd.f32 %v1916_v28, %v1908_v38 }
0x23a0   :  { %v1928_v29 = vrot.slane %v1922_v21, 7 }
0x23a2   :  { %v1930_v23 = vadd.f32 %v1928_v29, %v1926_v27 }
0x23a4   :  { %1932 = vst.msk [vmem:[#allocation2] sm:$0x1] %vm1931_vm3, %v1930_v23 }
0x23a5   :  { %2381 = shalt.err (!%p2378_p4)
}
0x23a6   :  { %s2382_s11 = scalar_lea.hbm %s3054_s2, 16 }
0x23a7   :  { %p2383_p5 = scmp.ne.s32.totalorder %s3054_s2, %s2382_s11  ;;  %p2386_p6 = scmp.lt.u32.totalorder %s2382_s11, %s3054_s2 }
0x23a9   :  { %p2388_p7 = pnand %p2386_p6, %p2383_p5 }
0x23ab   :  { %2391 = shalt.err (!%p2388_p7)
}
0x23ac   :  { %1942 = dma.vmem_to_hbm [thread:$0]  %s1940_s7, 16, %s3054_s2, [#allocation3]  }
0x23ad   :  { %2392 = dma.done.wait [#allocation3], 16  }
0x23ae   :  { %2393 = vsyncadd [#allocation3], 4294967280 }
0x23af   :  { %1946 = vsyncpa [#allocation3], 1 }

</bundles_post_ra>
